<compile_context>
chip_gen: v7x
topology: tpu7x:2x2x1
jax: 0.10.0
libtpu: 0.0.40
codegen_flags: <defaults>
</compile_context>

<pallas_src>
import functools

import jax
import jax.numpy as jnp
from jax.experimental import pallas as pl
from jax.experimental.pallas import tpu as pltpu


def _round_up(a, b):
    return ((a + b - 1) // b) * b


def _choose_spatial_tile(s, c, itemsize, override=None,
                         budget_bytes=2 * 1024 * 1024, max_lanes=8192):
    """Largest lane-dense (multiple of 128) spatial tile within a per-tile byte budget."""
    s_lanes = _round_up(s, 128)
    if override is not None:
        return max(128, min(_round_up(int(override), 128), s_lanes))
    lanes_by_budget = max(128, (budget_bytes // max(1, c * itemsize)) // 128 * 128)
    return max(128, min(s_lanes, max_lanes, lanes_by_budget))


# ---------------- Pass 1: global average pool over the (tiled) spatial axis ----------------

def _pool_kernel(x_ref, pooled_ref, *, inv_s, s_total, ts, need_mask):
    s_idx = pl.program_id(1)
    x = x_ref[0].astype(jnp.float32)                        # (C, TS), f32 accumulation
    if need_mask:
        # Remainder tile: zero out the out-of-range lanes (reads there are undefined).
        lane = jax.lax.broadcasted_iota(jnp.int32, x.shape, 1)
        valid = s_total - s_idx * ts
        x = jnp.where(lane < valid, x, 0.0)
    part = jnp.sum(x, axis=1, keepdims=True)                # (C, 1) partial sum

    @pl.when(s_idx == 0)
    def _():
        pooled_ref[0] = part

    @pl.when(s_idx > 0)
    def _():
        pooled_ref[0] += part

    @pl.when(s_idx == pl.num_programs(1) - 1)
    def _():
        pooled_ref[0] = pooled_ref[0] * inv_s


# ---------------- Pass 2: apply channel (precomputed) + spatial attention ----------------

def _apply_kernel(x_ref, catt_ref, ws_ref, bs_ref, o_ref, *, use_mxu):
    x = x_ref[0]                                            # (C, TS), input dtype

    # sSE 1x1x1 conv: s_pre[s] = sum_c ws[c] * x[c, s] + bs, accumulated in f32.
    if use_mxu:
        # Low-precision inputs: push the matvec onto the otherwise idle MXU.
        s_pre = jnp.dot(ws_ref[...], x, preferred_element_type=jnp.float32)   # (1, TS)
    else:
        # f32 inputs: exact VPU multiply + sublane reduce (strict parity with ref).
        s_pre = jnp.sum(ws_ref[...] * x.astype(jnp.float32), axis=0, keepdims=True)
    s_pre = s_pre + bs_ref[0]                               # SMEM scalar bias

    s_att = pl.reciprocal(1.0 + jnp.exp(-s_pre))            # (1, TS) f32, exact sigmoid

    # x * cSE(x) + x * sSE(x) == x * (c_att + s_att): one add + one mul per element,
    # computed/stored in the input dtype (bf16 stays bf16).
    att = catt_ref[0].astype(x.dtype) + s_att.astype(x.dtype)   # (C, TS) via broadcast
    o_ref[0] = x * att


@functools.partial(jax.jit, static_argnames=("spatial_tile",))
def scse_forward(x, w1, b1, w2, b2, ws, bs, *, spatial_tile=None):
    """x: (N, C, D, H, W). Weights follow PyTorch Conv3d 1x1x1 shapes (squeezed)."""
    N, C, D, H, W = x.shape
    S = D * H * W
    f32 = jnp.float32

    TS = _choose_spatial_tile(S, C, x.dtype.itemsize, spatial_tile)
    n_s = pl.cdiv(S, TS)
    need_mask = (S % TS) != 0

    x2 = x.reshape(N, C, S)                                  # contiguous view, no copy

    tile_bytes = C * TS * x.dtype.itemsize
    # Double-buffered in + out tiles plus in-kernel f32 temporaries; safe on all gens.
    vmem_limit = int(min(48 * 1024 * 1024, max(24 * 1024 * 1024, 10 * tile_bytes)))

    # ---- Pass 1: pooled[n, c] = mean_s x[n, c, s] ----
    pooled = pl.pallas_call(
        functools.partial(_pool_kernel, inv_s=1.0 / float(S), s_total=S, ts=TS,
                          need_mask=need_mask),
        out_shape=jax.ShapeDtypeStruct((N, C, 1), f32),
        grid_spec=pltpu.PrefetchScalarGridSpec(
            num_scalar_prefetch=0,
            grid=(N, n_s),
            in_specs=[pl.BlockSpec((1, C, TS), lambda n, s: (n, 0, s))],
            out_specs=pl.BlockSpec((1, C, 1), lambda n, s: (n, 0, 0)),
        ),
        compiler_params=pltpu.CompilerParams(
            dimension_semantics=("parallel", "arbitrary"),
            vmem_limit_bytes=vmem_limit),
    )(x2)

    # ---- cSE MLP on the pooled (N, C) vector: tiny, hoisted out of the Pallas hot loop ----
    p = pooled[:, :, 0]                                                        # (N, C) f32
    h = jnp.maximum(p @ w1.astype(f32).T + b1.astype(f32), 0.0)               # (N, C/r)
    c_pre = h @ w2.astype(f32).T + b2.astype(f32)                             # (N, C)
    c_att = jax.nn.sigmoid(c_pre).reshape(N, C, 1)                            # (N, C, 1) f32

    # ---- sSE weight layout + dtype path selection (trace-time) ----
    use_mxu = x.dtype != f32
    if use_mxu:
        ws_arr = ws.reshape(1, C).astype(x.dtype)            # lhs row for MXU matvec
        ws_spec = pl.BlockSpec((1, C), lambda n, s: (0, 0))
    else:
        ws_arr = ws.reshape(C, 1).astype(f32)                # broadcast column for VPU
        ws_spec = pl.BlockSpec((C, 1), lambda n, s: (0, 0))
    bs_s = bs.reshape(1).astype(f32)                         # scalar bias -> SMEM

    # ---- Pass 2: apply attention, grid (N, S_tiles), fully parallel ----
    out = pl.pallas_call(
        functools.partial(_apply_kernel, use_mxu=use_mxu),
        out_shape=jax.ShapeDtypeStruct((N, C, S), x.dtype),
        grid_spec=pltpu.PrefetchScalarGridSpec(
            num_scalar_prefetch=0,
            grid=(N, n_s),
            in_specs=[
                pl.BlockSpec((1, C, TS), lambda n, s: (n, 0, s)),      # x tile
                pl.BlockSpec((1, C, 1), lambda n, s: (n, 0, 0)),       # c_att (const over s)
                ws_spec,                                               # sSE weight (const)
                pl.BlockSpec(memory_space=pltpu.MemorySpace.SMEM),     # sSE bias scalar
            ],
            out_specs=pl.BlockSpec((1, C, TS), lambda n, s: (n, 0, s)),
        ),
        compiler_params=pltpu.CompilerParams(
            dimension_semantics=("parallel", "parallel"),
            vmem_limit_bytes=vmem_limit),
    )(x2, c_att, ws_arr, bs_s)

    return out.reshape(N, C, D, H, W)


def scse_ref(x, w1, b1, w2, b2, ws, bs):
    """Pure-JAX reference matching the PyTorch module semantics."""
    pooled = x.mean(axis=(2, 3, 4), keepdims=True)                    # (N,C,1,1,1)
    h = jnp.einsum('rc,ncdhw->nrdhw', w1, pooled) + b1[None, :, None, None, None]
    h = jax.nn.relu(h)
    c = jax.nn.sigmoid(jnp.einsum('cr,nrdhw->ncdhw', w2, h)
                       + b2[None, :, None, None, None])
    s = jax.nn.sigmoid(jnp.einsum('oc,ncdhw->nodhw', ws, x)
                       + bs[None, :, None, None, None])
    return x * c + x * s


if __name__ == "__main__":
    # Small shapes consistent with the module: in_channels=32, reduction=16 -> hidden=2.
    N, C, D, H, W = 2, 32, 16, 16, 16
    reduction = 16
    Cr = C // reduction

    key = jax.random.PRNGKey(0)
    kx, k1, k2, k3, k4, k5, k6 = jax.random.split(key, 7)

    x = jax.random.normal(kx, (N, C, D, H, W), dtype=jnp.float32)

    # Deterministic synthetic parameters (PyTorch Conv3d 1x1x1 weights, squeezed).
    w1 = jax.random.normal(k1, (Cr, C), dtype=jnp.float32) * 0.2   # cSE conv1 weight
    b1 = jax.random.normal(k2, (Cr,), dtype=jnp.float32) * 0.1     # cSE conv1 bias
    w2 = jax.random.normal(k3, (C, Cr), dtype=jnp.float32) * 0.2   # cSE conv2 weight
    b2 = jax.random.normal(k4, (C,), dtype=jnp.float32) * 0.1      # cSE conv2 bias
    ws = jax.random.normal(k5, (1, C), dtype=jnp.float32) * 0.2    # sSE conv weight
    bs = jax.random.normal(k6, (1,), dtype=jnp.float32) * 0.1      # sSE conv bias

    ref = scse_ref(x, w1, b1, w2, b2, ws, bs)

    # Default adaptive tiling (single lane-dense tile per sample at this size).
    out = jax.block_until_ready(scse_forward(x, w1, b1, w2, b2, ws, bs))
    assert out.shape == ref.shape == (N, C, D, H, W)
    assert jnp.allclose(out, ref, rtol=1e-4, atol=1e-4), "Pallas output mismatch vs reference"

    # Forced smaller tile: exercises the multi-step spatial pipeline and the
    # resident-accumulator pooling path.
    out_tiled = jax.block_until_ready(
        scse_forward(x, w1, b1, w2, b2, ws, bs, spatial_tile=512))
    assert jnp.allclose(out_tiled, ref, rtol=1e-4, atol=1e-4), "tiled path mismatch vs reference"

    print("KERNEL_OK")
</pallas_src>

<mosaic_0001>
module attributes {stable_mosaic.version = 11 : i64} {
  func.func @_pool_kernel(%arg0: i32, %arg1: i32, %arg2: memref<1x32x4096xf32, #tpu.memory_space<vmem>>, %arg3: memref<1x32x1xf32, #tpu.memory_space<vmem>>) attributes {dimension_semantics = [#tpu.dimension_semantics<parallel>, #tpu.dimension_semantics<arbitrary>], iteration_bounds = array<i64: 2, 1>, scalar_prefetch = 0 : i64, scratch_operands = 0 : i64, tpu.core_type = #tpu.core_type<tc>, window_params = [{transform_indices = @transform_0, window_bounds = array<i64: 1, 32, 4096>}, {transform_indices = @transform_1, window_bounds = array<i64: 1, 32, 1>}]} {
    %c0 = arith.constant 0 : index
    %c0_0 = arith.constant 0 : index
    %c0_1 = arith.constant 0 : index
    %0 = vector.load %arg2[%c0, %c0_0, %c0_1] : memref<1x32x4096xf32, #tpu.memory_space<vmem>>, vector<1x32x4096xf32>
    %1 = vector.shape_cast %0 : vector<1x32x4096xf32> to vector<32x4096xf32>
    %cst = arith.constant dense<0.000000e+00> : vector<32xf32>
    %2 = vector.multi_reduction <add>, %1, %cst [1] : vector<32x4096xf32> to vector<32xf32>
    %3 = vector.shape_cast %2 : vector<32xf32> to vector<32x1xf32>
    %c0_i32 = arith.constant 0 : i32
    %4 = arith.cmpi eq, %arg1, %c0_i32 : i32
    %5 = arith.extui %4 : i1 to i32
    %c0_i32_2 = arith.constant 0 : i32
    %6 = arith.cmpi ne, %5, %c0_i32_2 : i32
    scf.if %6 {
      %c0_7 = arith.constant 0 : index
      %c0_8 = arith.constant 0 : index
      %c0_9 = arith.constant 0 : index
      %13 = vector.load %arg3[%c0_7, %c0_8, %c0_9] : memref<1x32x1xf32, #tpu.memory_space<vmem>>, vector<1x32x1xf32>
      %14 = vector.shape_cast %13 : vector<1x32x1xf32> to vector<32x1xf32>
      %15 = vector.shape_cast %3 : vector<32x1xf32> to vector<1x32x1xf32>
      tpu.vector_store %arg3[%c0_7, %c0_8, %c0_9], %15 {strides = array<i32>} : memref<1x32x1xf32, #tpu.memory_space<vmem>>, vector<1x32x1xf32>,
    } else {
    }
    %c0_i32_3 = arith.constant 0 : i32
    %7 = arith.cmpi sgt, %arg1, %c0_i32_3 : i32
    %8 = arith.extui %7 : i1 to i32
    %c0_i32_4 = arith.constant 0 : i32
    %9 = arith.cmpi ne, %8, %c0_i32_4 : i32
    scf.if %9 {
      %c0_7 = arith.constant 0 : index
      %c0_8 = arith.constant 0 : index
      %c0_9 = arith.constant 0 : index
      %13 = vector.load %arg3[%c0_7, %c0_8, %c0_9] : memref<1x32x1xf32, #tpu.memory_space<vmem>>, vector<1x32x1xf32>
      %14 = vector.shape_cast %13 : vector<1x32x1xf32> to vector<32x1xf32>
      %15 = arith.addf %14, %3 : vector<32x1xf32>
      %c0_10 = arith.constant 0 : index
      %c0_11 = arith.constant 0 : index
      %c0_12 = arith.constant 0 : index
      %16 = vector.load %arg3[%c0_10, %c0_11, %c0_12] : memref<1x32x1xf32, #tpu.memory_space<vmem>>, vector<1x32x1xf32>
      %17 = vector.shape_cast %16 : vector<1x32x1xf32> to vector<32x1xf32>
      %18 = vector.shape_cast %15 : vector<32x1xf32> to vector<1x32x1xf32>
      tpu.vector_store %arg3[%c0_10, %c0_11, %c0_12], %18 {strides = array<i32>} : memref<1x32x1xf32, #tpu.memory_space<vmem>>, vector<1x32x1xf32>,
    } else {
    }
    %c0_i32_5 = arith.constant 0 : i32
    %10 = arith.cmpi eq, %arg1, %c0_i32_5 : i32
    %11 = arith.extui %10 : i1 to i32
    %c0_i32_6 = arith.constant 0 : i32
    %12 = arith.cmpi ne, %11, %c0_i32_6 : i32
    scf.if %12 {
      %c0_7 = arith.constant 0 : index
      %c0_8 = arith.constant 0 : index
      %c0_9 = arith.constant 0 : index
      %13 = vector.load %arg3[%c0_7, %c0_8, %c0_9] : memref<1x32x1xf32, #tpu.memory_space<vmem>>, vector<1x32x1xf32>
      %14 = vector.shape_cast %13 : vector<1x32x1xf32> to vector<32x1xf32>
      %cst_10 = arith.constant 2.44140625E-4 : f32
      %15 = vector.broadcast %cst_10 : f32 to vector<32x1xf32>
      %16 = arith.mulf %14, %15 : vector<32x1xf32>
      %c0_11 = arith.constant 0 : index
      %c0_12 = arith.constant 0 : index
      %c0_13 = arith.constant 0 : index
      %17 = vector.load %arg3[%c0_11, %c0_12, %c0_13] : memref<1x32x1xf32, #tpu.memory_space<vmem>>, vector<1x32x1xf32>
      %18 = vector.shape_cast %17 : vector<1x32x1xf32> to vector<32x1xf32>
      %19 = vector.shape_cast %16 : vector<32x1xf32> to vector<1x32x1xf32>
      tpu.vector_store %arg3[%c0_11, %c0_12, %c0_13], %19 {strides = array<i32>} : memref<1x32x1xf32, #tpu.memory_space<vmem>>, vector<1x32x1xf32>,
    } else {
    }
    return
  }
  func.func @transform_0(%arg0: i32, %arg1: i32) -> (i32, i32, i32) {
    %c0_i32 = arith.constant 0 : i32
    %c0_i32_0 = arith.constant 0 : i32
    return %arg0, %c0_i32, %arg1 : i32, i32, i32
  }
  func.func @transform_1(%arg0: i32, %arg1: i32) -> (i32, i32, i32) {
    %c0_i32 = arith.constant 0 : i32
    %c0_i32_0 = arith.constant 0 : i32
    %c0_i32_1 = arith.constant 0 : i32
    return %arg0, %c0_i32, %c0_i32_0 : i32, i32, i32
  }
}

module attributes {stable_mosaic.version = 11 : i64} {
  func.func @_apply_kernel(%arg0: i32, %arg1: i32, %arg2: memref<1x32x4096xf32, #tpu.memory_space<vmem>>, %arg3: memref<1x32x1xf32, #tpu.memory_space<vmem>>, %arg4: memref<32x1xf32, #tpu.memory_space<vmem>>, %arg5: memref<1xf32, #tpu.memory_space<smem>>, %arg6: memref<1x32x4096xf32, #tpu.memory_space<vmem>>) attributes {dimension_semantics = [#tpu.dimension_semantics<parallel>, #tpu.dimension_semantics<parallel>], iteration_bounds = array<i64: 2, 1>, scalar_prefetch = 0 : i64, scratch_operands = 0 : i64, tpu.core_type = #tpu.core_type<tc>, window_params = [{transform_indices = @transform_0, window_bounds = array<i64: 1, 32, 4096>}, {transform_indices = @transform_1, window_bounds = array<i64: 1, 32, 1>}, {pipeline_mode = #tpu.pipeline_mode<synchronous>, transform_indices = @transform_2, window_bounds = array<i64: 32, 1>}, {transform_indices = @transform_3, window_bounds = array<i64: 1>}, {transform_indices = @transform_4, window_bounds = array<i64: 1, 32, 4096>}]} {
    %c0 = arith.constant 0 : index
    %c0_0 = arith.constant 0 : index
    %c0_1 = arith.constant 0 : index
    %0 = vector.load %arg2[%c0, %c0_0, %c0_1] : memref<1x32x4096xf32, #tpu.memory_space<vmem>>, vector<1x32x4096xf32>
    %1 = vector.shape_cast %0 : vector<1x32x4096xf32> to vector<32x4096xf32>
    %c0_2 = arith.constant 0 : index
    %c0_3 = arith.constant 0 : index
    %2 = vector.load %arg4[%c0_2, %c0_3] : memref<32x1xf32, #tpu.memory_space<vmem>>, vector<32x1xf32>
    %3 = vector.broadcast %2 : vector<32x1xf32> to vector<32x4096xf32>
    %4 = arith.mulf %3, %1 : vector<32x4096xf32>
    %cst = arith.constant dense<0.000000e+00> : vector<4096xf32>
    %5 = vector.multi_reduction <add>, %4, %cst [0] : vector<32x4096xf32> to vector<4096xf32>
    %6 = vector.shape_cast %5 : vector<4096xf32> to vector<1x4096xf32>
    %c0_4 = arith.constant 0 : index
    %7 = memref.load %arg5[%c0_4] : memref<1xf32, #tpu.memory_space<smem>>
    %8 = vector.broadcast %7 : f32 to vector<1x4096xf32>
    %9 = arith.addf %6, %8 : vector<1x4096xf32>
    %cst_5 = arith.constant 0.000000e+00 : f32
    %10 = vector.broadcast %cst_5 : f32 to vector<1x4096xf32>
    %11 = arith.subf %10, %9 : vector<1x4096xf32>
    %12 = math.exp %11 : vector<1x4096xf32>
    %cst_6 = arith.constant 1.000000e+00 : f32
    %13 = vector.broadcast %cst_6 : f32 to vector<1x4096xf32>
    %14 = arith.addf %13, %12 : vector<1x4096xf32>
    %15 = tpu.reciprocal %14 : vector<1x4096xf32> -> vector<1x4096xf32>
    %c0_7 = arith.constant 0 : index
    %c0_8 = arith.constant 0 : index
    %c0_9 = arith.constant 0 : index
    %16 = vector.load %arg3[%c0_7, %c0_8, %c0_9] : memref<1x32x1xf32, #tpu.memory_space<vmem>>, vector<1x32x1xf32>
    %17 = vector.shape_cast %16 : vector<1x32x1xf32> to vector<32x1xf32>
    %18 = vector.broadcast %17 : vector<32x1xf32> to vector<32x4096xf32>
    %19 = vector.broadcast %15 : vector<1x4096xf32> to vector<32x4096xf32>
    %20 = arith.addf %18, %19 : vector<32x4096xf32>
    %21 = arith.mulf %1, %20 : vector<32x4096xf32>
    %c0_10 = arith.constant 0 : index
    %c0_11 = arith.constant 0 : index
    %c0_12 = arith.constant 0 : index
    %22 = vector.load %arg6[%c0_10, %c0_11, %c0_12] : memref<1x32x4096xf32, #tpu.memory_space<vmem>>, vector<1x32x4096xf32>
    %23 = vector.shape_cast %22 : vector<1x32x4096xf32> to vector<32x4096xf32>
    %24 = vector.shape_cast %21 : vector<32x4096xf32> to vector<1x32x4096xf32>
    tpu.vector_store %arg6[%c0_10, %c0_11, %c0_12], %24 {strides = array<i32>} : memref<1x32x4096xf32, #tpu.memory_space<vmem>>, vector<1x32x4096xf32>,
    return
  }
  func.func @transform_0(%arg0: i32, %arg1: i32) -> (i32, i32, i32) {
    %c0_i32 = arith.constant 0 : i32
    %c0_i32_0 = arith.constant 0 : i32
    return %arg0, %c0_i32, %arg1 : i32, i32, i32
  }
  func.func @transform_1(%arg0: i32, %arg1: i32) -> (i32, i32, i32) {
    %c0_i32 = arith.constant 0 : i32
    %c0_i32_0 = arith.constant 0 : i32
    %c0_i32_1 = arith.constant 0 : i32
    return %arg0, %c0_i32, %c0_i32_0 : i32, i32, i32
  }
  func.func @transform_2(%arg0: i32, %arg1: i32) -> (i32, i32) {
    %c0_i32 = arith.constant 0 : i32
    %c0_i32_0 = arith.constant 0 : i32
    %c0_i32_1 = arith.constant 0 : i32
    return %c0_i32, %c0_i32_0 : i32, i32
  }
  func.func @transform_3(%arg0: i32, %arg1: i32) -> i32 {
    %c0_i32 = arith.constant 0 : i32
    %c0_i32_0 = arith.constant 0 : i32
    return %c0_i32 : i32
  }
  func.func @transform_4(%arg0: i32, %arg1: i32) -> (i32, i32, i32) {
    %c0_i32 = arith.constant 0 : i32
    %c0_i32_0 = arith.constant 0 : i32
    return %arg0, %c0_i32, %arg1 : i32, i32, i32
  }
}

</mosaic_0001>

<bundles_post_ra>
// kernel: scse_forward.2
= control target key start
LH: loop header
LB: loop body
LE: loop exit
PB: predicated region body
PF: predicated region fallthrough
CT: control target
= control target key end

     0   :  { %s587_s6 = smov 0   ;;  %s589_s7 = smov 0   ;;  %s762_s0 = inlined_call_operand.vmem [shape: f32[2,32,4096], index: 0, kind: input, shape index: {}]   ;;  %s763_s1 = inlined_call_operand.vmem [shape: f32[2,32,1], index: 1, kind: output, shape index: {}]  }
   0x1   :  { %s591_s8 = smov 0  }
   0x2 LB: > { %s23_s9 = sadd.s32 1, %s571_s7  ;;  %p520_p0 = scmp.ge.s32.totalorder %s575_s8, 1  ;;  %s575_s8 = sphi %s591_s8, %s11_s8   ;;  %s571_s7 = sphi %s589_s7, %s765_s7   ;;  %s567_s6 = sphi %s587_s6, %s764_s6  }
   0x3   : > { %p25_p1 = scmp.ge.s32.totalorder %s23_s9, 2  ;;  %p106_p2 = scmp.lt.s32.totalorder %s575_s8, 3 }
   0x5   : > { %s767_s9 = smov (%p25_p1, %s23_s9), 0  ;;  %p107_p3 = pnand %p520_p0, %p106_p2 }
   0x6   : > { %p131_p4 = scmp.lt.s32.totalorder (!%p107_p3), %s567_s6, 1  ;;  %vm409_vm0 = vcmask (!%p107_p3), 7168  }
   0x7   : > { %110 = sbr.rel (%p107_p3) target bundleno = 252 (0xfc), region = 24 }
   0xe   : > { %s769_s6 = smov (!%p131_p4, %s567_s6), 1 }
   0xf   : > { %s527_s10 = sshll.u32 %s769_s6, 10  ;;  %s528_s14 = sshll.u32 %s769_s6, 5 }
  0x10   : > { %s611_s13 = scalar_lea.vmem %s762_s0, %s527_s10  ;;  %s144_s17 = scalar_lea.vmem %s763_s1, %s528_s14 }
  0x11   : > { %v209_v0 = vld [vmem:[%s611_s13 + $0x200] sm:$0xff]  ;;  %v210_v1 = vld [vmem:[%s611_s13 + $0x208] sm:$0xff]  ;;  %v211_v2 = vld [vmem:[%s611_s13 + $0x210] sm:$0xff] }
  0x12   : > { %v339_v3 = vadd.f32 %v210_v1, %v209_v0  ;;  %v212_v4 = vld [vmem:[%s611_s13 + $0x218] sm:$0xff]  ;;  %v213_v6 = vld [vmem:[%s611_s13 + $0x220] sm:$0xff]  ;;  %v214_v8 = vld [vmem:[%s611_s13 + $0x228] sm:$0xff] }
  0x13   : > { %v215_v10 = vld [vmem:[%s611_s13 + $0x230] sm:$0xff]  ;;  %v216_v12 = vld [vmem:[%s611_s13 + $0x238] sm:$0xff]  ;;  %v145_v13 = vld [vmem:[%s611_s13] sm:$0xff] }
  0x14   : > { %v340_v5 = vadd.f32 %v339_v3, %v211_v2  ;;  %v146_v15 = vld [vmem:[%s611_s13 + $0x8] sm:$0xff]  ;;  %v147_v16 = vld [vmem:[%s611_s13 + $0x10] sm:$0xff]  ;;  %v217_v17 = vld [vmem:[%s611_s13 + $0x240] sm:$0xff] }
  0x15   : > { %v273_v18 = vadd.f32 %v146_v15, %v145_v13  ;;  %v148_v20 = vld [vmem:[%s611_s13 + $0x18] sm:$0xff]  ;;  %v218_v21 = vld [vmem:[%s611_s13 + $0x248] sm:$0xff]  ;;  %v149_v24 = vld [vmem:[%s611_s13 + $0x20] sm:$0xff] }
  0x16   : > { %v341_v7 = vadd.f32 %v340_v5, %v212_v4  ;;  %v219_v25 = vld [vmem:[%s611_s13 + $0x250] sm:$0xff]  ;;  %v150_v28 = vld [vmem:[%s611_s13 + $0x28] sm:$0xff]  ;;  %v220_v29 = vld [vmem:[%s611_s13 + $0x258] sm:$0xff] }
  0x17   : > { %v274_v22 = vadd.f32 %v273_v18, %v147_v16  ;;  %v151_v32 = vld [vmem:[%s611_s13 + $0x30] sm:$0xff]  ;;  %v221_v33 = vld [vmem:[%s611_s13 + $0x260] sm:$0xff]  ;;  %v152_v36 = vld [vmem:[%s611_s13 + $0x38] sm:$0xff] }
  0x18   : > { %v342_v9 = vadd.f32 %v341_v7, %v213_v6  ;;  %v241_v37 = vld [vmem:[%s611_s13 + $0x300] sm:$0xff]  ;;  %v242_v38 = vld [vmem:[%s611_s13 + $0x308] sm:$0xff]  ;;  %v243_v41 = vld [vmem:[%s611_s13 + $0x310] sm:$0xff] }
  0x19   : > { %v275_v26 = vadd.f32 %v274_v22, %v148_v20  ;;  %v222_v39 = vld [vmem:[%s611_s13 + $0x268] sm:$0xff]  ;;  %v372_v42 = vadd.f32 %v242_v38, %v241_v37  ;;  %v153_v44 = vld [vmem:[%s611_s13 + $0x40] sm:$0xff]  ;;  %v244_v45 = vld [vmem:[%s611_s13 + $0x318] sm:$0xff] }
  0x1a   : > { %v343_v11 = vadd.f32 %v342_v9, %v214_v8  ;;  %v223_v46 = vld [vmem:[%s611_s13 + $0x270] sm:$0xff]  ;;  %v154_v50 = vld [vmem:[%s611_s13 + $0x48] sm:$0xff]  ;;  %v245_v51 = vld [vmem:[%s611_s13 + $0x320] sm:$0xff] }
  0x1b   : > { %v276_v30 = vadd.f32 %v275_v26, %v149_v24  ;;  %v373_v48 = vadd.f32 %v372_v42, %v243_v41  ;;  %v224_v52 = vld [vmem:[%s611_s13 + $0x278] sm:$0xff]  ;;  %v155_v56 = vld [vmem:[%s611_s13 + $0x50] sm:$0xff]  ;;  %v246_v57 = vld [vmem:[%s611_s13 + $0x328] sm:$0xff] }
  0x1c   : > { %v344_v14 = vadd.f32 %v343_v11, %v215_v10  ;;  %v225_v58 = vld [vmem:[%s611_s13 + $0x280] sm:$0xff]  ;;  %v156_v62 = vld [vmem:[%s611_s13 + $0x58] sm:$0xff]  ;;  %v247_v63 = vld [vmem:[%s611_s13 + $0x330] sm:$0xff] }
  0x1d   : > { %v277_v34 = vadd.f32 %v276_v30, %v150_v28  ;;  %v374_v54 = vadd.f32 %v373_v48, %v244_v45  ;;  %v226_v0 = vld [vmem:[%s611_s13 + $0x288] sm:$0xff]  ;;  %v227_v3 = vld [vmem:[%s611_s13 + $0x290] sm:$0xff]  ;;  %v157_v5 = vld [vmem:[%s611_s13 + $0x60] sm:$0xff] }
  0x1e   : > { %v345_v19 = vadd.f32 %v344_v14, %v216_v12  ;;  %v248_v6 = vld [vmem:[%s611_s13 + $0x338] sm:$0xff]  ;;  %v177_v9 = vld [vmem:[%s611_s13 + $0x100] sm:$0xff]  ;;  %v178_v10 = vld [vmem:[%s611_s13 + $0x108] sm:$0xff] }
  0x1f   : > { %v278_v40 = vadd.f32 %v277_v34, %v151_v32  ;;  %v375_v60 = vadd.f32 %v374_v54, %v245_v51  ;;  %v179_v11 = vld [vmem:[%s611_s13 + $0x110] sm:$0xff]  ;;  %v158_v13 = vld [vmem:[%s611_s13 + $0x68] sm:$0xff]  ;;  %v249_v14 = vld [vmem:[%s611_s13 + $0x340] sm:$0xff]  ;;  %v306_v15 = vadd.f32 %v178_v10, %v177_v9 }
  0x20   : > { %v346_v23 = vadd.f32 %v345_v19, %v217_v17  ;;  %v228_v16 = vld [vmem:[%s611_s13 + $0x298] sm:$0xff]  ;;  %v250_v22 = vld [vmem:[%s611_s13 + $0x348] sm:$0xff]  ;;  %v229_v24 = vld [vmem:[%s611_s13 + $0x2a0] sm:$0xff] }
  0x21   : > { %v279_v47 = vadd.f32 %v278_v40, %v152_v36  ;;  %v376_v2 = vadd.f32 %v375_v60, %v246_v57  ;;  %v180_v19 = vld [vmem:[%s611_s13 + $0x118] sm:$0xff]  ;;  %v251_v30 = vld [vmem:[%s611_s13 + $0x350] sm:$0xff]  ;;  %v230_v32 = vld [vmem:[%s611_s13 + $0x2a8] sm:$0xff] }
  0x22   : > { %v347_v27 = vadd.f32 %v346_v23, %v218_v21  ;;  %v159_v21 = vld [vmem:[%s611_s13 + $0x70] sm:$0xff]  ;;  %v307_v23 = vadd.f32 %v306_v15, %v179_v11  ;;  %v161_v37 = vld [vmem:[%s611_s13 + $0x80] sm:$0xff]  ;;  %v252_v38 = vld [vmem:[%s611_s13 + $0x358] sm:$0xff] }
  0x23   : > { %v280_v53 = vadd.f32 %v279_v47, %v153_v44  ;;  %v377_v8 = vadd.f32 %v376_v2, %v247_v63  ;;  %v231_v40 = vld [vmem:[%s611_s13 + $0x2b0] sm:$0xff]  ;;  %v162_v45 = vld [vmem:[%s611_s13 + $0x88] sm:$0xff]  ;;  %v232_v48 = vld [vmem:[%s611_s13 + $0x2b8] sm:$0xff] }
  0x24   : > { %v348_v31 = vadd.f32 %v347_v27, %v219_v25  ;;  %v181_v27 = vld [vmem:[%s611_s13 + $0x120] sm:$0xff]  ;;  %v184_v51 = vld [vmem:[%s611_s13 + $0x138] sm:$0xff]  ;;  %v254_v54 = vld [vmem:[%s611_s13 + $0x368] sm:$0xff] }
  0x25   : > { %v281_v59 = vadd.f32 %v280_v53, %v154_v50  ;;  %v378_v18 = vadd.f32 %v377_v8, %v248_v6  ;;  %v163_v53 = vld [vmem:[%s611_s13 + $0x90] sm:$0xff]  ;;  %v256_v6 = vld [vmem:[%s611_s13 + $0x378] sm:$0xff] }
  0x26   : > { %v349_v35 = vadd.f32 %v348_v31, %v220_v29  ;;  %v160_v29 = vld [vmem:[%s611_s13 + $0x78] sm:$0xff]  ;;  %v308_v31 = vadd.f32 %v307_v23, %v180_v19  ;;  %v235_v8 = vld [vmem:[%s611_s13 + $0x2d0] sm:$0xff] }
  0x27   : > { %v282_v1 = vadd.f32 %v281_v59, %v155_v56  ;;  %v379_v26 = vadd.f32 %v378_v18, %v249_v14  ;;  %v233_v56 = vld [vmem:[%s611_s13 + $0x2c0] sm:$0xff]  ;;  %v187_v11 = vld [vmem:[%s611_s13 + $0x150] sm:$0xff]  ;;  %v188_v19 = vld [vmem:[%s611_s13 + $0x158] sm:$0xff] }
  0x28   : > { %v350_v43 = vadd.f32 %v349_v35, %v221_v33  ;;  %v182_v35 = vld [vmem:[%s611_s13 + $0x128] sm:$0xff]  ;;  %v185_v59 = vld [vmem:[%s611_s13 + $0x140] sm:$0xff] }
  0x29   : > { %v283_v7 = vadd.f32 %v282_v1, %v156_v62  ;;  %v380_v34 = vadd.f32 %v379_v26, %v250_v22  ;;  %v255_v62 = vld [vmem:[%s611_s13 + $0x370] sm:$0xff]  ;;  %v257_v14 = vld [vmem:[%s611_s13 + $0x380] sm:$0xff]  ;;  %v258_v22 = vld [vmem:[%s611_s13 + $0x388] sm:$0xff] }
  0x2a   : > { %v351_v49 = vadd.f32 %v350_v43, %v222_v39  ;;  %v309_v39 = vadd.f32 %v308_v31, %v181_v27  ;;  %v183_v43 = vld [vmem:[%s611_s13 + $0x130] sm:$0xff]  ;;  %v189_v27 = vld [vmem:[%s611_s13 + $0x160] sm:$0xff] }
  0x2b   : > { %v284_v17 = vadd.f32 %v283_v7, %v157_v5  ;;  %v381_v42 = vadd.f32 %v380_v34, %v251_v30  ;;  %v165_v5 = vld [vmem:[%s611_s13 + $0xa0] sm:$0xff]  ;;  %v259_v30 = vld [vmem:[%s611_s13 + $0x390] sm:$0xff] }
  0x2c   : > { %v352_v55 = vadd.f32 %v351_v49, %v223_v46  ;;  %v253_v46 = vld [vmem:[%s611_s13 + $0x360] sm:$0xff]  ;;  %v310_v47 = vadd.f32 %v309_v39, %v182_v35  ;;  %v190_v35 = vld [vmem:[%s611_s13 + $0x168] sm:$0xff] }
  0x2d   : > { %v285_v25 = vadd.f32 %v284_v17, %v158_v13  ;;  %v382_v50 = vadd.f32 %v381_v42, %v252_v38  ;;  %v166_v13 = vld [vmem:[%s611_s13 + $0xa8] sm:$0xff]  ;;  %v260_v38 = vld [vmem:[%s611_s13 + $0x398] sm:$0xff] }
  0x2e   : > { %v353_v61 = vadd.f32 %v352_v55, %v224_v52  ;;  %v311_v55 = vadd.f32 %v310_v47, %v183_v43  ;;  %v191_v43 = vld [vmem:[%s611_s13 + $0x170] sm:$0xff] }
  0x2f   : > { %v286_v33 = vadd.f32 %v285_v25, %v159_v21  ;;  %v167_v21 = vld [vmem:[%s611_s13 + $0xb0] sm:$0xff] }
  0x30   : > { %v354_v4 = vadd.f32 %v353_v61, %v225_v58  ;;  %v383_v58 = vadd.f32 %v382_v50, %v253_v46  ;;  %v164_v61 = vld [vmem:[%s611_s13 + $0x98] sm:$0xff]  ;;  %v312_v63 = vadd.f32 %v311_v55, %v184_v51  ;;  %v261_v46 = vld [vmem:[%s611_s13 + $0x3a0] sm:$0xff] }
  0x31   : > { %v287_v41 = vadd.f32 %v286_v33, %v160_v29  ;;  %v168_v29 = vld [vmem:[%s611_s13 + $0xb8] sm:$0xff] }
  0x32   : > { %v355_v12 = vadd.f32 %v354_v4, %v226_v0  ;;  %v234_v0 = vld [vmem:[%s611_s13 + $0x2c8] sm:$0xff]  ;;  %v384_v2 = vadd.f32 %v383_v58, %v254_v54  ;;  %v313_v7 = vadd.f32 %v312_v63, %v185_v59  ;;  %v192_v51 = vld [vmem:[%s611_s13 + $0x178] sm:$0xff]  ;;  %v193_v58 = vld [vmem:[%s611_s13 + $0x180] sm:$0xff] }
  0x33   : > { %v288_v49 = vadd.f32 %v287_v41, %v161_v37  ;;  %v169_v37 = vld [vmem:[%s611_s13 + $0xc0] sm:$0xff]  ;;  %v262_v54 = vld [vmem:[%s611_s13 + $0x3a8] sm:$0xff] }
  0x34   : > { %v356_v20 = vadd.f32 %v355_v12, %v227_v3  ;;  %v186_v3 = vld [vmem:[%s611_s13 + $0x148] sm:$0xff]  ;;  %v385_v10 = vadd.f32 %v384_v2, %v255_v62  ;;  %v173_v2 = vld [vmem:[%s611_s13 + $0xe0] sm:$0xff] }
  0x35   : > { %v289_v57 = vadd.f32 %v288_v49, %v162_v45  ;;  %v314_v15 = vadd.f32 %v313_v7, %v186_v3  ;;  %v170_v45 = vld [vmem:[%s611_s13 + $0xc8] sm:$0xff]  ;;  %v264_v3 = vld [vmem:[%s611_s13 + $0x3b8] sm:$0xff]  ;;  %v195_v7 = vld [vmem:[%s611_s13 + $0x190] sm:$0xff] }
  0x36   : > { %v357_v28 = vadd.f32 %v356_v20, %v228_v16  ;;  %v236_v16 = vld [vmem:[%s611_s13 + $0x2d8] sm:$0xff]  ;;  %v386_v18 = vadd.f32 %v385_v10, %v256_v6 }
  0x37   : > { %v290_v1 = vadd.f32 %v289_v57, %v163_v53  ;;  %v315_v23 = vadd.f32 %v314_v15, %v187_v11  ;;  %v171_v53 = vld [vmem:[%s611_s13 + $0xd0] sm:$0xff]  ;;  %v266_v15 = vld [vmem:[%s611_s13 + $0x3c8] sm:$0xff] }
  0x38   : > { %v358_v36 = vadd.f32 %v357_v28, %v229_v24  ;;  %v237_v24 = vld [vmem:[%s611_s13 + $0x2e0] sm:$0xff]  ;;  %v387_v26 = vadd.f32 %v386_v18, %v257_v14  ;;  %v175_v14 = vld [vmem:[%s611_s13 + $0xf0] sm:$0xff] }
  0x39   : > { %v291_v9 = vadd.f32 %v290_v1, %v164_v61  ;;  %v316_v31 = vadd.f32 %v315_v23, %v188_v19  ;;  %v263_v61 = vld [vmem:[%s611_s13 + $0x3b0] sm:$0xff]  ;;  %v194_v1 = vld [vmem:[%s611_s13 + $0x188] sm:$0xff]  ;;  %v197_v19 = vld [vmem:[%s611_s13 + $0x1a0] sm:$0xff] }
  0x3a   : > { %v359_v44 = vadd.f32 %v358_v36, %v230_v32  ;;  %v238_v32 = vld [vmem:[%s611_s13 + $0x2e8] sm:$0xff]  ;;  %v388_v34 = vadd.f32 %v387_v26, %v258_v22  ;;  %v268_v26 = vld [vmem:[%s611_s13 + $0x3d8] sm:$0xff] }
  0x3b   : > { %v292_v17 = vadd.f32 %v291_v9, %v165_v5  ;;  %v317_v39 = vadd.f32 %v316_v31, %v189_v27  ;;  %v265_v9 = vld [vmem:[%s611_s13 + $0x3c0] sm:$0xff] }
  0x3c   : > { %v360_v52 = vadd.f32 %v359_v44, %v231_v40  ;;  %v239_v40 = vld [vmem:[%s611_s13 + $0x2f0] sm:$0xff]  ;;  %v389_v42 = vadd.f32 %v388_v34, %v259_v30  ;;  %v269_v31 = vld [vmem:[%s611_s13 + $0x3e0] sm:$0xff]  ;;  %v200_v34 = vld [vmem:[%s611_s13 + $0x1b8] sm:$0xff] }
  0x3d   : > { %v293_v25 = vadd.f32 %v292_v17, %v166_v13  ;;  %v318_v47 = vadd.f32 %v317_v39, %v190_v35  ;;  %v196_v13 = vld [vmem:[%s611_s13 + $0x198] sm:$0xff]  ;;  %v199_v30 = vld [vmem:[%s611_s13 + $0x1b0] sm:$0xff]  ;;  %v270_v35 = vld [vmem:[%s611_s13 + $0x3e8] sm:$0xff] }
  0x3e   : > { %v361_v60 = vadd.f32 %v360_v52, %v232_v48  ;;  %v240_v48 = vld [vmem:[%s611_s13 + $0x2f8] sm:$0xff]  ;;  %v390_v50 = vadd.f32 %v389_v42, %v260_v38  ;;  %v201_v38 = vld [vmem:[%s611_s13 + $0x1c0] sm:$0xff]  ;;  %v271_v39 = vld [vmem:[%s611_s13 + $0x3f0] sm:$0xff] }
  0x3f   : > { %v294_v33 = vadd.f32 %v293_v25, %v167_v21  ;;  %v319_v55 = vadd.f32 %v318_v47, %v191_v43  ;;  %v267_v21 = vld [vmem:[%s611_s13 + $0x3d0] sm:$0xff]  ;;  %v198_v25 = vld [vmem:[%s611_s13 + $0x1a8] sm:$0xff]  ;;  %v272_v43 = vld [vmem:[%s611_s13 + $0x3f8] sm:$0xff] }
  0x40   : > { %v362_v4 = vadd.f32 %v361_v60, %v233_v56  ;;  %v391_v57 = vadd.f32 %v390_v50, %v261_v46  ;;  %v172_v60 = vld [vmem:[%s611_s13 + $0xd8] sm:$0xff]  ;;  %v202_v42 = vld [vmem:[%s611_s13 + $0x1c8] sm:$0xff]  ;;  %v203_v46 = vld [vmem:[%s611_s13 + $0x1d0] sm:$0xff] }
  0x41   : > { %v295_v41 = vadd.f32 %v294_v33, %v168_v29  ;;  %v320_v62 = vadd.f32 %v319_v55, %v192_v51  ;;  %v205_v51 = vld [vmem:[%s611_s13 + $0x1e0] sm:$0xff]  ;;  %v207_v55 = vld [vmem:[%s611_s13 + $0x1f0] sm:$0xff] }
  0x42   : > { %v363_v12 = vadd.f32 %v362_v4, %v234_v0  ;;  %v392_v0 = vadd.f32 %v391_v57, %v262_v54  ;;  %v208_v57 = vld [vmem:[%s611_s13 + $0x1f8] sm:$0xff] }
  0x43   : > { %v296_v49 = vadd.f32 %v295_v41, %v169_v37  ;;  %v321_v4 = vadd.f32 %v320_v62, %v193_v58 }
  0x44   : > { %v364_v20 = vadd.f32 %v363_v12, %v235_v8  ;;  %v393_v6 = vadd.f32 %v392_v0, %v263_v61  ;;  %v174_v8 = vld [vmem:[%s611_s13 + $0xe8] sm:$0xff] }
  0x45   : > { %v297_v56 = vadd.f32 %v296_v49, %v170_v45  ;;  %v322_v10 = vadd.f32 %v321_v4, %v194_v1  ;;  %v204_v49 = vld [vmem:[%s611_s13 + $0x1d8] sm:$0xff] }
  0x46   : > { %v365_v28 = vadd.f32 %v364_v20, %v236_v16  ;;  %v394_v12 = vadd.f32 %v393_v6, %v264_v3  ;;  %v176_v20 = vld [vmem:[%s611_s13 + $0xf8] sm:$0xff] }
  0x47   : > { %v298_v63 = vadd.f32 %v297_v56, %v171_v53  ;;  %v323_v16 = vadd.f32 %v322_v10, %v195_v7  ;;  %v206_v53 = vld [vmem:[%s611_s13 + $0x1e8] sm:$0xff] }
  0x48   : > { %v366_v36 = vadd.f32 %v365_v28, %v237_v24  ;;  %v395_v18 = vadd.f32 %v394_v12, %v265_v9 }
  0x49   : > { %v299_v5 = vadd.f32 %v298_v63, %v172_v60  ;;  %v324_v22 = vadd.f32 %v323_v16, %v196_v13 }
  0x4a   : > { %v367_v44 = vadd.f32 %v366_v36, %v238_v32  ;;  %v396_v24 = vadd.f32 %v395_v18, %v266_v15 }
  0x4b   : > { %v300_v11 = vadd.f32 %v299_v5, %v173_v2  ;;  %v325_v27 = vadd.f32 %v324_v22, %v197_v19 }
  0x4c   : > { %v368_v52 = vadd.f32 %v367_v44, %v239_v40  ;;  %v397_v29 = vadd.f32 %v396_v24, %v267_v21 }
  0x4d   : > { %v301_v17 = vadd.f32 %v300_v11, %v174_v8  ;;  %v326_v32 = vadd.f32 %v325_v27, %v198_v25 }
  0x4e   : > { %v369_v59 = vadd.f32 %v368_v52, %v240_v48  ;;  %v398_v33 = vadd.f32 %v397_v29, %v268_v26 }
  0x4f   : > { %v302_v23 = vadd.f32 %v301_v17, %v175_v14  ;;  %v327_v36 = vadd.f32 %v326_v32, %v199_v30 }
  0x50   : > { %370 = vadd.xlane.f32.xlu1 %v369_v59  ;;  %v399_v37 = vadd.f32 %v398_v33, %v269_v31 }
  0x51   : > { %v303_v28 = vadd.f32 %v302_v23, %v176_v20  ;;  %v328_v40 = vadd.f32 %v327_v36, %v200_v34 }
  0x52   : > { %v400_v41 = vadd.f32 %v399_v37, %v270_v35 }
  0x53   : > { %304 = vadd.xlane.f32.xlu0 %v303_v28  ;;  %v329_v44 = vadd.f32 %v328_v40, %v201_v38 }
  0x54   : > { %v401_v45 = vadd.f32 %v400_v41, %v271_v39 }
  0x55   : > { %v330_v47 = vadd.f32 %v329_v44, %v202_v42 }
  0x56   : > { %v402_v48 = vadd.f32 %v401_v45, %v272_v43 }
  0x57   : > { %v331_v50 = vadd.f32 %v330_v47, %v203_v46 }
  0x58   : > { %403 = vadd.xlane.f32.xlu1 %v402_v48 }
  0x59   : > { %v332_v52 = vadd.f32 %v331_v50, %v204_v49 }
  0x5b   : > { %v333_v54 = vadd.f32 %v332_v52, %v205_v51 }
  0x5d   : > { %v334_v56 = vadd.f32 %v333_v54, %v206_v53 }
  0x5f   : > { %v335_v58 = vadd.f32 %v334_v56, %v207_v55 }
  0x61   : > { %v336_v59 = vadd.f32 %v335_v58, %v208_v57 }
  0x63   : > { %337 = vadd.xlane.f32.xlu0 %v336_v59 }
  0xdd   : > { %v371_v60 = vpop.xlane.xlu1 %370 }
  0xde   : > { %412 = vst.msk [vmem:[%s144_s17 + $0x10] sm:$0xff] %vm409_vm0, %v371_v60 }
  0xe0   : > { %v305_v63 = vpop.xlane.xlu0 %304 }
  0xe1   : > { %410 = vst.msk [vmem:[%s144_s17] sm:$0xff] %vm409_vm0, %v305_v63 }
  0xe5   : > { %v436_v61 = vld [vmem:[%s144_s17 + $0x10] sm:$0xff]  ;;  %v404_v2 = vpop.xlane.xlu1 %403 }
  0xe6   : > { %v440_v62 = vmul.f32 0.00024414063, %v436_v61  ;;  %413 = vst.msk [vmem:[%s144_s17 + $0x18] sm:$0xff] %vm409_vm0, %v404_v2 }
  0xe8   : > { %445 = vst.msk [vmem:[%s144_s17 + $0x10] sm:$0xff] %vm409_vm0, %v440_v62  ;;  %v434_v0 = vld [vmem:[%s144_s17] sm:$0xff] }
  0xe9   : > { %v438_v1 = vmul.f32 0.00024414063, %v434_v0 }
  0xeb   : > { %443 = vst.msk [vmem:[%s144_s17] sm:$0xff] %vm409_vm0, %v438_v1 }
  0xed   : > { %v437_v3 = vld [vmem:[%s144_s17 + $0x18] sm:$0xff] }
  0xee   : > { %v441_v4 = vmul.f32 0.00024414063, %v437_v3 }
  0xf0   : > { %446 = vst.msk [vmem:[%s144_s17 + $0x18] sm:$0xff] %vm409_vm0, %v441_v4  ;;  %v338_v5 = vpop.xlane.xlu0 %337 }
  0xf1   : > { %411 = vst.msk [vmem:[%s144_s17 + $0x8] sm:$0xff] %vm409_vm0, %v338_v5 }
  0xf8   : > { %v435_v6 = vld [vmem:[%s144_s17 + $0x8] sm:$0xff] }
  0xf9   : > { %v439_v7 = vmul.f32 0.00024414063, %v435_v6 }
  0xfb   : > { %444 = vst.msk [vmem:[%s144_s17 + $0x8] sm:$0xff] %vm409_vm0, %v439_v7 }
  0xfc PF: > { %s11_s8 = sadd.s32 1, %s575_s8   ;;  %s764_s6 = smov %s571_s7 }
  0xfd   : > { %p8_p5 = scmp.ge.s32.totalorder %s11_s8, 4   ;;  %s765_s7 = smov %s767_s9 }
  0xff   :  { %10 = sbr.rel (!%p8_p5) target bundleno = 2 (0x2), region = 66 }

// kernel: scse_forward.3
= control target key start
LH: loop header
LB: loop body
LE: loop exit
PB: predicated region body
PF: predicated region fallthrough
CT: control target
= control target key end

     0   :  { %s1879_s17 = smov 0   ;;  %s1881_s18 = smov 0   ;;  %s3691_s0 = inlined_call_operand.vmem [shape: f32[2,32,4096], index: 0, kind: input, shape index: {}]   ;;  %s3692_s1 = inlined_call_operand.vmem [shape: f32[2,32,1], index: 1, kind: input, shape index: {}]   ;;  %s3693_s2 = inlined_call_operand.vmem [shape: f32[32,1], index: 2, kind: input, shape index: {}]   ;;  %s3694_s3 = inlined_call_operand.<no memory space> [shape: f32[1], index: 3, kind: input, shape index: {}]   ;;  %s3695_s4 = inlined_call_operand.vmem [shape: f32[2,32,4096], index: 4, kind: output, shape index: {}]  }
   0x1   :  { %9 = sst [smem:[#allocation2]] %s3694_s3  ;;  %s1883_s19 = smov 0  }
   0x2 LB: > { %s27_s3 = sadd.s32 1, %s1844_s18  ;;  %p1531_p0 = scmp.ge.s32.totalorder %s1848_s19, 1  ;;  %s1848_s19 = sphi %s1883_s19, %s15_s19   ;;  %s1844_s18 = sphi %s1881_s18, %s3988_s18   ;;  %s1840_s17 = sphi %s1879_s17, %s3987_s17  }
   0x3   : > { %p29_p1 = scmp.ge.s32.totalorder %s27_s3, 2  ;;  %p194_p2 = scmp.lt.s32.totalorder %s1848_s19, 3 }
   0x5   : > { %s3990_s3 = smov (%p29_p1, %s27_s3), 0  ;;  %p195_p3 = pnand %p1531_p0, %p194_p2 }
   0x7   : > { %198 = sbr.rel (%p195_p3) target bundleno = 435 (0x1b3), region = 36 }
   0xe   : > { %v388_v0 = vld [vmem:[%s3693_s2 + $0x10] sm:$0xff]  ;;  %v386_v1 = vld [vmem:[%s3693_s2] sm:$0xff]  ;;  %p234_p4 = scmp.lt.s32.totalorder %s1840_s17, 1  ;;  %v1850_v2 = vmov 0   ;;  %v389_v3 = vld [vmem:[%s3693_s2 + $0x18] sm:$0xff]  ;;  %s826_s7 = sld [smem:[#allocation2]] }
   0xf   : > { %1569 = vset.pattern.permute.xlu1 %v1850_v2  ;;  %1568 = vset.pattern.permute.xlu0 %v1850_v2  ;;  %v387_v4 = vld [vmem:[%s3693_s2 + $0x8] sm:$0xff] }
  0x10   : > { %402 = vperm.xlu1 %1569, %v388_v0   ;;  %392 = vperm.xlu0 %1568, %v386_v1   ;;  %s3992_s17 = smov (!%p234_p4, %s1840_s17), 1 }
  0x11   : > { %s1541_s28 = sshll.u32 %s3992_s17, 5  ;;  %s1540_s6 = sshll.u32 %s3992_s17, 10 }
  0x12   : > { %s247_s5 = scalar_lea.vmem %s3692_s1, %s1541_s28  ;;  %s1921_s10 = scalar_lea.vmem %s3691_s0, %s1540_s6 }
  0x13   : > { %v1021_v5 = vld [vmem:[%s247_s5 + $0x8] sm:$0xff]  ;;  %v1020_v6 = vld [vmem:[%s247_s5] sm:$0xff]  ;;  %v1023_v7 = vld [vmem:[%s247_s5 + $0x18] sm:$0xff]  ;;  %s3281_s13 = scalar_lea.vmem %s3695_s4, %s1540_s6 }
  0x14   : > { %407 = vperm.xlu1 %1569, %v389_v3   ;;  %397 = vperm.xlu0 %1568, %v387_v4   ;;  %v1022_v8 = vld [vmem:[%s247_s5 + $0x10] sm:$0xff]  ;;  %v258_v9 = vld [vmem:[%s1921_s10] sm:$0xff]  ;;  %v259_v10 = vld [vmem:[%s1921_s10 + $0x8] sm:$0xff]  ;;  %v1945_v30 = vstv %s826_s7 }
  0x15   : > { %v260_v11 = vld [vmem:[%s1921_s10 + $0x10] sm:$0xff]  ;;  %v261_v12 = vld [vmem:[%s1921_s10 + $0x18] sm:$0xff]  ;;  %v262_v13 = vld [vmem:[%s1921_s10 + $0x20] sm:$0xff]  ;;  %3697 = vst [vmem:[#allocation3_spill] sm:$0xff] %v1945_v30 }
  0x16   : > { %v263_v14 = vld [vmem:[%s1921_s10 + $0x28] sm:$0xff]  ;;  %v264_v15 = vld [vmem:[%s1921_s10 + $0x30] sm:$0xff]  ;;  %v265_v16 = vld [vmem:[%s1921_s10 + $0x38] sm:$0xff] }
  0x17   : > { %v266_v18 = vld [vmem:[%s1921_s10 + $0x40] sm:$0xff]  ;;  %v267_v19 = vld [vmem:[%s1921_s10 + $0x48] sm:$0xff]  ;;  %v268_v20 = vld [vmem:[%s1921_s10 + $0x50] sm:$0xff] }
  0x18   : > { %1031 = vperm.xlu1 %1569, %v1021_v5   ;;  %1026 = vperm.xlu0 %1568, %v1020_v6   ;;  %v269_v21 = vld [vmem:[%s1921_s10 + $0x58] sm:$0xff]  ;;  %v270_v22 = vld [vmem:[%s1921_s10 + $0x60] sm:$0xff]  ;;  %v271_v23 = vld [vmem:[%s1921_s10 + $0x68] sm:$0xff] }
  0x19   : > { %v272_v24 = vld [vmem:[%s1921_s10 + $0x70] sm:$0xff]  ;;  %v273_v25 = vld [vmem:[%s1921_s10 + $0x78] sm:$0xff]  ;;  %v274_v26 = vld [vmem:[%s1921_s10 + $0x80] sm:$0xff] }
  0x1a   : > { %v275_v27 = vld [vmem:[%s1921_s10 + $0x88] sm:$0xff]  ;;  %v276_v28 = vld [vmem:[%s1921_s10 + $0x90] sm:$0xff]  ;;  %v277_v29 = vld [vmem:[%s1921_s10 + $0x98] sm:$0xff] }
  0x1b   : > { %v278_v31 = vld [vmem:[%s1921_s10 + $0xa0] sm:$0xff]  ;;  %v279_v32 = vld [vmem:[%s1921_s10 + $0xa8] sm:$0xff]  ;;  %v280_v33 = vld [vmem:[%s1921_s10 + $0xb0] sm:$0xff] }
  0x1c   : > { %1041 = vperm.xlu1 %1569, %v1023_v7   ;;  %1036 = vperm.xlu0 %1568, %v1022_v8   ;;  %v281_v34 = vld [vmem:[%s1921_s10 + $0xb8] sm:$0xff]  ;;  %v282_v39 = vld [vmem:[%s1921_s10 + $0xc0] sm:$0xff]  ;;  %v283_v40 = vld [vmem:[%s1921_s10 + $0xc8] sm:$0xff] }
  0x1d   : > { %v284_v41 = vld [vmem:[%s1921_s10 + $0xd0] sm:$0xff]  ;;  %v285_v42 = vld [vmem:[%s1921_s10 + $0xd8] sm:$0xff]  ;;  %v286_v47 = vld [vmem:[%s1921_s10 + $0xe0] sm:$0xff] }
  0x1e   : > { %v287_v48 = vld [vmem:[%s1921_s10 + $0xe8] sm:$0xff]  ;;  %v288_v49 = vld [vmem:[%s1921_s10 + $0xf0] sm:$0xff]  ;;  %v289_v50 = vld [vmem:[%s1921_s10 + $0xf8] sm:$0xff] }
  0x1f   : > { %v290_v55 = vld [vmem:[%s1921_s10 + $0x100] sm:$0xff]  ;;  %v291_v56 = vld [vmem:[%s1921_s10 + $0x108] sm:$0xff]  ;;  %v292_v57 = vld [vmem:[%s1921_s10 + $0x110] sm:$0xff] }
  0x20   : > { %v293_v58 = vld [vmem:[%s1921_s10 + $0x118] sm:$0xff]  ;;  %v294_v63 = vld [vmem:[%s1921_s10 + $0x120] sm:$0xff]  ;;  %v295_v0 = vld [vmem:[%s1921_s10 + $0x128] sm:$0xff] }
  0x21   : > { %v296_v1 = vld [vmem:[%s1921_s10 + $0x130] sm:$0xff]  ;;  %v297_v2 = vld [vmem:[%s1921_s10 + $0x138] sm:$0xff]  ;;  %v298_v8 = vld [vmem:[%s1921_s10 + $0x140] sm:$0xff] }
  0x22   : > { %v316_v30 = vld [vmem:[%s1921_s10 + $0x1d0] sm:$0xff] }
  0x8f   : > { %v1931_v17 = vpop.permute.xlu0 %392 }
  0x90   : > { %v1952_v35 = vmul.f32 %v1931_v17, %v258_v9  ;;  %v1955_v36 = vmul.f32 %v1931_v17, %v259_v10  ;;  %v1958_v37 = vmul.f32 %v1931_v17, %v260_v11  ;;  %v1961_v38 = vmul.f32 %v1931_v17, %v261_v12  ;;  %v299_v9 = vld [vmem:[%s1921_s10 + $0x148] sm:$0xff]  ;;  %v300_v10 = vld [vmem:[%s1921_s10 + $0x150] sm:$0xff]  ;;  %v301_v11 = vld [vmem:[%s1921_s10 + $0x158] sm:$0xff] }
  0x91   : > { %v1968_v43 = vmul.f32 %v1931_v17, %v262_v13  ;;  %v1971_v44 = vmul.f32 %v1931_v17, %v263_v14  ;;  %v1974_v45 = vmul.f32 %v1931_v17, %v264_v15  ;;  %v1977_v46 = vmul.f32 %v1931_v17, %v265_v16  ;;  %v302_v16 = vld [vmem:[%s1921_s10 + $0x160] sm:$0xff] }
  0x92   : > { %v1984_v51 = vmul.f32 %v1931_v17, %v266_v18  ;;  %v1987_v52 = vmul.f32 %v1931_v17, %v267_v19  ;;  %v1990_v53 = vmul.f32 %v1931_v17, %v268_v20  ;;  %v1993_v54 = vmul.f32 %v1931_v17, %v269_v21  ;;  %v303_v18 = vld [vmem:[%s1921_s10 + $0x168] sm:$0xff]  ;;  %v304_v19 = vld [vmem:[%s1921_s10 + $0x170] sm:$0xff]  ;;  %v305_v20 = vld [vmem:[%s1921_s10 + $0x178] sm:$0xff] }
  0x93   : > { %v2000_v59 = vmul.f32 %v1931_v17, %v270_v22  ;;  %v2003_v60 = vmul.f32 %v1931_v17, %v271_v23  ;;  %v2006_v61 = vmul.f32 %v1931_v17, %v272_v24  ;;  %v2009_v62 = vmul.f32 %v1931_v17, %v273_v25  ;;  %v2027_v7 = vpop.permute.xlu0 %397  ;;  %v306_v25 = vld [vmem:[%s1921_s10 + $0x180] sm:$0xff] }
  0x94   : > { %v2016_v3 = vmul.f32 %v1931_v17, %v274_v26  ;;  %v2019_v4 = vmul.f32 %v1931_v17, %v275_v27  ;;  %v2022_v5 = vmul.f32 %v1931_v17, %v276_v28  ;;  %v2025_v6 = vmul.f32 %v1931_v17, %v277_v29  ;;  %v307_v26 = vld [vmem:[%s1921_s10 + $0x188] sm:$0xff]  ;;  %v308_v27 = vld [vmem:[%s1921_s10 + $0x190] sm:$0xff]  ;;  %v309_v28 = vld [vmem:[%s1921_s10 + $0x198] sm:$0xff] }
  0x95   : > { %3698 = vst [vmem:[#allocation4_spill] sm:$0xff] %v2003_v60  ;;  %3699 = vst [vmem:[#allocation5_spill] sm:$0xff] %v2006_v61  ;;  %v2034_v12 = vmul.f32 %v1931_v17, %v278_v31  ;;  %v2037_v13 = vmul.f32 %v1931_v17, %v279_v32  ;;  %v2040_v14 = vmul.f32 %v1931_v17, %v280_v33  ;;  %v354_v60 = vld [vmem:[%s1921_s10 + $0x300] sm:$0xff] }
  0x96   : > { %3700 = vst [vmem:[#allocation6_spill] sm:$0xff] %v2009_v62  ;;  %3701 = vst [vmem:[#allocation7_spill] sm:$0xff] %v2016_v3  ;;  %v2043_v15 = vmul.f32 %v1931_v17, %v281_v34  ;;  %v2050_v21 = vmul.f32 %v1931_v17, %v282_v39  ;;  %v2053_v22 = vmul.f32 %v1931_v17, %v283_v40  ;;  %v310_v34 = vld [vmem:[%s1921_s10 + $0x1a0] sm:$0xff]  ;;  %v311_v39 = vld [vmem:[%s1921_s10 + $0x1a8] sm:$0xff] }
  0x97   : > { %3702 = vst [vmem:[#allocation8_spill] sm:$0xff] %v2019_v4  ;;  %3703 = vst [vmem:[#allocation9_spill] sm:$0xff] %v2022_v5  ;;  %v2056_v23 = vmul.f32 %v1931_v17, %v284_v41  ;;  %v2059_v24 = vmul.f32 %v1931_v17, %v285_v42  ;;  %v2066_v29 = vmul.f32 %v1931_v17, %v286_v47  ;;  %v312_v40 = vld [vmem:[%s1921_s10 + $0x1b0] sm:$0xff]  ;;  %v313_v41 = vld [vmem:[%s1921_s10 + $0x1b8] sm:$0xff] }
  0x98   : > { %3704 = vst [vmem:[#allocation10_spill] sm:$0xff] %v2025_v6  ;;  %3705 = vst [vmem:[#allocation11_spill] sm:$0xff] %v2034_v12  ;;  %v2069_v31 = vmul.f32 %v1931_v17, %v287_v48  ;;  %v2072_v32 = vmul.f32 %v1931_v17, %v288_v49  ;;  %v2075_v33 = vmul.f32 %v1931_v17, %v289_v50  ;;  %v314_v49 = vld [vmem:[%s1921_s10 + $0x1c0] sm:$0xff]  ;;  %v315_v50 = vld [vmem:[%s1921_s10 + $0x1c8] sm:$0xff] }
  0x99   : > { %3706 = vst [vmem:[#allocation12_spill] sm:$0xff] %v2037_v13  ;;  %3707 = vst [vmem:[#allocation13_spill] sm:$0xff] %v2040_v14  ;;  %v2082_v42 = vmul.f32 %v2027_v7, %v290_v55  ;;  %v2085_v47 = vmul.f32 %v2027_v7, %v291_v56  ;;  %v2088_v48 = vmul.f32 %v2027_v7, %v292_v57  ;;  %v326_v14 = vld [vmem:[%s1921_s10 + $0x220] sm:$0xff]  ;;  %v327_v13 = vld [vmem:[%s1921_s10 + $0x228] sm:$0xff] }
  0x9a   : > { %3708 = vst [vmem:[#allocation14_spill] sm:$0xff] %v2043_v15  ;;  %3709 = vst [vmem:[#allocation15_spill] sm:$0xff] %v2050_v21  ;;  %v2091_v17 = vmul.f32 %v2027_v7, %v293_v58  ;;  %v2098_v55 = vmul.f32 %v2027_v7, %v294_v63  ;;  %v2101_v56 = vmul.f32 %v2027_v7, %v295_v0  ;;  %v324_v21 = vld [vmem:[%s1921_s10 + $0x210] sm:$0xff]  ;;  %v325_v15 = vld [vmem:[%s1921_s10 + $0x218] sm:$0xff] }
  0x9b   : > { %3710 = vst [vmem:[#allocation16_spill] sm:$0xff] %v2053_v22  ;;  %3711 = vst [vmem:[#allocation17_spill] sm:$0xff] %v2056_v23  ;;  %v2104_v57 = vmul.f32 %v2027_v7, %v296_v1  ;;  %v2107_v58 = vmul.f32 %v2027_v7, %v297_v2  ;;  %v2114_v63 = vmul.f32 %v2027_v7, %v298_v8  ;;  %v322_v23 = vld [vmem:[%s1921_s10 + $0x200] sm:$0xff]  ;;  %v323_v22 = vld [vmem:[%s1921_s10 + $0x208] sm:$0xff] }
  0x9c   : > { %3712 = vst [vmem:[#allocation18_spill] sm:$0xff] %v2059_v24  ;;  %3713 = vst [vmem:[#allocation19_spill] sm:$0xff] %v2066_v29  ;;  %v320_v29 = vld [vmem:[%s1921_s10 + $0x1f0] sm:$0xff]  ;;  %v321_v24 = vld [vmem:[%s1921_s10 + $0x1f8] sm:$0xff]  ;;  %v2117_v0 = vmul.f32 %v2027_v7, %v299_v9  ;;  %v2120_v1 = vmul.f32 %v2027_v7, %v300_v10  ;;  %v2123_v2 = vmul.f32 %v2027_v7, %v301_v11 }
  0x9d   : > { %3714 = vst [vmem:[#allocation20_spill] sm:$0xff] %v2069_v31  ;;  %3715 = vst [vmem:[#allocation21_spill] sm:$0xff] %v2072_v32  ;;  %v318_v32 = vld [vmem:[%s1921_s10 + $0x1e0] sm:$0xff]  ;;  %v319_v31 = vld [vmem:[%s1921_s10 + $0x1e8] sm:$0xff]  ;;  %v2130_v8 = vmul.f32 %v2027_v7, %v302_v16  ;;  %v2133_v9 = vmul.f32 %v2027_v7, %v303_v18  ;;  %v2136_v10 = vmul.f32 %v2027_v7, %v304_v19 }
  0x9e   : > { %3716 = vst [vmem:[#allocation22_spill] sm:$0xff] %v2075_v33  ;;  %v317_v33 = vld [vmem:[%s1921_s10 + $0x1d8] sm:$0xff]  ;;  %v2139_v11 = vmul.f32 %v2027_v7, %v305_v20  ;;  %v328_v12 = vld [vmem:[%s1921_s10 + $0x230] sm:$0xff]  ;;  %v2146_v16 = vmul.f32 %v2027_v7, %v306_v25  ;;  %v2149_v18 = vmul.f32 %v2027_v7, %v307_v26  ;;  %v2152_v19 = vmul.f32 %v2027_v7, %v308_v27  ;;  %v330_v5 = vld [vmem:[%s1921_s10 + $0x240] sm:$0xff] }
  0x9f   : > { %3717 = vst [vmem:[#allocation23_spill] sm:$0xff] %v2130_v8  ;;  %3718 = vst [vmem:[#allocation24_spill] sm:$0xff] %v2133_v9  ;;  %v329_v6 = vld [vmem:[%s1921_s10 + $0x238] sm:$0xff]  ;;  %v2155_v20 = vmul.f32 %v2027_v7, %v309_v28  ;;  %v331_v4 = vld [vmem:[%s1921_s10 + $0x248] sm:$0xff]  ;;  %v2162_v62 = vmul.f32 %v2027_v7, %v310_v34  ;;  %v2165_v25 = vmul.f32 %v2027_v7, %v311_v39 }
  0xa0   : > { %3719 = vst [vmem:[#allocation25_spill] sm:$0xff] %v2136_v10  ;;  %3720 = vst [vmem:[#allocation26_spill] sm:$0xff] %v2139_v11  ;;  %v332_v3 = vld [vmem:[%s1921_s10 + $0x250] sm:$0xff]  ;;  %v333_v11 = vld [vmem:[%s1921_s10 + $0x258] sm:$0xff]  ;;  %v2168_v26 = vmul.f32 %v2027_v7, %v312_v40  ;;  %v2171_v27 = vmul.f32 %v2027_v7, %v313_v41  ;;  %v2178_v34 = vmul.f32 %v2027_v7, %v314_v49 }
  0xa1   : > { %3721 = vst [vmem:[#allocation27_spill] sm:$0xff] %v2146_v16  ;;  %3722 = vst [vmem:[#allocation28_spill] sm:$0xff] %v2149_v18  ;;  %v334_v28 = vld [vmem:[%s1921_s10 + $0x260] sm:$0xff]  ;;  %v337_v18 = vld [vmem:[%s1921_s10 + $0x278] sm:$0xff]  ;;  %v2181_v39 = vmul.f32 %v2027_v7, %v315_v50  ;;  %v2184_v40 = vmul.f32 %v2027_v7, %v316_v30  ;;  %v2187_v41 = vmul.f32 %v2027_v7, %v317_v33 }
  0xa2   : > { %3723 = vst [vmem:[#allocation29_spill] sm:$0xff] %v2152_v19  ;;  %3724 = vst [vmem:[#allocation30_spill] sm:$0xff] %v2155_v20  ;;  %v335_v20 = vld [vmem:[%s1921_s10 + $0x268] sm:$0xff]  ;;  %v336_v19 = vld [vmem:[%s1921_s10 + $0x270] sm:$0xff]  ;;  %v2199_v50 = vmul.f32 %v2027_v7, %v319_v31  ;;  %v2202_v30 = vmul.f32 %v2027_v7, %v320_v29  ;;  %v2205_v33 = vmul.f32 %v2027_v7, %v321_v24 }
  0xa3   : > { %3725 = vst [vmem:[#allocation31_spill] sm:$0xff] %v2162_v62  ;;  %3726 = vst [vmem:[#allocation32_spill] sm:$0xff] %v2165_v25  ;;  %v339_v25 = vld [vmem:[%s1921_s10 + $0x288] sm:$0xff]  ;;  %v340_v62 = vld [vmem:[%s1921_s10 + $0x290] sm:$0xff] }
  0xa4   : > { %3727 = vst [vmem:[#allocation33_spill] sm:$0xff] %v2168_v26  ;;  %3728 = vst [vmem:[#allocation34_spill] sm:$0xff] %v2171_v27  ;;  %v2189_v27 = vpop.permute.xlu1 %402  ;;  %v338_v26 = vld [vmem:[%s1921_s10 + $0x280] sm:$0xff]  ;;  %v341_v49 = vld [vmem:[%s1921_s10 + $0x298] sm:$0xff] }
  0xa5   : > { %3729 = vst [vmem:[#allocation35_spill] sm:$0xff] %v2178_v34  ;;  %3730 = vst [vmem:[#allocation36_spill] sm:$0xff] %v2181_v39  ;;  %v2196_v34 = vmul.f32 %v2027_v7, %v318_v32  ;;  %v344_v39 = vld [vmem:[%s1921_s10 + $0x2b0] sm:$0xff]  ;;  %v345_v16 = vld [vmem:[%s1921_s10 + $0x2b8] sm:$0xff]  ;;  %v2212_v10 = vmul.f32 %v2189_v27, %v322_v23  ;;  %v2215_v32 = vmul.f32 %v2189_v27, %v323_v22 }
  0xa6   : > { %3731 = vst [vmem:[#allocation37_spill] sm:$0xff] %v2184_v40  ;;  %3732 = vst [vmem:[#allocation38_spill] sm:$0xff] %v2187_v41  ;;  %v342_v41 = vld [vmem:[%s1921_s10 + $0x2a0] sm:$0xff]  ;;  %v343_v40 = vld [vmem:[%s1921_s10 + $0x2a8] sm:$0xff]  ;;  %v2218_v31 = vmul.f32 %v2189_v27, %v324_v21  ;;  %v2221_v7 = vmul.f32 %v2189_v27, %v325_v15  ;;  %v2230_v23 = vmul.f32 %v2189_v27, %v327_v13 }
  0xa7   : > { %3733 = vst [vmem:[#allocation39_spill] sm:$0xff] %v2196_v34  ;;  %3734 = vst [vmem:[#allocation40_spill] sm:$0xff] %v2199_v50  ;;  %v346_v24 = vld [vmem:[%s1921_s10 + $0x2c0] sm:$0xff]  ;;  %v347_v29 = vld [vmem:[%s1921_s10 + $0x2c8] sm:$0xff]  ;;  %v2233_v22 = vmul.f32 %v2189_v27, %v328_v12  ;;  %v2236_v21 = vmul.f32 %v2189_v27, %v329_v6  ;;  %v2242_v61 = vmul.f32 %v2189_v27, %v330_v5 }
  0xa8   : > { %3735 = vst [vmem:[#allocation41_spill] sm:$0xff] %v2202_v30  ;;  %3736 = vst [vmem:[#allocation42_spill] sm:$0xff] %v2205_v33  ;;  %v348_v33 = vld [vmem:[%s1921_s10 + $0x2d0] sm:$0xff]  ;;  %v2227_v30 = vmul.f32 %v2189_v27, %v326_v14  ;;  %v349_v15 = vld [vmem:[%s1921_s10 + $0x2d8] sm:$0xff]  ;;  %v2245_v14 = vmul.f32 %v2189_v27, %v331_v4  ;;  %v2248_v13 = vmul.f32 %v2189_v27, %v332_v3 }
  0xa9   : > { %v350_v50 = vld [vmem:[%s1921_s10 + $0x2e0] sm:$0xff]  ;;  %v351_v34 = vld [vmem:[%s1921_s10 + $0x2e8] sm:$0xff]  ;;  %v2251_v12 = vmul.f32 %v2189_v27, %v333_v11  ;;  %v352_v6 = vld [vmem:[%s1921_s10 + $0x2f0] sm:$0xff]  ;;  %v2257_v8 = vmul.f32 %v2189_v27, %v334_v28  ;;  %v2260_v5 = vmul.f32 %v2189_v27, %v335_v20  ;;  %v2263_v4 = vmul.f32 %v2189_v27, %v336_v19 }
  0xaa   : > { %3737 = vst [vmem:[#allocation43_spill] sm:$0xff] %v2245_v14  ;;  %3738 = vst [vmem:[#allocation44_spill] sm:$0xff] %v2248_v13  ;;  %v353_v9 = vld [vmem:[%s1921_s10 + $0x2f8] sm:$0xff]  ;;  %v2266_v3 = vmul.f32 %v2189_v27, %v337_v18  ;;  %v355_v11 = vld [vmem:[%s1921_s10 + $0x308] sm:$0xff]  ;;  %v2272_v14 = vmul.f32 %v2189_v27, %v338_v26  ;;  %v2275_v28 = vmul.f32 %v2189_v27, %v339_v25  ;;  %v2283_v18 = vpop.permute.xlu1 %407 }
  0xab   : > { %3739 = vst [vmem:[#allocation45_spill] sm:$0xff] %v2251_v12  ;;  %3740 = vst [vmem:[#allocation46_spill] sm:$0xff] %v2260_v5  ;;  %v356_v12 = vld [vmem:[%s1921_s10 + $0x310] sm:$0xff]  ;;  %v357_v13 = vld [vmem:[%s1921_s10 + $0x318] sm:$0xff]  ;;  %v2278_v20 = vmul.f32 %v2189_v27, %v340_v62  ;;  %v2281_v19 = vmul.f32 %v2189_v27, %v341_v49  ;;  %v2289_v26 = vmul.f32 %v2189_v27, %v342_v41 }
  0xac   : > { %3741 = vst [vmem:[#allocation47_spill] sm:$0xff] %v2263_v4  ;;  %3742 = vst [vmem:[#allocation48_spill] sm:$0xff] %v2266_v3  ;;  %v358_v3 = vld [vmem:[%s1921_s10 + $0x320] sm:$0xff]  ;;  %v359_v4 = vld [vmem:[%s1921_s10 + $0x328] sm:$0xff]  ;;  %v2292_v25 = vmul.f32 %v2189_v27, %v343_v40  ;;  %v2295_v62 = vmul.f32 %v2189_v27, %v344_v39  ;;  %v2298_v49 = vmul.f32 %v2189_v27, %v345_v16 }
  0xad   : > { %3743 = vst [vmem:[#allocation49_spill] sm:$0xff] %v2272_v14  ;;  %3744 = vst [vmem:[#allocation50_spill] sm:$0xff] %v2275_v28  ;;  %v360_v5 = vld [vmem:[%s1921_s10 + $0x330] sm:$0xff]  ;;  %v363_v28 = vld [vmem:[%s1921_s10 + $0x348] sm:$0xff]  ;;  %v2304_v14 = vmul.f32 %v2189_v27, %v346_v24  ;;  %v2307_v41 = vmul.f32 %v2189_v27, %v347_v29  ;;  %v2310_v40 = vmul.f32 %v2189_v27, %v348_v33 }
  0xae   : > { %3745 = vst [vmem:[#allocation51_spill] sm:$0xff] %v2278_v20  ;;  %3746 = vst [vmem:[#allocation52_spill] sm:$0xff] %v2281_v19  ;;  %v361_v19 = vld [vmem:[%s1921_s10 + $0x338] sm:$0xff]  ;;  %v362_v20 = vld [vmem:[%s1921_s10 + $0x340] sm:$0xff]  ;;  %v2313_v39 = vmul.f32 %v2189_v27, %v349_v15  ;;  %v2322_v24 = vmul.f32 %v2189_v27, %v351_v34  ;;  %v2325_v29 = vmul.f32 %v2189_v27, %v352_v6 }
  0xaf   : > { %3747 = vst [vmem:[#allocation53_spill] sm:$0xff] %v2289_v26  ;;  %3748 = vst [vmem:[#allocation54_spill] sm:$0xff] %v2292_v25  ;;  %v365_v16 = vld [vmem:[%s1921_s10 + $0x358] sm:$0xff]  ;;  %v2319_v25 = vmul.f32 %v2189_v27, %v350_v50  ;;  %v2328_v33 = vmul.f32 %v2189_v27, %v353_v9  ;;  %v368_v15 = vld [vmem:[%s1921_s10 + $0x370] sm:$0xff]  ;;  %v2337_v50 = vmul.f32 %v2283_v18, %v355_v11 }
  0xb0   : > { %3749 = vst [vmem:[#allocation55_spill] sm:$0xff] %v2295_v62  ;;  %3750 = vst [vmem:[#allocation56_spill] sm:$0xff] %v2298_v49  ;;  %v364_v62 = vld [vmem:[%s1921_s10 + $0x350] sm:$0xff]  ;;  %v366_v49 = vld [vmem:[%s1921_s10 + $0x360] sm:$0xff]  ;;  %v2340_v34 = vmul.f32 %v2283_v18, %v356_v12  ;;  %v2343_v6 = vmul.f32 %v2283_v18, %v357_v13  ;;  %v2346_v9 = vmul.f32 %v2283_v18, %v358_v3 }
  0xb1   : > { %3751 = vst [vmem:[#allocation57_spill] sm:$0xff] %v2304_v14  ;;  %3752 = vst [vmem:[#allocation58_spill] sm:$0xff] %v2307_v41  ;;  %v2334_v41 = vmul.f32 %v2283_v18, %v354_v60  ;;  %v2349_v27 = vmul.f32 %v2283_v18, %v359_v4  ;;  %v2352_v60 = vmul.f32 %v2283_v18, %v360_v5  ;;  %v370_v12 = vld [vmem:[%s1921_s10 + $0x380] sm:$0xff]  ;;  %v372_v5 = vld [vmem:[%s1921_s10 + $0x390] sm:$0xff] }
  0xb2   : > { %3753 = vst [vmem:[#allocation59_spill] sm:$0xff] %v2310_v40  ;;  %3754 = vst [vmem:[#allocation60_spill] sm:$0xff] %v2313_v39  ;;  %v367_v40 = vld [vmem:[%s1921_s10 + $0x368] sm:$0xff]  ;;  %v369_v39 = vld [vmem:[%s1921_s10 + $0x378] sm:$0xff]  ;;  %v2355_v11 = vmul.f32 %v2283_v18, %v361_v19  ;;  %v2360_v13 = vmul.f32 %v2283_v18, %v362_v20  ;;  %v2363_v3 = vmul.f32 %v2283_v18, %v363_v28 }
  0xb3   : > { %3755 = vst [vmem:[#allocation61_spill] sm:$0xff] %v2319_v25  ;;  %3756 = vst [vmem:[#allocation62_spill] sm:$0xff] %v2322_v24  ;;  %v2366_v4 = vmul.f32 %v2283_v18, %v364_v62  ;;  %v373_v24 = vld [vmem:[%s1921_s10 + $0x398] sm:$0xff]  ;;  %v374_v25 = vld [vmem:[%s1921_s10 + $0x3a0] sm:$0xff]  ;;  %v2375_v19 = vmul.f32 %v2283_v18, %v366_v49  ;;  %v2378_v20 = vmul.f32 %v2283_v18, %v367_v40 }
  0xb4   : > { %3757 = vst [vmem:[#allocation63_spill] sm:$0xff] %v2325_v29  ;;  %3758 = vst [vmem:[#allocation64_spill] sm:$0xff] %v2328_v33  ;;  %v371_v33 = vld [vmem:[%s1921_s10 + $0x388] sm:$0xff]  ;;  %v2369_v29 = vmul.f32 %v2283_v18, %v365_v16  ;;  %v2381_v28 = vmul.f32 %v2283_v18, %v368_v15  ;;  %v2384_v62 = vmul.f32 %v2283_v18, %v369_v39  ;;  %v376_v16 = vld [vmem:[%s1921_s10 + $0x3b0] sm:$0xff] }
  0xb5   : > { %v375_v14 = vld [vmem:[%s1921_s10 + $0x3a8] sm:$0xff]  ;;  %v377_v26 = vld [vmem:[%s1921_s10 + $0x3b8] sm:$0xff]  ;;  %v547_v49 = vadd.f32 %v2085_v47, %v1955_v36  ;;  %v556_v40 = vadd.f32 %v2088_v48, %v1958_v37  ;;  %v565_v15 = vadd.f32 %v2091_v17, %v1961_v38  ;;  %v574_v39 = vadd.f32 %v2098_v55, %v1968_v43  ;;  %v382_v17 = vld [vmem:[%s1921_s10 + $0x3e0] sm:$0xff] }
  0xb6   : > { %3759 = vst [vmem:[#allocation65_spill] sm:$0xff] %v2369_v29  ;;  %3760 = vst [vmem:[#allocation66_spill] sm:$0xff] %v2384_v62  ;;  %v538_v29 = vadd.f32 %v2082_v42, %v1952_v35  ;;  %v583_v62 = vadd.f32 %v2101_v56, %v1971_v44  ;;  %v592_v35 = vadd.f32 %v2104_v57, %v1974_v45  ;;  %v378_v42 = vld [vmem:[%s1921_s10 + $0x3c0] sm:$0xff]  ;;  %v379_v37 = vld [vmem:[%s1921_s10 + $0x3c8] sm:$0xff] }
  0xb7   : > { %v601_v36 = vadd.f32 %v2107_v58, %v1977_v46  ;;  %v2408_v47 = vmul.f32 %v2283_v18, %v370_v12  ;;  %v2411_v38 = vmul.f32 %v2283_v18, %v371_v33  ;;  %v2414_v43 = vmul.f32 %v2283_v18, %v372_v5  ;;  %v380_v45 = vld [vmem:[%s1921_s10 + $0x3d0] sm:$0xff]  ;;  %v381_v48 = vld [vmem:[%s1921_s10 + $0x3d8] sm:$0xff]  ;;  %v383_v58 = vld [vmem:[%s1921_s10 + $0x3e8] sm:$0xff] }
  0xb8   : > { %v2417_v44 = vmul.f32 %v2283_v18, %v373_v24  ;;  %v2423_v46 = vmul.f32 %v2283_v18, %v374_v25  ;;  %v2426_v55 = vmul.f32 %v2283_v18, %v375_v14  ;;  %v2429_v56 = vmul.f32 %v2283_v18, %v376_v16  ;;  %v384_v33 = vld [vmem:[%s1921_s10 + $0x3f0] sm:$0xff]  ;;  %v385_v12 = vld [vmem:[%s1921_s10 + $0x3f8] sm:$0xff] }
  0xb9   : > { %v2432_v57 = vmul.f32 %v2283_v18, %v377_v26  ;;  %v539_v24 = vadd.f32 %v538_v29, %v2212_v10  ;;  %v548_v5 = vadd.f32 %v547_v49, %v2215_v32  ;;  %v566_v25 = vadd.f32 %v565_v15, %v2221_v7 }
  0xba   : > { %3761 = vst [vmem:[#allocation67_spill] sm:$0xff] %v2417_v44  ;;  %3762 = vst [vmem:[#allocation68_spill] sm:$0xff] %v2426_v55  ;;  %v557_v44 = vadd.f32 %v556_v40, %v2218_v31  ;;  %v575_v14 = vadd.f32 %v574_v39, %v2227_v30  ;;  %v584_v55 = vadd.f32 %v583_v62, %v2230_v23 }
  0xbb   : > { %3763 = vst [vmem:[#allocation69_spill] sm:$0xff] %v2429_v56  ;;  %3764 = vst [vmem:[#allocation70_spill] sm:$0xff] %v2432_v57  ;;  %v593_v16 = vadd.f32 %v592_v35, %v2233_v22  ;;  %v602_v26 = vadd.f32 %v601_v36, %v2236_v21  ;;  %v2446_v57 = vmul.f32 %v2283_v18, %v378_v42  ;;  %v3767_v35 = vld [vmem:[#allocation24_spill] sm:$0xff]  ;;  %v3768_v36 = vld [vmem:[#allocation5_spill] sm:$0xff] }
  0xbc   : > { %v2449_v56 = vmul.f32 %v2283_v18, %v379_v37  ;;  %v2452_v10 = vmul.f32 %v2283_v18, %v380_v45  ;;  %v2455_v32 = vmul.f32 %v2283_v18, %v381_v48  ;;  %v2458_v30 = vmul.f32 %v2283_v18, %v382_v17  ;;  %v3770_v37 = vld [vmem:[#allocation6_spill] sm:$0xff] }
  0xbd   : > { %v2461_v31 = vmul.f32 %v2283_v18, %v383_v58  ;;  %v2464_v7 = vmul.f32 %v2283_v18, %v384_v33  ;;  %v2467_v23 = vmul.f32 %v2283_v18, %v385_v12  ;;  %v540_v22 = vadd.f32 %v539_v24, %v2334_v41  ;;  %v3774_v33 = vld [vmem:[#allocation45_spill] sm:$0xff] }
  0xbe   : > { %v549_v21 = vadd.f32 %v548_v5, %v2337_v50  ;;  %v558_v29 = vadd.f32 %v557_v44, %v2340_v34  ;;  %v567_v62 = vadd.f32 %v566_v25, %v2343_v6  ;;  %v576_v49 = vadd.f32 %v575_v14, %v2346_v9  ;;  %v3765_v6 = vld [vmem:[#allocation23_spill] sm:$0xff]  ;;  %v3775_v5 = vld [vmem:[#allocation46_spill] sm:$0xff] }
  0xbf   : > { %v585_v40 = vadd.f32 %v584_v55, %v2349_v27  ;;  %v594_v15 = vadd.f32 %v593_v16, %v2352_v60  ;;  %v603_v39 = vadd.f32 %v602_v26, %v2355_v11  ;;  %v610_v18 = vadd.f32 %v2114_v63, %v1984_v51  ;;  %v3766_v27 = vld [vmem:[#allocation4_spill] sm:$0xff]  ;;  %v3769_v11 = vld [vmem:[#allocation25_spill] sm:$0xff]  ;;  %v3771_v51 = vld [vmem:[#allocation26_spill] sm:$0xff] }
  0xc0   : > { %v619_v41 = vadd.f32 %v2117_v0, %v1987_v52  ;;  %v628_v50 = vadd.f32 %v2120_v1, %v1990_v53  ;;  %v637_v34 = vadd.f32 %v2123_v2, %v1993_v54  ;;  %v646_v9 = vadd.f32 %v3765_v6, %v2000_v59  ;;  %v3772_v59 = vld [vmem:[#allocation43_spill] sm:$0xff]  ;;  %v3773_v55 = vld [vmem:[#allocation44_spill] sm:$0xff] }
  0xc1   : > { %v655_v60 = vadd.f32 %v3767_v35, %v3766_v27  ;;  %v664_v42 = vadd.f32 %v3769_v11, %v3768_v36  ;;  %v673_v63 = vadd.f32 %v3771_v51, %v3770_v37  ;;  %v541_v44 = vrot.slane %v540_v22, 4  ;;  %v3776_v14 = vld [vmem:[#allocation47_spill] sm:$0xff]  ;;  %v3777_v26 = vld [vmem:[#allocation48_spill] sm:$0xff] }
  0xc2   : > { %v550_v52 = vrot.slane %v549_v21, 4  ;;  %v559_v0 = vrot.slane %v558_v29, 4  ;;  %v568_v45 = vrot.slane %v567_v62, 4  ;;  %v577_v53 = vrot.slane %v576_v49, 4 }
  0xc3   : > { %v586_v1 = vrot.slane %v585_v40, 4  ;;  %v595_v48 = vrot.slane %v594_v15, 4  ;;  %v604_v54 = vrot.slane %v603_v39, 4  ;;  %v611_v2 = vadd.f32 %v610_v18, %v2242_v61 }
  0xc4   : > { %v620_v17 = vadd.f32 %v619_v41, %v3772_v59  ;;  %v629_v58 = vadd.f32 %v628_v50, %v3773_v55  ;;  %v638_v12 = vadd.f32 %v637_v34, %v3774_v33  ;;  %v647_v24 = vadd.f32 %v646_v9, %v2257_v8  ;;  %v3778_v9 = vld [vmem:[#allocation65_spill] sm:$0xff] }
  0xc5   : > { %v656_v25 = vadd.f32 %v655_v60, %v3775_v5  ;;  %v665_v16 = vadd.f32 %v664_v42, %v3776_v14  ;;  %v674_v6 = vadd.f32 %v673_v63, %v3777_v26  ;;  %v542_v27 = vadd.f32 %v541_v44, %v540_v22 }
  0xc6   : > { %v551_v35 = vadd.f32 %v550_v52, %v549_v21  ;;  %v560_v36 = vadd.f32 %v559_v0, %v558_v29  ;;  %v569_v11 = vadd.f32 %v568_v45, %v567_v62  ;;  %v578_v37 = vadd.f32 %v577_v53, %v576_v49  ;;  %v3779_v21 = vld [vmem:[#allocation66_spill] sm:$0xff] }
  0xc7   : > { %v587_v61 = vadd.f32 %v586_v1, %v585_v40  ;;  %v596_v18 = vadd.f32 %v595_v48, %v594_v15  ;;  %v605_v41 = vadd.f32 %v604_v54, %v603_v39  ;;  %v612_v50 = vadd.f32 %v611_v2, %v2360_v13 }
  0xc8   : > { %v621_v34 = vadd.f32 %v620_v17, %v2363_v3  ;;  %v630_v8 = vadd.f32 %v629_v58, %v2366_v4  ;;  %v639_v60 = vadd.f32 %v638_v12, %v3778_v9  ;;  %v648_v42 = vadd.f32 %v647_v24, %v2375_v19 }
  0xc9   : > { %v657_v51 = vadd.f32 %v656_v25, %v2378_v20  ;;  %v666_v22 = vadd.f32 %v665_v16, %v2381_v28  ;;  %v675_v29 = vadd.f32 %v674_v6, %v3779_v21  ;;  %v543_v62 = vrot.slane %v542_v27, 2 }
  0xca   : > { %v552_v49 = vrot.slane %v551_v35, 2  ;;  %v561_v40 = vrot.slane %v560_v36, 2  ;;  %v570_v15 = vrot.slane %v569_v11, 2  ;;  %v579_v39 = vrot.slane %v578_v37, 2 }
  0xcb   : > { %v588_v13 = vrot.slane %v587_v61, 2  ;;  %v597_v63 = vrot.slane %v596_v18, 2  ;;  %v606_v3 = vrot.slane %v605_v41, 2  ;;  %v613_v44 = vrot.slane %v612_v50, 4 }
  0xcc   : > { %v622_v4 = vrot.slane %v621_v34, 4  ;;  %v631_v52 = vrot.slane %v630_v8, 4  ;;  %v640_v0 = vrot.slane %v639_v60, 4  ;;  %v649_v45 = vrot.slane %v648_v42, 4 }
  0xcd   : > { %v658_v19 = vrot.slane %v657_v51, 4  ;;  %v667_v53 = vrot.slane %v666_v22, 4  ;;  %v676_v20 = vrot.slane %v675_v29, 4  ;;  %v544_v1 = vadd.f32 %v543_v62, %v542_v27 }
  0xce   : > { %v553_v28 = vadd.f32 %v552_v49, %v551_v35  ;;  %v562_v48 = vadd.f32 %v561_v40, %v560_v36  ;;  %v571_v54 = vadd.f32 %v570_v15, %v569_v11  ;;  %v580_v2 = vadd.f32 %v579_v39, %v578_v37 }
  0xcf   : > { %v589_v59 = vadd.f32 %v588_v13, %v587_v61  ;;  %v598_v17 = vadd.f32 %v597_v63, %v596_v18  ;;  %v607_v55 = vadd.f32 %v606_v3, %v605_v41  ;;  %v614_v58 = vadd.f32 %v613_v44, %v612_v50 }
  0xd0   : > { %v623_v33 = vadd.f32 %v622_v4, %v621_v34  ;;  %v632_v12 = vadd.f32 %v631_v52, %v630_v8  ;;  %v641_v24 = vadd.f32 %v640_v0, %v639_v60  ;;  %v650_v5 = vadd.f32 %v649_v45, %v648_v42  ;;  %v3780_v45 = vld [vmem:[#allocation7_spill] sm:$0xff] }
  0xd1   : > { %v659_v25 = vadd.f32 %v658_v19, %v657_v51  ;;  %v668_v14 = vadd.f32 %v667_v53, %v666_v22  ;;  %v677_v16 = vadd.f32 %v676_v20, %v675_v29  ;;  %v545_v26 = vrot.slane %v544_v1, 1  ;;  %v3781_v19 = vld [vmem:[#allocation27_spill] sm:$0xff]  ;;  %v3782_v20 = vld [vmem:[#allocation8_spill] sm:$0xff] }
  0xd2   : > { %v554_v6 = vrot.slane %v553_v28, 1  ;;  %v563_v9 = vrot.slane %v562_v48, 1  ;;  %v572_v21 = vrot.slane %v571_v54, 1  ;;  %v581_v27 = vrot.slane %v580_v2, 1 }
  0xd3   : > { %v590_v35 = vrot.slane %v589_v59, 1  ;;  %v599_v36 = vrot.slane %v598_v17, 1  ;;  %v608_v11 = vrot.slane %v607_v55, 1  ;;  %v615_v37 = vrot.slane %v614_v58, 2 }
  0xd4   : > { %v624_v61 = vrot.slane %v623_v33, 2  ;;  %v633_v18 = vrot.slane %v632_v12, 2  ;;  %v642_v41 = vrot.slane %v641_v24, 2  ;;  %v651_v50 = vrot.slane %v650_v5, 2 }
  0xd5   : > { %v660_v34 = vrot.slane %v659_v25, 2  ;;  %v669_v8 = vrot.slane %v668_v14, 2  ;;  %v678_v60 = vrot.slane %v677_v16, 2  ;;  %v2509_v42 = vadd.f32 %v545_v26, %v544_v1  ;;  %v3783_v1 = vld [vmem:[#allocation28_spill] sm:$0xff] }
  0xd6   : > { %v2511_v51 = vadd.f32 %v554_v6, %v553_v28  ;;  %v2513_v22 = vadd.f32 %v563_v9, %v562_v48  ;;  %v2515_v29 = vadd.f32 %v572_v21, %v571_v54  ;;  %v2517_v62 = vadd.f32 %v581_v27, %v580_v2  ;;  %v3784_v48 = vld [vmem:[#allocation9_spill] sm:$0xff]  ;;  %v3794_v6 = vld [vmem:[#allocation14_spill] sm:$0xff] }
  0xd7   : > { %v2519_v49 = vadd.f32 %v590_v35, %v589_v59  ;;  %v2521_v40 = vadd.f32 %v599_v36, %v598_v17  ;;  %v2523_v15 = vadd.f32 %v608_v11, %v607_v55  ;;  %v616_v39 = vadd.f32 %v615_v37, %v614_v58  ;;  %v3785_v54 = vld [vmem:[#allocation29_spill] sm:$0xff]  ;;  %v3786_v59 = vld [vmem:[#allocation10_spill] sm:$0xff]  ;;  %v3788_v58 = vld [vmem:[#allocation11_spill] sm:$0xff] }
  0xd8   : > { %v625_v13 = vadd.f32 %v624_v61, %v623_v33  ;;  %v634_v63 = vadd.f32 %v633_v18, %v632_v12  ;;  %v643_v3 = vadd.f32 %v642_v41, %v641_v24  ;;  %v652_v44 = vadd.f32 %v651_v50, %v650_v5  ;;  %v3787_v17 = vld [vmem:[#allocation30_spill] sm:$0xff]  ;;  %v3789_v33 = vld [vmem:[#allocation31_spill] sm:$0xff]  ;;  %v3790_v24 = vld [vmem:[#allocation12_spill] sm:$0xff] }
  0xd9   : > { %v661_v4 = vadd.f32 %v660_v34, %v659_v25  ;;  %v670_v52 = vadd.f32 %v669_v8, %v668_v14  ;;  %v679_v0 = vadd.f32 %v678_v60, %v677_v16  ;;  %v682_v53 = vadd.f32 %v3781_v19, %v3780_v45  ;;  %v3791_v5 = vld [vmem:[#allocation32_spill] sm:$0xff]  ;;  %v3792_v14 = vld [vmem:[#allocation13_spill] sm:$0xff]  ;;  %v3795_v9 = vld [vmem:[#allocation34_spill] sm:$0xff] }
  0xda   : > { %v691_v28 = vadd.f32 %v3783_v1, %v3782_v20  ;;  %v700_v2 = vadd.f32 %v3785_v54, %v3784_v48  ;;  %v709_v55 = vadd.f32 %v3787_v17, %v3786_v59  ;;  %v718_v12 = vadd.f32 %v3789_v33, %v3788_v58  ;;  %v3793_v16 = vld [vmem:[#allocation33_spill] sm:$0xff]  ;;  %v3797_v8 = vld [vmem:[#allocation50_spill] sm:$0xff]  ;;  %v3798_v45 = vld [vmem:[#allocation51_spill] sm:$0xff] }
  0xdb   : > { %v727_v25 = vadd.f32 %v3791_v5, %v3790_v24  ;;  %v736_v26 = vadd.f32 %v3793_v16, %v3792_v14  ;;  %v745_v21 = vadd.f32 %v3795_v9, %v3794_v6  ;;  %v617_v27 = vrot.slane %v616_v39, 1  ;;  %v3796_v50 = vld [vmem:[#allocation49_spill] sm:$0xff]  ;;  %v3799_v20 = vld [vmem:[#allocation52_spill] sm:$0xff]  ;;  %v3801_v59 = vld [vmem:[#allocation54_spill] sm:$0xff] }
  0xdc   : > { %v626_v35 = vrot.slane %v625_v13, 1  ;;  %v635_v36 = vrot.slane %v634_v63, 1  ;;  %v644_v11 = vrot.slane %v643_v3, 1  ;;  %v653_v37 = vrot.slane %v652_v44, 1  ;;  %v3800_v48 = vld [vmem:[#allocation53_spill] sm:$0xff]  ;;  %v3802_v58 = vld [vmem:[#allocation55_spill] sm:$0xff] }
  0xdd   : > { %v662_v61 = vrot.slane %v661_v4, 1  ;;  %v671_v18 = vrot.slane %v670_v52, 1  ;;  %v680_v41 = vrot.slane %v679_v0, 1  ;;  %v683_v34 = vadd.f32 %v682_v53, %v3796_v50  ;;  %v3803_v24 = vld [vmem:[#allocation56_spill] sm:$0xff] }
  0xde   : > { %v692_v60 = vadd.f32 %v691_v28, %v3797_v8  ;;  %v701_v19 = vadd.f32 %v700_v2, %v3798_v45  ;;  %v710_v1 = vadd.f32 %v709_v55, %v3799_v20  ;;  %v719_v54 = vadd.f32 %v718_v12, %v3800_v48  ;;  %v3821_v45 = vld [vmem:[#allocation40_spill] sm:$0xff]  ;;  %v3822_v20 = vld [vmem:[#allocation21_spill] sm:$0xff] }
  0xdf   : > { %v728_v17 = vadd.f32 %v727_v25, %v3801_v59  ;;  %v737_v33 = vadd.f32 %v736_v26, %v3802_v58  ;;  %v746_v5 = vadd.f32 %v745_v21, %v3803_v24  ;;  %v2549_v14 = vadd.f32 %v617_v27, %v616_v39  ;;  %v3825_v59 = vld [vmem:[#allocation42_spill] sm:$0xff]  ;;  %v3826_v24 = vld [vmem:[#allocation57_spill] sm:$0xff] }
  0xe0   : > { %v2551_v16 = vadd.f32 %v626_v35, %v625_v13  ;;  %v2553_v6 = vadd.f32 %v635_v36, %v634_v63  ;;  %v2555_v53 = vadd.f32 %v644_v11, %v643_v3  ;;  %v2557_v28 = vadd.f32 %v653_v37, %v652_v44  ;;  %v3806_v13 = vld [vmem:[#allocation67_spill] sm:$0xff]  ;;  %v3807_v3 = vld [vmem:[#allocation68_spill] sm:$0xff]  ;;  %v3808_v44 = vld [vmem:[#allocation69_spill] sm:$0xff] }
  0xe1   : > { %v2559_v2 = vadd.f32 %v662_v61, %v661_v4  ;;  %v2561_v55 = vadd.f32 %v671_v18, %v670_v52  ;;  %v2563_v12 = vadd.f32 %v680_v41, %v679_v0  ;;  %v684_v25 = vadd.f32 %v683_v34, %v2408_v47  ;;  %v3809_v4 = vld [vmem:[#allocation70_spill] sm:$0xff]  ;;  %v3810_v52 = vld [vmem:[#allocation15_spill] sm:$0xff]  ;;  %v3812_v11 = vld [vmem:[#allocation16_spill] sm:$0xff] }
  0xe2   : > { %v693_v26 = vadd.f32 %v692_v60, %v2411_v38  ;;  %v702_v39 = vadd.f32 %v701_v19, %v2414_v43  ;;  %v711_v9 = vadd.f32 %v710_v1, %v3806_v13  ;;  %v720_v63 = vadd.f32 %v719_v54, %v2423_v46  ;;  %v3811_v36 = vld [vmem:[#allocation35_spill] sm:$0xff]  ;;  %v3813_v37 = vld [vmem:[#allocation36_spill] sm:$0xff]  ;;  %v3814_v61 = vld [vmem:[#allocation17_spill] sm:$0xff] }
  0xe3   : > { %3804 = vst [vmem:[#allocation23_spill] sm:$0xff] %v2561_v55  ;;  %3805 = vst [vmem:[#allocation4_spill] sm:$0xff] %v2563_v12  ;;  %v729_v21 = vadd.f32 %v728_v17, %v3807_v3  ;;  %v738_v27 = vadd.f32 %v737_v33, %v3808_v44  ;;  %v747_v35 = vadd.f32 %v746_v5, %v3809_v4  ;;  %v3815_v38 = vld [vmem:[#allocation37_spill] sm:$0xff]  ;;  %v3816_v43 = vld [vmem:[#allocation18_spill] sm:$0xff]  ;;  %v685_v58 = vrot.slane %v684_v25, 4 }
  0xe4   : > { %v754_v0 = vadd.f32 %v3811_v36, %v3810_v52  ;;  %v763_v47 = vadd.f32 %v3813_v37, %v3812_v11  ;;  %v772_v18 = vadd.f32 %v3815_v38, %v3814_v61  ;;  %v3817_v41 = vld [vmem:[#allocation38_spill] sm:$0xff]  ;;  %v3818_v34 = vld [vmem:[#allocation19_spill] sm:$0xff]  ;;  %v3820_v60 = vld [vmem:[#allocation20_spill] sm:$0xff]  ;;  %v694_v33 = vrot.slane %v693_v26, 4 }
  0xe5   : > { %v781_v50 = vadd.f32 %v3817_v41, %v3816_v43  ;;  %v3819_v46 = vld [vmem:[#allocation39_spill] sm:$0xff]  ;;  %v799_v19 = vadd.f32 %v3821_v45, %v3820_v60  ;;  %v3823_v1 = vld [vmem:[#allocation41_spill] sm:$0xff]  ;;  %v3824_v54 = vld [vmem:[#allocation22_spill] sm:$0xff]  ;;  %v703_v44 = vrot.slane %v702_v39, 4  ;;  %v712_v4 = vrot.slane %v711_v9, 4 }
  0xe6   : > { %v790_v8 = vadd.f32 %v3819_v46, %v3818_v34  ;;  %v808_v48 = vadd.f32 %v3823_v1, %v3822_v20  ;;  %v817_v17 = vadd.f32 %v3825_v59, %v3824_v54  ;;  %v755_v5 = vadd.f32 %v754_v0, %v3826_v24  ;;  %v3827_v13 = vld [vmem:[#allocation58_spill] sm:$0xff]  ;;  %v3828_v52 = vld [vmem:[#allocation59_spill] sm:$0xff]  ;;  %v3829_v11 = vld [vmem:[#allocation60_spill] sm:$0xff] }
  0xe7   : > { %v764_v3 = vadd.f32 %v763_v47, %v3827_v13  ;;  %v773_v36 = vadd.f32 %v772_v18, %v3828_v52  ;;  %v782_v37 = vadd.f32 %v781_v50, %v3829_v11  ;;  %v721_v61 = vrot.slane %v720_v63, 4  ;;  %v3830_v38 = vld [vmem:[#allocation61_spill] sm:$0xff]  ;;  %v3831_v41 = vld [vmem:[#allocation62_spill] sm:$0xff]  ;;  %v3832_v46 = vld [vmem:[#allocation63_spill] sm:$0xff] }
  0xe8   : > { %v791_v43 = vadd.f32 %v790_v8, %v3830_v38  ;;  %v800_v34 = vadd.f32 %v799_v19, %v3831_v41  ;;  %v809_v60 = vadd.f32 %v808_v48, %v3832_v46  ;;  %v730_v45 = vrot.slane %v729_v21, 4  ;;  %v3833_v0 = vld [vmem:[#allocation64_spill] sm:$0xff] }
  0xe9   : > { %v739_v20 = vrot.slane %v738_v27, 4  ;;  %v756_v1 = vadd.f32 %v755_v5, %v2446_v57  ;;  %v818_v54 = vadd.f32 %v817_v17, %v3833_v0  ;;  %v686_v47 = vadd.f32 %v685_v58, %v684_v25 }
  0xea   : > { %v695_v59 = vadd.f32 %v694_v33, %v693_v26  ;;  %v748_v24 = vrot.slane %v747_v35, 4  ;;  %v765_v18 = vadd.f32 %v764_v3, %v2449_v56  ;;  %v704_v13 = vadd.f32 %v703_v44, %v702_v39 }
  0xeb   : > { %v713_v50 = vadd.f32 %v712_v4, %v711_v9  ;;  %v774_v52 = vadd.f32 %v773_v36, %v2452_v10  ;;  %v783_v8 = vadd.f32 %v782_v37, %v2455_v32  ;;  %v722_v19 = vadd.f32 %v721_v61, %v720_v63 }
  0xec   : > { %v792_v48 = vadd.f32 %v791_v43, %v2458_v30  ;;  %v801_v11 = vadd.f32 %v800_v34, %v2461_v31  ;;  %v810_v57 = vadd.f32 %v809_v60, %v2464_v7  ;;  %v731_v5 = vadd.f32 %v730_v45, %v729_v21 }
  0xed   : > { %v740_v17 = vadd.f32 %v739_v20, %v738_v27  ;;  %v757_v25 = vrot.slane %v756_v1, 4  ;;  %v819_v26 = vadd.f32 %v818_v54, %v2467_v23  ;;  %v687_v58 = vrot.slane %v686_v47, 2 }
  0xee   : > { %v696_v56 = vrot.slane %v695_v59, 2  ;;  %v749_v39 = vadd.f32 %v748_v24, %v747_v35  ;;  %v766_v9 = vrot.slane %v765_v18, 4  ;;  %v705_v33 = vrot.slane %v704_v13, 2 }
  0xef   : > { %v714_v10 = vrot.slane %v713_v50, 2  ;;  %v775_v3 = vrot.slane %v774_v52, 4  ;;  %v784_v32 = vrot.slane %v783_v8, 4  ;;  %v723_v63 = vrot.slane %v722_v19, 2 }
  0xf0   : > { %v793_v44 = vrot.slane %v792_v48, 4  ;;  %v802_v30 = vrot.slane %v801_v11, 4  ;;  %v811_v4 = vrot.slane %v810_v57, 4  ;;  %v732_v31 = vrot.slane %v731_v5, 2 }
  0xf1   : > { %v741_v36 = vrot.slane %v740_v17, 2  ;;  %v758_v7 = vadd.f32 %v757_v25, %v756_v1  ;;  %v820_v21 = vrot.slane %v819_v26, 4  ;;  %v688_v27 = vadd.f32 %v687_v58, %v686_v47 }
  0xf2   : > { %v697_v37 = vadd.f32 %v696_v56, %v695_v59  ;;  %v750_v61 = vrot.slane %v749_v39, 2  ;;  %v767_v23 = vadd.f32 %v766_v9, %v765_v18  ;;  %v706_v38 = vadd.f32 %v705_v33, %v704_v13 }
  0xf3   : > { %v715_v43 = vadd.f32 %v714_v10, %v713_v50  ;;  %v776_v35 = vadd.f32 %v775_v3, %v774_v52  ;;  %v785_v41 = vadd.f32 %v784_v32, %v783_v8  ;;  %v724_v34 = vadd.f32 %v723_v63, %v722_v19 }
  0xf4   : > { %v794_v46 = vadd.f32 %v793_v44, %v792_v48  ;;  %v803_v60 = vadd.f32 %v802_v30, %v801_v11  ;;  %v812_v45 = vadd.f32 %v811_v4, %v810_v57  ;;  %v733_v20 = vadd.f32 %v732_v31, %v731_v5 }
  0xf5   : > { %v742_v0 = vadd.f32 %v741_v36, %v740_v17  ;;  %v759_v54 = vrot.slane %v758_v7, 2  ;;  %v821_v24 = vadd.f32 %v820_v21, %v819_v26  ;;  %v689_v12 = vrot.slane %v688_v27, 1  ;;  %v3834_v36 = vld [vmem:[#allocation3_spill] sm:$0xff] }
  0xf6   : > { %v698_v55 = vrot.slane %v697_v37, 1  ;;  %v751_v1 = vadd.f32 %v750_v61, %v749_v39  ;;  %v768_v25 = vrot.slane %v767_v23, 2  ;;  %v707_v47 = vrot.slane %v706_v38, 1 }
  0xf7   : > { %v716_v59 = vrot.slane %v715_v43, 1  ;;  %v777_v58 = vrot.slane %v776_v35, 2  ;;  %v786_v18 = vrot.slane %v785_v41, 2  ;;  %v725_v13 = vrot.slane %v724_v34, 1 }
  0xf8   : > { %v795_v50 = vrot.slane %v794_v46, 2  ;;  %v804_v52 = vrot.slane %v803_v60, 2  ;;  %v813_v8 = vrot.slane %v812_v45, 2  ;;  %v734_v19 = vrot.slane %v733_v20, 1 }
  0xf9   : > { %v743_v48 = vrot.slane %v742_v0, 1  ;;  %v760_v11 = vadd.f32 %v759_v54, %v758_v7  ;;  %v822_v57 = vrot.slane %v821_v24, 2  ;;  %v2605_v5 = vadd.f32 %v689_v12, %v688_v27 }
  0xfa   : > { %v2607_v17 = vadd.f32 %v698_v55, %v697_v37  ;;  %v752_v26 = vrot.slane %v751_v1, 1  ;;  %v769_v56 = vadd.f32 %v768_v25, %v767_v23  ;;  %v2609_v39 = vadd.f32 %v707_v47, %v706_v38 }
  0xfb   : > { %v2611_v9 = vadd.f32 %v716_v59, %v715_v43  ;;  %v778_v33 = vadd.f32 %v777_v58, %v776_v35  ;;  %v787_v10 = vadd.f32 %v786_v18, %v785_v41  ;;  %v2613_v3 = vadd.f32 %v725_v13, %v724_v34 }
  0xfc   : > { %v796_v32 = vadd.f32 %v795_v50, %v794_v46  ;;  %v805_v63 = vadd.f32 %v804_v52, %v803_v60  ;;  %v814_v44 = vadd.f32 %v813_v8, %v812_v45  ;;  %v2615_v30 = vadd.f32 %v734_v19, %v733_v20 }
  0xfd   : > { %v2617_v4 = vadd.f32 %v743_v48, %v742_v0  ;;  %v761_v12 = vrot.slane %v760_v11, 1  ;;  %v823_v55 = vadd.f32 %v822_v57, %v821_v24  ;;  %v770_v31 = vrot.slane %v769_v56, 1 }
  0xfe   : > { %v828_v7 = vadd.f32 %v3834_v36, %v2509_v42  ;;  %v829_v21 = vadd.f32 %v3834_v36, %v2511_v51  ;;  %v830_v27 = vadd.f32 %v3834_v36, %v2513_v22  ;;  %v2625_v37 = vadd.f32 %v752_v26, %v751_v1 }
  0xff   : > { %v779_v61 = vrot.slane %v778_v33, 1  ;;  %v788_v23 = vrot.slane %v787_v10, 1  ;;  %v831_v38 = vadd.f32 %v3834_v36, %v2515_v29  ;;  %v797_v43 = vrot.slane %v796_v32, 1 }
 0x100   : > { %v806_v35 = vrot.slane %v805_v63, 1  ;;  %v815_v41 = vrot.slane %v814_v44, 1  ;;  %v832_v34 = vadd.f32 %v3834_v36, %v2517_v62  ;;  %v2631_v42 = vadd.f32 %v761_v12, %v760_v11 }
 0x101   : > { %v824_v46 = vrot.slane %v823_v55, 1  ;;  %v833_v51 = vadd.f32 %v3834_v36, %v2519_v49  ;;  %v834_v22 = vadd.f32 %v3834_v36, %v2521_v40  ;;  %v2637_v60 = vadd.f32 %v770_v31, %v769_v56 }
 0x102   : > { %v860_v45 = vsub.f32 0.0, %v828_v7  ;;  %v861_v20 = vsub.f32 0.0, %v829_v21  ;;  %v862_v29 = vsub.f32 0.0, %v830_v27  ;;  %v2639_v0 = vadd.f32 %v779_v61, %v778_v33  ;;  %v3835_v33 = vld [vmem:[#allocation23_spill] sm:$0xff] }
 0x103   : > { %v2641_v54 = vadd.f32 %v788_v23, %v787_v10  ;;  %v835_v62 = vadd.f32 %v3834_v36, %v2523_v15  ;;  %v863_v24 = vsub.f32 0.0, %v831_v38  ;;  %v2645_v1 = vadd.f32 %v797_v43, %v796_v32 }
 0x104   : > { %v2647_v25 = vadd.f32 %v806_v35, %v805_v63  ;;  %v836_v49 = vadd.f32 %v3834_v36, %v2549_v14  ;;  %v864_v40 = vsub.f32 0.0, %v832_v34  ;;  %v2651_v47 = vadd.f32 %v815_v41, %v814_v44  ;;  %v3836_v63 = vld [vmem:[#allocation4_spill] sm:$0xff] }
 0x105   : > { %v837_v59 = vadd.f32 %v3834_v36, %v2551_v16  ;;  %v865_v58 = vsub.f32 0.0, %v833_v51  ;;  %v866_v18 = vsub.f32 0.0, %v834_v22  ;;  %v838_v13 = vadd.f32 %v3834_v36, %v2553_v6 }
 0x106   : > { %v892_v15 = vmul.f32 1.442695, %v860_v45  ;;  %v894_v50 = vmul.f32 1.442695, %v861_v20  ;;  %v896_v52 = vmul.f32 1.442695, %v862_v29  ;;  %v2657_v8 = vadd.f32 %v824_v46, %v823_v55 }
 0x107   : > { %v839_v19 = vadd.f32 %v3834_v36, %v2555_v53  ;;  %v867_v14 = vsub.f32 0.0, %v835_v62  ;;  %v898_v48 = vmul.f32 1.442695, %v863_v24  ;;  %v840_v11 = vadd.f32 %v3834_v36, %v2557_v28 }
 0x108   : > { %v868_v57 = vsub.f32 0.0, %v836_v49  ;;  %1570 = vpow2.f32 %v892_v15  ;;  %v900_v16 = vmul.f32 1.442695, %v864_v40  ;;  %v841_v26 = vadd.f32 %v3834_v36, %v2559_v2 }
 0x109   : > { %v869_v6 = vsub.f32 0.0, %v837_v59  ;;  %1572 = vpow2.f32 %v894_v50  ;;  %v902_v56 = vmul.f32 1.442695, %v865_v58  ;;  %v842_v10 = vadd.f32 %v3834_v36, %v3835_v33 }
 0x10a   : > { %v870_v32 = vsub.f32 0.0, %v838_v13  ;;  %1574 = vpow2.f32 %v896_v52  ;;  %v904_v53 = vmul.f32 1.442695, %v866_v18  ;;  %v843_v44 = vadd.f32 %v3834_v36, %v3836_v63 }
 0x10b   : > { %v871_v12 = vsub.f32 0.0, %v839_v19  ;;  %1576 = vpow2.f32 %v898_v48  ;;  %v906_v28 = vmul.f32 1.442695, %v867_v14  ;;  %v844_v55 = vadd.f32 %v3834_v36, %v2605_v5 }
 0x10c   : > { %v872_v31 = vsub.f32 0.0, %v840_v11  ;;  %1578 = vpow2.f32 %v900_v16  ;;  %v908_v2 = vmul.f32 1.442695, %v868_v57  ;;  %v845_v7 = vadd.f32 %v3834_v36, %v2607_v17 }
 0x10d   : > { %v873_v21 = vsub.f32 0.0, %v841_v26  ;;  %1580 = vpow2.f32 %v902_v56  ;;  %v910_v27 = vmul.f32 1.442695, %v869_v6  ;;  %v846_v61 = vadd.f32 %v3834_v36, %v2609_v39 }
 0x10e   : > { %v874_v23 = vsub.f32 0.0, %v842_v10  ;;  %1582 = vpow2.f32 %v904_v53  ;;  %v912_v38 = vmul.f32 1.442695, %v870_v32  ;;  %v847_v43 = vadd.f32 %v3834_v36, %v2611_v9 }
 0x10f   : > { %v875_v35 = vsub.f32 0.0, %v843_v44  ;;  %1584 = vpow2.f32 %v906_v28  ;;  %v914_v5 = vmul.f32 1.442695, %v871_v12  ;;  %v848_v41 = vadd.f32 %v3834_v36, %v2613_v3 }
 0x110   : > { %v876_v34 = vsub.f32 0.0, %v844_v55  ;;  %1586 = vpow2.f32 %v908_v2  ;;  %v916_v17 = vmul.f32 1.442695, %v872_v31  ;;  %v849_v46 = vadd.f32 %v3834_v36, %v2615_v30 }
 0x111   : > { %v877_v51 = vsub.f32 0.0, %v845_v7  ;;  %1588 = vpow2.f32 %v910_v27  ;;  %v918_v39 = vmul.f32 1.442695, %v873_v21  ;;  %v850_v9 = vadd.f32 %v3834_v36, %v2617_v4 }
 0x112   : > { %v2681_v22 = vpop.eup %1570  ;;  %v878_v45 = vsub.f32 0.0, %v846_v61  ;;  %1590 = vpow2.f32 %v912_v38  ;;  %v920_v20 = vmul.f32 1.442695, %v874_v23  ;;  %v851_v3 = vadd.f32 %v3834_v36, %v2625_v37 }
 0x113   : > { %v2685_v29 = vpop.eup %1572  ;;  %v879_v62 = vsub.f32 0.0, %v847_v43  ;;  %1592 = vpow2.f32 %v914_v5  ;;  %v922_v24 = vmul.f32 1.442695, %v875_v35  ;;  %v852_v49 = vadd.f32 %v3834_v36, %v2631_v42 }
 0x114   : > { %v2689_v30 = vpop.eup %1574  ;;  %v880_v40 = vsub.f32 0.0, %v848_v41  ;;  %1594 = vpow2.f32 %v916_v17  ;;  %v924_v59 = vmul.f32 1.442695, %v876_v34  ;;  %v853_v58 = vadd.f32 %v3834_v36, %v2637_v60 }
 0x115   : > { %v2693_v4 = vpop.eup %1576  ;;  %v881_v18 = vsub.f32 0.0, %v849_v46  ;;  %1596 = vpow2.f32 %v918_v39  ;;  %v926_v13 = vmul.f32 1.442695, %v877_v51  ;;  %v854_v15 = vadd.f32 %v3834_v36, %v2639_v0 }
 0x116   : > { %v2697_v37 = vpop.eup %1578  ;;  %v882_v50 = vsub.f32 0.0, %v850_v9  ;;  %1598 = vpow2.f32 %v920_v20  ;;  %v928_v52 = vmul.f32 1.442695, %v878_v45  ;;  %v855_v19 = vadd.f32 %v3834_v36, %v2641_v54 }
 0x117   : > { %v2701_v42 = vpop.eup %1580  ;;  %v883_v14 = vsub.f32 0.0, %v851_v3  ;;  %1600 = vpow2.f32 %v922_v24  ;;  %v930_v48 = vmul.f32 1.442695, %v879_v62  ;;  %v856_v11 = vadd.f32 %v3834_v36, %v2645_v1 }
 0x118   : > { %v2705_v60 = vpop.eup %1582  ;;  %v884_v57 = vsub.f32 0.0, %v852_v49  ;;  %1602 = vpow2.f32 %v924_v59  ;;  %v932_v16 = vmul.f32 1.442695, %v880_v40  ;;  %v857_v26 = vadd.f32 %v3834_v36, %v2647_v25 }
 0x119   : > { %v1585_v0 = vpop.eup %1584  ;;  %v885_v6 = vsub.f32 0.0, %v853_v58  ;;  %1604 = vpow2.f32 %v926_v13  ;;  %v934_v56 = vmul.f32 1.442695, %v881_v18  ;;  %v858_v54 = vadd.f32 %v3834_v36, %v2651_v47 }
 0x11a   : > { %v1587_v33 = vpop.eup %1586  ;;  %v886_v10 = vsub.f32 0.0, %v854_v15  ;;  %1606 = vpow2.f32 %v928_v52  ;;  %v936_v32 = vmul.f32 1.442695, %v882_v50  ;;  %v859_v1 = vadd.f32 %v3834_v36, %v2657_v8 }
 0x11b   : > { %v1589_v53 = vpop.eup %1588  ;;  %v887_v63 = vsub.f32 0.0, %v855_v19  ;;  %1608 = vpow2.f32 %v930_v48  ;;  %v938_v44 = vmul.f32 1.442695, %v883_v14  ;;  %v888_v28 = vsub.f32 0.0, %v856_v11 }
 0x11c   : > { %v1591_v12 = vpop.eup %1590  ;;  %1610 = vpow2.f32 %v932_v16  ;;  %v940_v25 = vmul.f32 1.442695, %v884_v57  ;;  %v889_v31 = vsub.f32 0.0, %v857_v26  ;;  %v942_v2 = vmul.f32 1.442695, %v885_v6 }
 0x11d   : > { %v1593_v55 = vpop.eup %1592  ;;  %1612 = vpow2.f32 %v934_v56  ;;  %v890_v47 = vsub.f32 0.0, %v858_v54  ;;  %v944_v21 = vmul.f32 1.442695, %v886_v10  ;;  %v891_v61 = vsub.f32 0.0, %v859_v1 }
 0x11e   : > { %v1595_v7 = vpop.eup %1594  ;;  %1614 = vpow2.f32 %v936_v32  ;;  %v946_v23 = vmul.f32 1.442695, %v887_v63  ;;  %v948_v8 = vmul.f32 1.442695, %v888_v28  ;;  %v950_v43 = vmul.f32 1.442695, %v889_v31  ;;  %v2746_v28 = vpop.permute.xlu1 %1031 }
 0x11f   : > { %v1597_v27 = vpop.eup %1596  ;;  %1616 = vpow2.f32 %v938_v44  ;;  %v952_v5 = vmul.f32 1.442695, %v890_v47  ;;  %v954_v34 = vmul.f32 1.442695, %v891_v61  ;;  %v956_v46 = vadd.f32 1.0, %v2681_v22 }
 0x120   : > { %v1599_v36 = vpop.eup %1598  ;;  %1618 = vpow2.f32 %v940_v25  ;;  %v957_v39 = vadd.f32 1.0, %v2685_v29  ;;  %v958_v45 = vadd.f32 1.0, %v2689_v30  ;;  %v959_v3 = vadd.f32 1.0, %v2693_v4  ;;  %v2722_v4 = vpop.permute.xlu0 %1026 }
 0x121   : > { %v1601_v38 = vpop.eup %1600  ;;  %1620 = vpow2.f32 %v942_v2  ;;  %v960_v24 = vadd.f32 1.0, %v2697_v37  ;;  %v961_v40 = vadd.f32 1.0, %v2701_v42  ;;  %v962_v59 = vadd.f32 1.0, %v2705_v60 }
 0x122   : > { %v1603_v35 = vpop.eup %1602  ;;  %1622 = vpow2.f32 %v944_v21  ;;  %v963_v29 = vadd.f32 1.0, %v1585_v0  ;;  %v964_v18 = vadd.f32 1.0, %v1587_v33  ;;  %v965_v30 = vadd.f32 1.0, %v1589_v53 }
 0x123   : > { %v1605_v41 = vpop.eup %1604  ;;  %1624 = vpow2.f32 %v946_v23  ;;  %v966_v13 = vadd.f32 1.0, %v1591_v12  ;;  %v967_v50 = vadd.f32 1.0, %v1593_v55  ;;  %v968_v37 = vadd.f32 1.0, %v1595_v7 }
 0x124   : > { %v1607_v17 = vpop.eup %1606  ;;  %1626 = vpow2.f32 %v948_v8  ;;  %v969_v52 = vadd.f32 1.0, %v1597_v27  ;;  %v970_v42 = vadd.f32 1.0, %v1599_v36  ;;  %v971_v14 = vadd.f32 1.0, %v1601_v38  ;;  %v2748_v25 = vpop.permute.xlu0 %1036 }
 0x125   : > { %v1609_v51 = vpop.eup %1608  ;;  %1628 = vpow2.f32 %v950_v43  ;;  %v972_v48 = vadd.f32 1.0, %v1603_v35  ;;  %v973_v11 = vadd.f32 1.0, %v1605_v41  ;;  %v974_v57 = vadd.f32 1.0, %v1607_v17 }
 0x126   : > { %v1611_v9 = vpop.eup %1610  ;;  %1630 = vpow2.f32 %v952_v5  ;;  %v2724_v16 = vadd.f32 1.0, %v1609_v51 }
 0x127   : > { %v1613_v20 = vpop.eup %1612  ;;  %1632 = vpow2.f32 %v954_v34  ;;  %v2726_v26 = vadd.f32 1.0, %v1611_v9 }
 0x128   : > { %v1615_v62 = vpop.eup %1614  ;;  %1634 = vrcp.f32 %v956_v46  ;;  %v2728_v6 = vadd.f32 1.0, %v1613_v20 }
 0x129   : > { %v1617_v49 = vpop.eup %1616  ;;  %1636 = vrcp.f32 %v957_v39  ;;  %v2730_v56 = vadd.f32 1.0, %v1615_v62 }
 0x12a   : > { %v1619_v22 = vpop.eup %1618  ;;  %1638 = vrcp.f32 %v958_v45  ;;  %v2732_v54 = vadd.f32 1.0, %v1617_v49 }
 0x12b   : > { %v1621_v58 = vpop.eup %1620  ;;  %1640 = vrcp.f32 %v959_v3  ;;  %v2734_v10 = vadd.f32 1.0, %v1619_v22 }
 0x12c   : > { %v1623_v15 = vpop.eup %1622  ;;  %1642 = vrcp.f32 %v960_v24  ;;  %v2736_v32 = vadd.f32 1.0, %v1621_v58 }
 0x12d   : > { %v1625_v19 = vpop.eup %1624  ;;  %1644 = vrcp.f32 %v961_v40  ;;  %v2738_v1 = vadd.f32 1.0, %v1623_v15 }
 0x12e   : > { %v1627_v60 = vpop.eup %1626  ;;  %1646 = vrcp.f32 %v962_v59  ;;  %v2740_v63 = vadd.f32 1.0, %v1625_v19 }
 0x12f   : > { %v1629_v0 = vpop.eup %1628  ;;  %1648 = vrcp.f32 %v963_v29  ;;  %v2742_v44 = vadd.f32 1.0, %v1627_v60 }
 0x130   : > { %v1631_v33 = vpop.eup %1630  ;;  %1650 = vrcp.f32 %v964_v18  ;;  %v2750_v55 = vadd.f32 1.0, %v1629_v0 }
 0x131   : > { %v1633_v53 = vpop.eup %1632  ;;  %1652 = vrcp.f32 %v965_v30  ;;  %v2752_v31 = vadd.f32 1.0, %v1631_v33 }
 0x132   : > { %v2744_v12 = vpop.eup %1634  ;;  %v2754_v2 = vadd.f32 1.0, %v1633_v53  ;;  %1654 = vrcp.f32 %v966_v13 }
 0x133   : > { %v2756_v7 = vpop.eup %1636  ;;  %1656 = vrcp.f32 %v967_v50  ;;  %v2760_v47 = vadd.f32 %v2744_v12, %v2722_v4  ;;  %v2764_v21 = vadd.f32 %v2744_v12, %v2746_v28  ;;  %v2768_v27 = vadd.f32 %v2744_v12, %v2748_v25 }
 0x134   : > { %v2770_v61 = vpop.eup %1638  ;;  %1658 = vrcp.f32 %v968_v37  ;;  %v2774_v23 = vadd.f32 %v2756_v7, %v2722_v4  ;;  %v2778_v36 = vadd.f32 %v2756_v7, %v2746_v28  ;;  %v2782_v8 = vadd.f32 %v2756_v7, %v2748_v25 }
 0x135   : > { %3837 = vst [vmem:[#allocation24_spill] sm:$0xff] %v2764_v21  ;;  %3838 = vst [vmem:[#allocation5_spill] sm:$0xff] %v2768_v27  ;;  %v2784_v38 = vpop.eup %1640  ;;  %1660 = vrcp.f32 %v969_v52  ;;  %v2788_v43 = vadd.f32 %v2770_v61, %v2722_v4  ;;  %v2792_v35 = vadd.f32 %v2770_v61, %v2746_v28  ;;  %v2796_v5 = vadd.f32 %v2770_v61, %v2748_v25 }
 0x136   : > { %3839 = vst [vmem:[#allocation25_spill] sm:$0xff] %v2778_v36  ;;  %3840 = vst [vmem:[#allocation6_spill] sm:$0xff] %v2782_v8  ;;  %v2798_v41 = vpop.eup %1642  ;;  %1662 = vrcp.f32 %v970_v42  ;;  %v2802_v34 = vadd.f32 %v2784_v38, %v2722_v4  ;;  %v2806_v17 = vadd.f32 %v2784_v38, %v2746_v28  ;;  %v2810_v46 = vadd.f32 %v2784_v38, %v2748_v25 }
 0x137   : > { %3841 = vst [vmem:[#allocation26_spill] sm:$0xff] %v2792_v35  ;;  %3842 = vst [vmem:[#allocation43_spill] sm:$0xff] %v2796_v5  ;;  %v2812_v51 = vpop.eup %1644  ;;  %1664 = vrcp.f32 %v971_v14  ;;  %v2816_v39 = vadd.f32 %v2798_v41, %v2722_v4  ;;  %v2820_v9 = vadd.f32 %v2798_v41, %v2746_v28  ;;  %v2824_v45 = vadd.f32 %v2798_v41, %v2748_v25 }
 0x138   : > { %3843 = vst [vmem:[#allocation44_spill] sm:$0xff] %v2806_v17  ;;  %3844 = vst [vmem:[#allocation45_spill] sm:$0xff] %v2810_v46  ;;  %v2826_v20 = vpop.eup %1646  ;;  %1666 = vrcp.f32 %v972_v48  ;;  %v2830_v3 = vadd.f32 %v2812_v51, %v2722_v4  ;;  %v2834_v62 = vadd.f32 %v2812_v51, %v2746_v28  ;;  %v2838_v24 = vadd.f32 %v2812_v51, %v2748_v25 }
 0x139   : > { %3845 = vst [vmem:[#allocation46_spill] sm:$0xff] %v2820_v9  ;;  %3846 = vst [vmem:[#allocation47_spill] sm:$0xff] %v2824_v45  ;;  %v2840_v49 = vpop.eup %1648  ;;  %1668 = vrcp.f32 %v973_v11  ;;  %v2844_v40 = vadd.f32 %v2826_v20, %v2722_v4  ;;  %v2848_v22 = vadd.f32 %v2826_v20, %v2746_v28  ;;  %v2852_v59 = vadd.f32 %v2826_v20, %v2748_v25 }
 0x13a   : > { %3847 = vst [vmem:[#allocation48_spill] sm:$0xff] %v2834_v62  ;;  %3848 = vst [vmem:[#allocation65_spill] sm:$0xff] %v2838_v24  ;;  %v2854_v29 = vpop.eup %1650  ;;  %1670 = vrcp.f32 %v974_v57  ;;  %v2858_v58 = vadd.f32 %v2840_v49, %v2722_v4  ;;  %v2862_v18 = vadd.f32 %v2840_v49, %v2746_v28  ;;  %v2866_v30 = vadd.f32 %v2840_v49, %v2748_v25 }
 0x13b   : > { %3849 = vst [vmem:[#allocation66_spill] sm:$0xff] %v2848_v22  ;;  %3850 = vst [vmem:[#allocation7_spill] sm:$0xff] %v2852_v59  ;;  %v2868_v13 = vpop.eup %1652  ;;  %1672 = vrcp.f32 %v2724_v16  ;;  %v2873_v15 = vadd.f32 %v2854_v29, %v2722_v4  ;;  %v2877_v50 = vadd.f32 %v2854_v29, %v2746_v28  ;;  %v2881_v37 = vadd.f32 %v2854_v29, %v2748_v25 }
 0x13c   : > { %3851 = vst [vmem:[#allocation27_spill] sm:$0xff] %v2862_v18  ;;  %3852 = vst [vmem:[#allocation8_spill] sm:$0xff] %v2866_v30  ;;  %v2883_v52 = vpop.eup %1654  ;;  %1674 = vrcp.f32 %v2726_v26  ;;  %v2888_v19 = vadd.f32 %v2868_v13, %v2722_v4  ;;  %v2892_v42 = vadd.f32 %v2868_v13, %v2746_v28  ;;  %v2896_v14 = vadd.f32 %v2868_v13, %v2748_v25 }
 0x13d   : > { %3853 = vst [vmem:[#allocation28_spill] sm:$0xff] %v2877_v50  ;;  %3854 = vst [vmem:[#allocation9_spill] sm:$0xff] %v2881_v37  ;;  %v2898_v48 = vpop.eup %1656  ;;  %1676 = vrcp.f32 %v2728_v6  ;;  %v2903_v60 = vadd.f32 %v2883_v52, %v2722_v4  ;;  %v2907_v11 = vadd.f32 %v2883_v52, %v2746_v28  ;;  %v2911_v57 = vadd.f32 %v2883_v52, %v2748_v25 }
 0x13e   : > { %3855 = vst [vmem:[#allocation29_spill] sm:$0xff] %v2892_v42  ;;  %3856 = vst [vmem:[#allocation10_spill] sm:$0xff] %v2896_v14  ;;  %v2913_v16 = vpop.eup %1658  ;;  %1678 = vrcp.f32 %v2730_v56  ;;  %v2918_v0 = vadd.f32 %v2898_v48, %v2722_v4  ;;  %v2922_v26 = vadd.f32 %v2898_v48, %v2746_v28  ;;  %v2926_v6 = vadd.f32 %v2898_v48, %v2748_v25 }
 0x13f   : > { %3857 = vst [vmem:[#allocation30_spill] sm:$0xff] %v2907_v11  ;;  %3858 = vst [vmem:[#allocation11_spill] sm:$0xff] %v2911_v57  ;;  %v2928_v33 = vpop.eup %1660  ;;  %1680 = vrcp.f32 %v2732_v54  ;;  %v2933_v53 = vadd.f32 %v2913_v16, %v2722_v4  ;;  %v2937_v56 = vadd.f32 %v2913_v16, %v2746_v28  ;;  %v2941_v57 = vadd.f32 %v2913_v16, %v2748_v25 }
 0x140   : > { %3859 = vst [vmem:[#allocation31_spill] sm:$0xff] %v2922_v26  ;;  %3860 = vst [vmem:[#allocation12_spill] sm:$0xff] %v2926_v6  ;;  %v2943_v14 = vpop.eup %1662  ;;  %1682 = vrcp.f32 %v2734_v10  ;;  %v2948_v6 = vadd.f32 %v2928_v33, %v2722_v4  ;;  %v2952_v54 = vadd.f32 %v2928_v33, %v2746_v28  ;;  %v2956_v37 = vadd.f32 %v2928_v33, %v2748_v25 }
 0x141   : > { %3861 = vst [vmem:[#allocation32_spill] sm:$0xff] %v2937_v56  ;;  %3862 = vst [vmem:[#allocation13_spill] sm:$0xff] %v2941_v57  ;;  %v2958_v30 = vpop.eup %1664  ;;  %1684 = vrcp.f32 %v2736_v32  ;;  %v2963_v57 = vadd.f32 %v2943_v14, %v2722_v4  ;;  %v2967_v10 = vadd.f32 %v2943_v14, %v2746_v28  ;;  %v2971_v59 = vadd.f32 %v2943_v14, %v2748_v25 }
 0x142   : > { %3863 = vst [vmem:[#allocation33_spill] sm:$0xff] %v2952_v54  ;;  %3864 = vst [vmem:[#allocation14_spill] sm:$0xff] %v2956_v37  ;;  %v2973_v24 = vpop.eup %1666  ;;  %1686 = vrcp.f32 %v2738_v1  ;;  %v2978_v37 = vadd.f32 %v2958_v30, %v2722_v4  ;;  %v2982_v32 = vadd.f32 %v2958_v30, %v2746_v28  ;;  %v2986_v45 = vadd.f32 %v2958_v30, %v2748_v25  ;;  %v3050_v54 = vpop.permute.xlu1 %1041 }
 0x143   : > { %3865 = vst [vmem:[#allocation34_spill] sm:$0xff] %v2967_v10  ;;  %3866 = vst [vmem:[#allocation49_spill] sm:$0xff] %v2971_v59  ;;  %v2988_v46 = vpop.eup %1668  ;;  %1688 = vrcp.f32 %v2740_v63  ;;  %v2993_v59 = vadd.f32 %v2973_v24, %v2722_v4  ;;  %v2997_v1 = vadd.f32 %v2973_v24, %v2746_v28  ;;  %v3001_v5 = vadd.f32 %v2973_v24, %v2748_v25 }
 0x144   : > { %3867 = vst [vmem:[#allocation50_spill] sm:$0xff] %v2982_v32  ;;  %3868 = vst [vmem:[#allocation51_spill] sm:$0xff] %v2986_v45  ;;  %v3003_v8 = vpop.eup %1670  ;;  %1690 = vrcp.f32 %v2742_v44  ;;  %v3008_v45 = vadd.f32 %v2988_v46, %v2722_v4  ;;  %v3012_v63 = vadd.f32 %v2988_v46, %v2746_v28  ;;  %v3016_v27 = vadd.f32 %v2988_v46, %v2748_v25 }
 0x145   : > { %3869 = vst [vmem:[#allocation52_spill] sm:$0xff] %v2997_v1  ;;  %3870 = vst [vmem:[#allocation53_spill] sm:$0xff] %v3001_v5  ;;  %v3018_v1 = vpop.eup %1672  ;;  %1692 = vrcp.f32 %v2750_v55  ;;  %v3023_v5 = vadd.f32 %v3003_v8, %v2722_v4  ;;  %v3027_v44 = vadd.f32 %v3003_v8, %v2746_v28  ;;  %v3031_v32 = vadd.f32 %v3003_v8, %v2748_v25 }
 0x146   : > { %3871 = vst [vmem:[#allocation54_spill] sm:$0xff] %v3012_v63  ;;  %3872 = vst [vmem:[#allocation55_spill] sm:$0xff] %v3016_v27  ;;  %v3033_v63 = vpop.eup %1674  ;;  %1694 = vrcp.f32 %v2752_v31  ;;  %v3038_v27 = vadd.f32 %v3018_v1, %v2722_v4  ;;  %v3042_v55 = vadd.f32 %v3018_v1, %v2746_v28  ;;  %v3046_v10 = vadd.f32 %v3018_v1, %v2748_v25 }
 0x147   : > { %3873 = vst [vmem:[#allocation56_spill] sm:$0xff] %v3027_v44  ;;  %3874 = vst [vmem:[#allocation67_spill] sm:$0xff] %v3031_v32  ;;  %v3048_v44 = vpop.eup %1676  ;;  %1696 = vrcp.f32 %v2754_v2  ;;  %v3055_v31 = vadd.f32 %v3033_v63, %v2722_v4  ;;  %v3059_v32 = vadd.f32 %v3033_v63, %v2746_v28 }
 0x148   : > { %3875 = vst [vmem:[#allocation68_spill] sm:$0xff] %v3042_v55  ;;  %3876 = vst [vmem:[#allocation69_spill] sm:$0xff] %v3046_v10  ;;  %v3063_v55 = vadd.f32 %v3033_v63, %v2748_v25  ;;  %v3065_v56 = vpop.eup %1678  ;;  %v3069_v10 = vadd.f32 %v3048_v44, %v2722_v4  ;;  %v3073_v2 = vadd.f32 %v3048_v44, %v2746_v28 }
 0x149   : > { %3877 = vst [vmem:[#allocation70_spill] sm:$0xff] %v3059_v32  ;;  %v3077_v26 = vadd.f32 %v3048_v44, %v2748_v25  ;;  %v3081_v32 = vadd.f32 %v2744_v12, %v3050_v54  ;;  %v1681_v11 = vpop.eup %1680  ;;  %v3089_v42 = vadd.f32 %v3065_v56, %v2746_v28 }
 0x14a   : > { %3878 = vst [vmem:[#allocation15_spill] sm:$0xff] %v3063_v55  ;;  %3879 = vst [vmem:[#allocation35_spill] sm:$0xff] %v3073_v2  ;;  %v3085_v55 = vadd.f32 %v3065_v56, %v2722_v4  ;;  %v3093_v2 = vadd.f32 %v3065_v56, %v2748_v25  ;;  %v1683_v50 = vpop.eup %1682  ;;  %v3100_v12 = vadd.f32 %v1681_v11, %v2722_v4 }
 0x14b   : > { %3880 = vst [vmem:[#allocation16_spill] sm:$0xff] %v3077_v26  ;;  %3881 = vst [vmem:[#allocation36_spill] sm:$0xff] %v3081_v32  ;;  %v3097_v26 = vadd.f32 %v2756_v7, %v3050_v54  ;;  %v3103_v32 = vadd.f32 %v1681_v11, %v2746_v28  ;;  %v3106_v18 = vadd.f32 %v1681_v11, %v2748_v25  ;;  %v1685_v22 = vpop.eup %1684 }
 0x14c   : > { %3882 = vst [vmem:[#allocation17_spill] sm:$0xff] %v3089_v42  ;;  %3883 = vst [vmem:[#allocation37_spill] sm:$0xff] %v3093_v2  ;;  %v3110_v42 = vadd.f32 %v2770_v61, %v3050_v54  ;;  %v3113_v2 = vadd.f32 %v1683_v50, %v2722_v4  ;;  %v3116_v7 = vadd.f32 %v1683_v50, %v2746_v28  ;;  %v1687_v62 = vpop.eup %1686 }
 0x14d   : > { %3884 = vst [vmem:[#allocation18_spill] sm:$0xff] %v3097_v26  ;;  %3885 = vst [vmem:[#allocation38_spill] sm:$0xff] %v3103_v32  ;;  %v3119_v26 = vadd.f32 %v1683_v50, %v2748_v25  ;;  %v3123_v32 = vadd.f32 %v2784_v38, %v3050_v54  ;;  %v3129_v61 = vadd.f32 %v1685_v22, %v2746_v28  ;;  %v1689_v9 = vpop.eup %1688 }
 0x14e   : > { %3886 = vst [vmem:[#allocation19_spill] sm:$0xff] %v3106_v18  ;;  %3887 = vst [vmem:[#allocation39_spill] sm:$0xff] %v3110_v42  ;;  %v3126_v18 = vadd.f32 %v1685_v22, %v2722_v4  ;;  %v3132_v42 = vadd.f32 %v1685_v22, %v2748_v25  ;;  %v3142_v38 = vadd.f32 %v1687_v62, %v2746_v28  ;;  %v1691_v17 = vpop.eup %1690 }
 0x14f   : > { %3888 = vst [vmem:[#allocation20_spill] sm:$0xff] %v3116_v7  ;;  %3889 = vst [vmem:[#allocation40_spill] sm:$0xff] %v3119_v26  ;;  %v3136_v7 = vadd.f32 %v2798_v41, %v3050_v54  ;;  %v3139_v26 = vadd.f32 %v1687_v62, %v2722_v4  ;;  %v3155_v41 = vadd.f32 %v1689_v9, %v2746_v28  ;;  %v1693_v35 = vpop.eup %1692 }
 0x150   : > { %3890 = vst [vmem:[#allocation21_spill] sm:$0xff] %v3123_v32  ;;  %3891 = vst [vmem:[#allocation41_spill] sm:$0xff] %v3129_v61  ;;  %v3145_v32 = vadd.f32 %v1687_v62, %v2748_v25  ;;  %v3149_v61 = vadd.f32 %v2812_v51, %v3050_v54  ;;  %v3168_v51 = vadd.f32 %v1691_v17, %v2746_v28  ;;  %v1695_v36 = vpop.eup %1694 }
 0x151   : > { %3892 = vst [vmem:[#allocation22_spill] sm:$0xff] %v3132_v42  ;;  %3893 = vst [vmem:[#allocation42_spill] sm:$0xff] %v3136_v7  ;;  %v3152_v42 = vadd.f32 %v1689_v9, %v2722_v4  ;;  %v3158_v7 = vadd.f32 %v1689_v9, %v2748_v25  ;;  %v1697_v21 = vpop.eup %1696 }
 0x152   : > { %3894 = vst [vmem:[#allocation57_spill] sm:$0xff] %v3142_v38  ;;  %3895 = vst [vmem:[#allocation58_spill] sm:$0xff] %v3145_v32  ;;  %v3162_v38 = vadd.f32 %v2826_v20, %v3050_v54  ;;  %v3165_v32 = vadd.f32 %v1691_v17, %v2722_v4  ;;  %v3181_v20 = vadd.f32 %v1693_v35, %v2746_v28 }
 0x153   : > { %3896 = vst [vmem:[#allocation59_spill] sm:$0xff] %v3149_v61  ;;  %3897 = vst [vmem:[#allocation60_spill] sm:$0xff] %v3155_v41  ;;  %v3171_v61 = vadd.f32 %v1691_v17, %v2748_v25  ;;  %v3175_v41 = vadd.f32 %v2840_v49, %v3050_v54  ;;  %v3194_v49 = vadd.f32 %v1695_v36, %v2746_v28 }
 0x154   : > { %3898 = vst [vmem:[#allocation61_spill] sm:$0xff] %v3158_v7  ;;  %3899 = vst [vmem:[#allocation62_spill] sm:$0xff] %v3162_v38  ;;  %v3178_v7 = vadd.f32 %v1693_v35, %v2722_v4  ;;  %v3184_v38 = vadd.f32 %v1693_v35, %v2748_v25 }
 0x155   : > { %3900 = vst [vmem:[#allocation63_spill] sm:$0xff] %v3168_v51  ;;  %3901 = vst [vmem:[#allocation64_spill] sm:$0xff] %v3171_v61  ;;  %v3188_v51 = vadd.f32 %v2854_v29, %v3050_v54  ;;  %v3191_v61 = vadd.f32 %v1695_v36, %v2722_v4  ;;  %v3207_v29 = vadd.f32 %v1697_v21, %v2746_v28 }
 0x156   : > { %3902 = vst [vmem:[#allocation3_spill] sm:$0xff] %v3175_v41  ;;  %3903 = vst [vmem:[#allocation23_spill] sm:$0xff] %v3181_v20  ;;  %v3197_v41 = vadd.f32 %v1695_v36, %v2748_v25  ;;  %v3201_v20 = vadd.f32 %v2868_v13, %v3050_v54  ;;  %v3222_v13 = vadd.f32 %v2913_v16, %v3050_v54 }
 0x157   : > { %3904 = vst [vmem:[#allocation4_spill] sm:$0xff] %v3184_v38  ;;  %3905 = vst [vmem:[#allocation71_spill] sm:$0xff] %v3188_v51  ;;  %v3204_v38 = vadd.f32 %v1697_v21, %v2722_v4  ;;  %v3210_v51 = vadd.f32 %v1697_v21, %v2748_v25  ;;  %v3226_v4 = vadd.f32 %v2928_v33, %v3050_v54 }
 0x158   : > { %3906 = vst [vmem:[#allocation72_spill] sm:$0xff] %v3191_v61  ;;  %3907 = vst [vmem:[#allocation73_spill] sm:$0xff] %v3197_v41  ;;  %v3214_v61 = vadd.f32 %v2883_v52, %v3050_v54  ;;  %v3218_v41 = vadd.f32 %v2898_v48, %v3050_v54  ;;  %v3230_v28 = vadd.f32 %v2943_v14, %v3050_v54 }
 0x159   : > { %v3234_v25 = vadd.f32 %v2958_v30, %v3050_v54  ;;  %v3238_v52 = vadd.f32 %v2973_v24, %v3050_v54  ;;  %v3242_v48 = vadd.f32 %v2988_v46, %v3050_v54  ;;  %v3246_v16 = vadd.f32 %v3003_v8, %v3050_v54 }
 0x15a   : > { %v3250_v14 = vadd.f32 %v3018_v1, %v3050_v54  ;;  %v3254_v30 = vadd.f32 %v3033_v63, %v3050_v54  ;;  %v3258_v24 = vadd.f32 %v3048_v44, %v3050_v54  ;;  %v3262_v46 = vadd.f32 %v3065_v56, %v3050_v54  ;;  %v1698_v44 = vld [vmem:[%s1921_s10] sm:$0xff] }
 0x15b   : > { %v3265_v8 = vadd.f32 %v1681_v11, %v3050_v54  ;;  %v3268_v33 = vadd.f32 %v1683_v50, %v3050_v54  ;;  %v3271_v1 = vadd.f32 %v1685_v22, %v3050_v54  ;;  %v3274_v63 = vadd.f32 %v1687_v62, %v3050_v54 }
 0x15c   : > { %v3284_v11 = vadd.f32 %v1689_v9, %v3050_v54  ;;  %v3287_v50 = vadd.f32 %v1691_v17, %v3050_v54  ;;  %v3290_v22 = vadd.f32 %v1693_v35, %v3050_v54  ;;  %v3293_v62 = vadd.f32 %v1695_v36, %v3050_v54  ;;  %v1699_v9 = vld [vmem:[%s1921_s10 + $0x8] sm:$0xff] }
 0x15d   : > { %3908 = vst [vmem:[#allocation74_spill] sm:$0xff] %v3274_v63  ;;  %v3296_v56 = vadd.f32 %v1697_v21, %v3050_v54  ;;  %v1172_v63 = vmul.f32 %v1698_v44, %v2760_v47  ;;  %v1173_v17 = vmul.f32 %v1699_v9, %v2774_v23  ;;  %v1703_v54 = vld [vmem:[%s1921_s10 + $0x28] sm:$0xff]  ;;  %v1704_v44 = vld [vmem:[%s1921_s10 + $0x30] sm:$0xff]  ;;  %v1705_v9 = vld [vmem:[%s1921_s10 + $0x38] sm:$0xff] }
 0x15e   : > { %3909 = vst [vmem:[#allocation75_spill] sm:$0xff] %v3287_v50  ;;  %3910 = vst [vmem:[#allocation76_spill] sm:$0xff] %v3290_v22  ;;  %v1700_v50 = vld [vmem:[%s1921_s10 + $0x10] sm:$0xff]  ;;  %v1701_v22 = vld [vmem:[%s1921_s10 + $0x18] sm:$0xff]  ;;  %v1177_v47 = vmul.f32 %v1703_v54, %v2830_v3  ;;  %v1178_v23 = vmul.f32 %v1704_v44, %v2844_v40 }
 0x15f   : > { %3911 = vst [vmem:[#allocation77_spill] sm:$0xff] %v3293_v62  ;;  %v1174_v35 = vmul.f32 %v1700_v50, %v2788_v43  ;;  %v1175_v36 = vmul.f32 %v1701_v22, %v2802_v34  ;;  %v1702_v62 = vld [vmem:[%s1921_s10 + $0x20] sm:$0xff]  ;;  %v1179_v43 = vmul.f32 %v1705_v9, %v2858_v58  ;;  %v1707_v22 = vld [vmem:[%s1921_s10 + $0x48] sm:$0xff]  ;;  %1300 = vst [vmem:[%s3281_s13] sm:$0xff] %v1172_v63 }
 0x160   : > { %v1176_v21 = vmul.f32 %v1702_v62, %v2816_v39  ;;  %v1706_v50 = vld [vmem:[%s1921_s10 + $0x40] sm:$0xff]  ;;  %v1181_v39 = vmul.f32 %v1707_v22, %v2888_v19  ;;  %v1708_v62 = vld [vmem:[%s1921_s10 + $0x50] sm:$0xff]  ;;  %1301 = vst [vmem:[%s3281_s13 + $0x8] sm:$0xff] %v1173_v17  ;;  %v1709_v40 = vld [vmem:[%s1921_s10 + $0x58] sm:$0xff] }
 0x161   : > { %v1180_v34 = vmul.f32 %v1706_v50, %v2873_v15  ;;  %v1182_v3 = vmul.f32 %v1708_v62, %v2903_v60  ;;  %1302 = vst [vmem:[%s3281_s13 + $0x10] sm:$0xff] %v1174_v35  ;;  %v1183_v58 = vmul.f32 %v1709_v40, %v2918_v0  ;;  %v1710_v15 = vld [vmem:[%s1921_s10 + $0x60] sm:$0xff]  ;;  %v1711_v44 = vld [vmem:[%s1921_s10 + $0x68] sm:$0xff]  ;;  %v1712_v9 = vld [vmem:[%s1921_s10 + $0x70] sm:$0xff] }
 0x162   : > { %v1184_v54 = vmul.f32 %v1710_v15, %v2933_v53  ;;  %v1185_v19 = vmul.f32 %v1711_v44, %v2948_v6  ;;  %v1186_v60 = vmul.f32 %v1712_v9, %v2963_v57  ;;  %1303 = vst [vmem:[%s3281_s13 + $0x18] sm:$0xff] %v1175_v36  ;;  %1304 = vst [vmem:[%s3281_s13 + $0x20] sm:$0xff] %v1176_v21  ;;  %v1713_v0 = vld [vmem:[%s1921_s10 + $0x78] sm:$0xff]  ;;  %v1714_v63 = vld [vmem:[%s1921_s10 + $0x80] sm:$0xff] }
 0x163   : > { %1305 = vst [vmem:[%s3281_s13 + $0x28] sm:$0xff] %v1177_v47  ;;  %1306 = vst [vmem:[%s3281_s13 + $0x30] sm:$0xff] %v1178_v23  ;;  %v1187_v53 = vmul.f32 %v1713_v0, %v2978_v37  ;;  %v1188_v6 = vmul.f32 %v1714_v63, %v2993_v59  ;;  %v1715_v17 = vld [vmem:[%s1921_s10 + $0x88] sm:$0xff]  ;;  %v1716_v57 = vld [vmem:[%s1921_s10 + $0x90] sm:$0xff] }
 0x164   : > { %v1189_v35 = vmul.f32 %v1715_v17, %v3008_v45  ;;  %v1190_v36 = vmul.f32 %v1716_v57, %v3023_v5  ;;  %1307 = vst [vmem:[%s3281_s13 + $0x38] sm:$0xff] %v1179_v43  ;;  %1308 = vst [vmem:[%s3281_s13 + $0x40] sm:$0xff] %v1180_v34  ;;  %v1717_v37 = vld [vmem:[%s1921_s10 + $0x98] sm:$0xff]  ;;  %v1718_v21 = vld [vmem:[%s1921_s10 + $0xa0] sm:$0xff] }
 0x165   : > { %1309 = vst [vmem:[%s3281_s13 + $0x48] sm:$0xff] %v1181_v39  ;;  %1310 = vst [vmem:[%s3281_s13 + $0x50] sm:$0xff] %v1182_v3  ;;  %v1191_v59 = vmul.f32 %v1717_v37, %v3038_v27  ;;  %v1192_v45 = vmul.f32 %v1718_v21, %v3055_v31  ;;  %v1719_v47 = vld [vmem:[%s1921_s10 + $0xa8] sm:$0xff]  ;;  %v1720_v5 = vld [vmem:[%s1921_s10 + $0xb0] sm:$0xff] }
 0x166   : > { %v1193_v23 = vmul.f32 %v1719_v47, %v3069_v10  ;;  %v1194_v43 = vmul.f32 %v1720_v5, %v3085_v55  ;;  %1311 = vst [vmem:[%s3281_s13 + $0x58] sm:$0xff] %v1183_v58  ;;  %1312 = vst [vmem:[%s3281_s13 + $0x60] sm:$0xff] %v1184_v54  ;;  %v1721_v27 = vld [vmem:[%s1921_s10 + $0xb8] sm:$0xff]  ;;  %v1722_v50 = vld [vmem:[%s1921_s10 + $0xc0] sm:$0xff] }
 0x167   : > { %1313 = vst [vmem:[%s3281_s13 + $0x68] sm:$0xff] %v1185_v19  ;;  %1314 = vst [vmem:[%s3281_s13 + $0x70] sm:$0xff] %v1186_v60  ;;  %v1195_v31 = vmul.f32 %v1721_v27, %v3100_v12  ;;  %v1196_v10 = vmul.f32 %v1722_v50, %v3113_v2  ;;  %v1723_v34 = vld [vmem:[%s1921_s10 + $0xc8] sm:$0xff]  ;;  %v1724_v55 = vld [vmem:[%s1921_s10 + $0xd0] sm:$0xff] }
 0x168   : > { %v1197_v22 = vmul.f32 %v1723_v34, %v3126_v18  ;;  %v1198_v39 = vmul.f32 %v1724_v55, %v3139_v26  ;;  %1315 = vst [vmem:[%s3281_s13 + $0x78] sm:$0xff] %v1187_v53  ;;  %1316 = vst [vmem:[%s3281_s13 + $0x80] sm:$0xff] %v1188_v6  ;;  %v1725_v12 = vld [vmem:[%s1921_s10 + $0xd8] sm:$0xff]  ;;  %v1726_v62 = vld [vmem:[%s1921_s10 + $0xe0] sm:$0xff] }
 0x169   : > { %1317 = vst [vmem:[%s3281_s13 + $0x88] sm:$0xff] %v1189_v35  ;;  %1318 = vst [vmem:[%s3281_s13 + $0x90] sm:$0xff] %v1190_v36  ;;  %v1199_v2 = vmul.f32 %v1725_v12, %v3152_v42  ;;  %v1200_v18 = vmul.f32 %v1726_v62, %v3165_v32  ;;  %v1727_v3 = vld [vmem:[%s1921_s10 + $0xe8] sm:$0xff]  ;;  %v1728_v26 = vld [vmem:[%s1921_s10 + $0xf0] sm:$0xff] }
 0x16a   : > { %v1201_v40 = vmul.f32 %v1727_v3, %v3178_v7  ;;  %v3912_v58 = vld [vmem:[#allocation72_spill] sm:$0xff]  ;;  %1319 = vst [vmem:[%s3281_s13 + $0x98] sm:$0xff] %v1191_v59  ;;  %1320 = vst [vmem:[%s3281_s13 + $0xa0] sm:$0xff] %v1192_v45  ;;  %v1729_v42 = vld [vmem:[%s1921_s10 + $0xf8] sm:$0xff] }
 0x16b   : > { %v1202_v15 = vmul.f32 %v1728_v26, %v3912_v58  ;;  %1321 = vst [vmem:[%s3281_s13 + $0xa8] sm:$0xff] %v1193_v23  ;;  %1322 = vst [vmem:[%s3281_s13 + $0xb0] sm:$0xff] %v1194_v43  ;;  %v1203_v32 = vmul.f32 %v1729_v42, %v3204_v38  ;;  %v1730_v54 = vld [vmem:[%s1921_s10 + $0x100] sm:$0xff]  ;;  %v3913_v44 = vld [vmem:[#allocation24_spill] sm:$0xff] }
 0x16c   : > { %v1204_v7 = vmul.f32 %v1730_v54, %v3913_v44  ;;  %v1731_v19 = vld [vmem:[%s1921_s10 + $0x108] sm:$0xff]  ;;  %v3914_v9 = vld [vmem:[#allocation25_spill] sm:$0xff]  ;;  %v3915_v53 = vld [vmem:[#allocation26_spill] sm:$0xff]  ;;  %1323 = vst [vmem:[%s3281_s13 + $0xb8] sm:$0xff] %v1195_v31 }
 0x16d   : > { %v1205_v60 = vmul.f32 %v1731_v19, %v3914_v9  ;;  %v1732_v0 = vld [vmem:[%s1921_s10 + $0x110] sm:$0xff]  ;;  %1324 = vst [vmem:[%s3281_s13 + $0xc0] sm:$0xff] %v1196_v10  ;;  %1325 = vst [vmem:[%s3281_s13 + $0xc8] sm:$0xff] %v1197_v22  ;;  %v1733_v38 = vld [vmem:[%s1921_s10 + $0x118] sm:$0xff] }
 0x16e   : > { %v1206_v63 = vmul.f32 %v1732_v0, %v3915_v53  ;;  %1326 = vst [vmem:[%s3281_s13 + $0xd0] sm:$0xff] %v1198_v39  ;;  %v3916_v6 = vld [vmem:[#allocation44_spill] sm:$0xff]  ;;  %v1734_v35 = vld [vmem:[%s1921_s10 + $0x120] sm:$0xff]  ;;  %v3917_v57 = vld [vmem:[#allocation46_spill] sm:$0xff] }
 0x16f   : > { %v1207_v17 = vmul.f32 %v1733_v38, %v3916_v6  ;;  %v1208_v36 = vmul.f32 %v1734_v35, %v3917_v57  ;;  %v1735_v37 = vld [vmem:[%s1921_s10 + $0x128] sm:$0xff]  ;;  %v1736_v45 = vld [vmem:[%s1921_s10 + $0x130] sm:$0xff]  ;;  %v3919_v47 = vld [vmem:[#allocation66_spill] sm:$0xff]  ;;  %1327 = vst [vmem:[%s3281_s13 + $0xd8] sm:$0xff] %v1199_v2 }
 0x170   : > { %v3918_v59 = vld [vmem:[#allocation48_spill] sm:$0xff]  ;;  %v1210_v23 = vmul.f32 %v1736_v45, %v3919_v47  ;;  %1328 = vst [vmem:[%s3281_s13 + $0xe0] sm:$0xff] %v1200_v18  ;;  %1329 = vst [vmem:[%s3281_s13 + $0xe8] sm:$0xff] %v1201_v40  ;;  %v1737_v5 = vld [vmem:[%s1921_s10 + $0x138] sm:$0xff] }
 0x171   : > { %v1209_v21 = vmul.f32 %v1735_v37, %v3918_v59  ;;  %1330 = vst [vmem:[%s3281_s13 + $0xf0] sm:$0xff] %v1202_v15  ;;  %v3920_v43 = vld [vmem:[#allocation27_spill] sm:$0xff]  ;;  %v3921_v50 = vld [vmem:[#allocation28_spill] sm:$0xff]  ;;  %v3922_v22 = vld [vmem:[#allocation29_spill] sm:$0xff] }
 0x172   : > { %v1211_v27 = vmul.f32 %v1737_v5, %v3920_v43  ;;  %v1738_v31 = vld [vmem:[%s1921_s10 + $0x140] sm:$0xff]  ;;  %v1739_v34 = vld [vmem:[%s1921_s10 + $0x148] sm:$0xff]  ;;  %v1740_v39 = vld [vmem:[%s1921_s10 + $0x150] sm:$0xff]  ;;  %1331 = vst [vmem:[%s3281_s13 + $0xf8] sm:$0xff] %v1203_v32 }
 0x173   : > { %v1212_v10 = vmul.f32 %v1738_v31, %v3921_v50  ;;  %v1213_v55 = vmul.f32 %v1739_v34, %v3922_v22  ;;  %v3923_v12 = vld [vmem:[#allocation30_spill] sm:$0xff]  ;;  %1332 = vst [vmem:[%s3281_s13 + $0x100] sm:$0xff] %v1204_v7  ;;  %1333 = vst [vmem:[%s3281_s13 + $0x108] sm:$0xff] %v1205_v60  ;;  %v3924_v18 = vld [vmem:[#allocation31_spill] sm:$0xff] }
 0x174   : > { %v1214_v2 = vmul.f32 %v1740_v39, %v3923_v12  ;;  %1334 = vst [vmem:[%s3281_s13 + $0x110] sm:$0xff] %v1206_v63  ;;  %v1741_v62 = vld [vmem:[%s1921_s10 + $0x158] sm:$0xff]  ;;  %v1742_v40 = vld [vmem:[%s1921_s10 + $0x160] sm:$0xff]  ;;  %v3925_v26 = vld [vmem:[#allocation32_spill] sm:$0xff] }
 0x175   : > { %v1215_v3 = vmul.f32 %v1741_v62, %v3924_v18  ;;  %v1216_v58 = vmul.f32 %v1742_v40, %v3925_v26  ;;  %v1743_v15 = vld [vmem:[%s1921_s10 + $0x168] sm:$0xff]  ;;  %v3926_v42 = vld [vmem:[#allocation33_spill] sm:$0xff]  ;;  %v3927_v32 = vld [vmem:[#allocation34_spill] sm:$0xff]  ;;  %1335 = vst [vmem:[%s3281_s13 + $0x118] sm:$0xff] %v1207_v17 }
 0x176   : > { %v1217_v54 = vmul.f32 %v1743_v15, %v3926_v42  ;;  %v1744_v44 = vld [vmem:[%s1921_s10 + $0x170] sm:$0xff]  ;;  %1336 = vst [vmem:[%s3281_s13 + $0x120] sm:$0xff] %v1208_v36  ;;  %1337 = vst [vmem:[%s3281_s13 + $0x128] sm:$0xff] %v1209_v21  ;;  %v1745_v19 = vld [vmem:[%s1921_s10 + $0x178] sm:$0xff] }
 0x177   : > { %v1218_v7 = vmul.f32 %v1744_v44, %v3927_v32  ;;  %1338 = vst [vmem:[%s3281_s13 + $0x130] sm:$0xff] %v1210_v23  ;;  %v3928_v9 = vld [vmem:[#allocation50_spill] sm:$0xff]  ;;  %v1746_v0 = vld [vmem:[%s1921_s10 + $0x180] sm:$0xff]  ;;  %v3929_v53 = vld [vmem:[#allocation52_spill] sm:$0xff] }
 0x178   : > { %v1219_v60 = vmul.f32 %v1745_v19, %v3928_v9  ;;  %v1220_v63 = vmul.f32 %v1746_v0, %v3929_v53  ;;  %v1747_v38 = vld [vmem:[%s1921_s10 + $0x188] sm:$0xff]  ;;  %v3930_v6 = vld [vmem:[#allocation54_spill] sm:$0xff]  ;;  %v1748_v57 = vld [vmem:[%s1921_s10 + $0x190] sm:$0xff]  ;;  %1339 = vst [vmem:[%s3281_s13 + $0x138] sm:$0xff] %v1211_v27 }
 0x179   : > { %v1221_v35 = vmul.f32 %v1747_v38, %v3930_v6  ;;  %v3931_v17 = vld [vmem:[#allocation56_spill] sm:$0xff]  ;;  %1340 = vst [vmem:[%s3281_s13 + $0x140] sm:$0xff] %v1212_v10  ;;  %1341 = vst [vmem:[%s3281_s13 + $0x148] sm:$0xff] %v1213_v55  ;;  %v1749_v37 = vld [vmem:[%s1921_s10 + $0x198] sm:$0xff] }
 0x17a   : > { %v1222_v36 = vmul.f32 %v1748_v57, %v3931_v17  ;;  %1342 = vst [vmem:[%s3281_s13 + $0x150] sm:$0xff] %v1214_v2  ;;  %v3932_v59 = vld [vmem:[#allocation68_spill] sm:$0xff]  ;;  %v1750_v45 = vld [vmem:[%s1921_s10 + $0x1a0] sm:$0xff]  ;;  %v3933_v47 = vld [vmem:[#allocation70_spill] sm:$0xff] }
 0x17b   : > { %v1223_v21 = vmul.f32 %v1749_v37, %v3932_v59  ;;  %v1224_v23 = vmul.f32 %v1750_v45, %v3933_v47  ;;  %v1751_v5 = vld [vmem:[%s1921_s10 + $0x1a8] sm:$0xff]  ;;  %v3934_v43 = vld [vmem:[#allocation35_spill] sm:$0xff]  ;;  %v1752_v50 = vld [vmem:[%s1921_s10 + $0x1b0] sm:$0xff]  ;;  %1343 = vst [vmem:[%s3281_s13 + $0x158] sm:$0xff] %v1215_v3 }
 0x17c   : > { %v1225_v31 = vmul.f32 %v1751_v5, %v3934_v43  ;;  %v3935_v27 = vld [vmem:[#allocation17_spill] sm:$0xff]  ;;  %1344 = vst [vmem:[%s3281_s13 + $0x160] sm:$0xff] %v1216_v58  ;;  %1345 = vst [vmem:[%s3281_s13 + $0x168] sm:$0xff] %v1217_v54  ;;  %v1753_v34 = vld [vmem:[%s1921_s10 + $0x1b8] sm:$0xff] }
 0x17d   : > { %v1226_v10 = vmul.f32 %v1752_v50, %v3935_v27  ;;  %1346 = vst [vmem:[%s3281_s13 + $0x170] sm:$0xff] %v1218_v7  ;;  %v3936_v22 = vld [vmem:[#allocation38_spill] sm:$0xff]  ;;  %v1754_v39 = vld [vmem:[%s1921_s10 + $0x1c0] sm:$0xff]  ;;  %v3937_v12 = vld [vmem:[#allocation20_spill] sm:$0xff] }
 0x17e   : > { %v1227_v55 = vmul.f32 %v1753_v34, %v3936_v22  ;;  %v1228_v2 = vmul.f32 %v1754_v39, %v3937_v12  ;;  %v1755_v62 = vld [vmem:[%s1921_s10 + $0x1c8] sm:$0xff]  ;;  %v3938_v18 = vld [vmem:[#allocation41_spill] sm:$0xff]  ;;  %1347 = vst [vmem:[%s3281_s13 + $0x178] sm:$0xff] %v1219_v60  ;;  %1348 = vst [vmem:[%s3281_s13 + $0x180] sm:$0xff] %v1220_v63 }
 0x17f   : > { %v1229_v40 = vmul.f32 %v1755_v62, %v3938_v18  ;;  %v1756_v26 = vld [vmem:[%s1921_s10 + $0x1d0] sm:$0xff]  ;;  %1349 = vst [vmem:[%s3281_s13 + $0x188] sm:$0xff] %v1221_v35  ;;  %1350 = vst [vmem:[%s3281_s13 + $0x190] sm:$0xff] %v1222_v36  ;;  %v1757_v15 = vld [vmem:[%s1921_s10 + $0x1d8] sm:$0xff] }
 0x180   : > { %v3939_v3 = vld [vmem:[#allocation57_spill] sm:$0xff]  ;;  %v3940_v42 = vld [vmem:[#allocation60_spill] sm:$0xff]  ;;  %v1758_v44 = vld [vmem:[%s1921_s10 + $0x1e0] sm:$0xff]  ;;  %1351 = vst [vmem:[%s3281_s13 + $0x198] sm:$0xff] %v1223_v21 }
 0x181   : > { %v1230_v58 = vmul.f32 %v1756_v26, %v3939_v3  ;;  %v1231_v54 = vmul.f32 %v1757_v15, %v3940_v42  ;;  %v3941_v32 = vld [vmem:[#allocation63_spill] sm:$0xff]  ;;  %v1759_v19 = vld [vmem:[%s1921_s10 + $0x1e8] sm:$0xff]  ;;  %v1760_v53 = vld [vmem:[%s1921_s10 + $0x1f0] sm:$0xff]  ;;  %1352 = vst [vmem:[%s3281_s13 + $0x1a0] sm:$0xff] %v1224_v23 }
 0x182   : > { %v1232_v7 = vmul.f32 %v1758_v44, %v3941_v32  ;;  %v3942_v9 = vld [vmem:[#allocation23_spill] sm:$0xff]  ;;  %v1234_v60 = vmul.f32 %v1760_v53, %v3194_v49  ;;  %1353 = vst [vmem:[%s3281_s13 + $0x1a8] sm:$0xff] %v1225_v31  ;;  %1354 = vst [vmem:[%s3281_s13 + $0x1b0] sm:$0xff] %v1226_v10  ;;  %v1761_v63 = vld [vmem:[%s1921_s10 + $0x1f8] sm:$0xff] }
 0x183   : > { %v1233_v0 = vmul.f32 %v1759_v19, %v3942_v9  ;;  %v1235_v38 = vmul.f32 %v1761_v63, %v3207_v29  ;;  %v1762_v6 = vld [vmem:[%s1921_s10 + $0x200] sm:$0xff]  ;;  %v3943_v35 = vld [vmem:[#allocation5_spill] sm:$0xff]  ;;  %v1763_v17 = vld [vmem:[%s1921_s10 + $0x208] sm:$0xff]  ;;  %1355 = vst [vmem:[%s3281_s13 + $0x1b8] sm:$0xff] %v1227_v55 }
 0x184   : > { %v1236_v57 = vmul.f32 %v1762_v6, %v3943_v35  ;;  %v3944_v36 = vld [vmem:[#allocation6_spill] sm:$0xff]  ;;  %v1764_v49 = vld [vmem:[%s1921_s10 + $0x210] sm:$0xff]  ;;  %v3945_v59 = vld [vmem:[#allocation43_spill] sm:$0xff]  ;;  %1356 = vst [vmem:[%s3281_s13 + $0x1c0] sm:$0xff] %v1228_v2 }
 0x185   : > { %v1237_v37 = vmul.f32 %v1763_v17, %v3944_v36  ;;  %v1238_v21 = vmul.f32 %v1764_v49, %v3945_v59  ;;  %1357 = vst [vmem:[%s3281_s13 + $0x1c8] sm:$0xff] %v1229_v40  ;;  %1358 = vst [vmem:[%s3281_s13 + $0x1d0] sm:$0xff] %v1230_v58  ;;  %v1765_v29 = vld [vmem:[%s1921_s10 + $0x218] sm:$0xff]  ;;  %v3946_v45 = vld [vmem:[#allocation45_spill] sm:$0xff] }
 0x186   : > { %v1239_v47 = vmul.f32 %v1765_v29, %v3946_v45  ;;  %v1766_v23 = vld [vmem:[%s1921_s10 + $0x220] sm:$0xff]  ;;  %v1767_v31 = vld [vmem:[%s1921_s10 + $0x228] sm:$0xff]  ;;  %v3948_v50 = vld [vmem:[#allocation65_spill] sm:$0xff]  ;;  %1359 = vst [vmem:[%s3281_s13 + $0x1d8] sm:$0xff] %v1231_v54 }
 0x187   : > { %v3947_v5 = vld [vmem:[#allocation47_spill] sm:$0xff]  ;;  %v1241_v27 = vmul.f32 %v1767_v31, %v3948_v50  ;;  %v1768_v10 = vld [vmem:[%s1921_s10 + $0x230] sm:$0xff]  ;;  %1360 = vst [vmem:[%s3281_s13 + $0x1e0] sm:$0xff] %v1232_v7  ;;  %1361 = vst [vmem:[%s3281_s13 + $0x1e8] sm:$0xff] %v1233_v0 }
 0x188   : > { %v1240_v43 = vmul.f32 %v1766_v23, %v3947_v5  ;;  %v3949_v34 = vld [vmem:[#allocation7_spill] sm:$0xff]  ;;  %1362 = vst [vmem:[%s3281_s13 + $0x1f0] sm:$0xff] %v1234_v60  ;;  %v1769_v55 = vld [vmem:[%s1921_s10 + $0x238] sm:$0xff]  ;;  %v3950_v39 = vld [vmem:[#allocation8_spill] sm:$0xff] }
 0x189   : > { %v1242_v22 = vmul.f32 %v1768_v10, %v3949_v34  ;;  %v1243_v12 = vmul.f32 %v1769_v55, %v3950_v39  ;;  %v1770_v2 = vld [vmem:[%s1921_s10 + $0x240] sm:$0xff]  ;;  %v3951_v62 = vld [vmem:[#allocation9_spill] sm:$0xff]  ;;  %v1771_v40 = vld [vmem:[%s1921_s10 + $0x248] sm:$0xff]  ;;  %1363 = vst [vmem:[%s3281_s13 + $0x1f8] sm:$0xff] %v1235_v38 }
 0x18a   : > { %v1244_v18 = vmul.f32 %v1770_v2, %v3951_v62  ;;  %v3952_v26 = vld [vmem:[#allocation10_spill] sm:$0xff]  ;;  %v1772_v58 = vld [vmem:[%s1921_s10 + $0x250] sm:$0xff]  ;;  %v3953_v15 = vld [vmem:[#allocation11_spill] sm:$0xff]  ;;  %1364 = vst [vmem:[%s3281_s13 + $0x200] sm:$0xff] %v1236_v57 }
 0x18b   : > { %v1245_v3 = vmul.f32 %v1771_v40, %v3952_v26  ;;  %v1246_v42 = vmul.f32 %v1772_v58, %v3953_v15  ;;  %1365 = vst [vmem:[%s3281_s13 + $0x208] sm:$0xff] %v1237_v37  ;;  %1366 = vst [vmem:[%s3281_s13 + $0x210] sm:$0xff] %v1238_v21  ;;  %v1773_v54 = vld [vmem:[%s1921_s10 + $0x258] sm:$0xff]  ;;  %v3954_v44 = vld [vmem:[#allocation12_spill] sm:$0xff] }
 0x18c   : > { %v1247_v32 = vmul.f32 %v1773_v54, %v3954_v44  ;;  %v1774_v7 = vld [vmem:[%s1921_s10 + $0x260] sm:$0xff]  ;;  %v3955_v19 = vld [vmem:[#allocation13_spill] sm:$0xff]  ;;  %v1775_v0 = vld [vmem:[%s1921_s10 + $0x268] sm:$0xff]  ;;  %1367 = vst [vmem:[%s3281_s13 + $0x218] sm:$0xff] %v1239_v47 }
 0x18d   : > { %v1248_v9 = vmul.f32 %v1774_v7, %v3955_v19  ;;  %v3956_v53 = vld [vmem:[#allocation14_spill] sm:$0xff]  ;;  %v1776_v63 = vld [vmem:[%s1921_s10 + $0x270] sm:$0xff]  ;;  %1368 = vst [vmem:[%s3281_s13 + $0x220] sm:$0xff] %v1240_v43  ;;  %1369 = vst [vmem:[%s3281_s13 + $0x228] sm:$0xff] %v1241_v27 }
 0x18e   : > { %v1249_v60 = vmul.f32 %v1775_v0, %v3956_v53  ;;  %v3957_v38 = vld [vmem:[#allocation49_spill] sm:$0xff]  ;;  %1370 = vst [vmem:[%s3281_s13 + $0x230] sm:$0xff] %v1242_v22  ;;  %v1777_v35 = vld [vmem:[%s1921_s10 + $0x278] sm:$0xff]  ;;  %v3958_v57 = vld [vmem:[#allocation51_spill] sm:$0xff] }
 0x18f   : > { %v1250_v6 = vmul.f32 %v1776_v63, %v3957_v38  ;;  %v1251_v17 = vmul.f32 %v1777_v35, %v3958_v57  ;;  %v1778_v36 = vld [vmem:[%s1921_s10 + $0x280] sm:$0xff]  ;;  %v3959_v37 = vld [vmem:[#allocation53_spill] sm:$0xff]  ;;  %v1779_v59 = vld [vmem:[%s1921_s10 + $0x288] sm:$0xff]  ;;  %1371 = vst [vmem:[%s3281_s13 + $0x238] sm:$0xff] %v1243_v12 }
 0x190   : > { %v1252_v49 = vmul.f32 %v1778_v36, %v3959_v37  ;;  %v3960_v21 = vld [vmem:[#allocation55_spill] sm:$0xff]  ;;  %v1780_v45 = vld [vmem:[%s1921_s10 + $0x290] sm:$0xff]  ;;  %1372 = vst [vmem:[%s3281_s13 + $0x240] sm:$0xff] %v1244_v18  ;;  %1373 = vst [vmem:[%s3281_s13 + $0x248] sm:$0xff] %v1245_v3 }
 0x191   : > { %v1253_v29 = vmul.f32 %v1779_v59, %v3960_v21  ;;  %v3961_v47 = vld [vmem:[#allocation67_spill] sm:$0xff]  ;;  %1374 = vst [vmem:[%s3281_s13 + $0x250] sm:$0xff] %v1246_v42  ;;  %v1781_v5 = vld [vmem:[%s1921_s10 + $0x298] sm:$0xff]  ;;  %v3962_v43 = vld [vmem:[#allocation69_spill] sm:$0xff] }
 0x192   : > { %v1254_v23 = vmul.f32 %v1780_v45, %v3961_v47  ;;  %v1255_v31 = vmul.f32 %v1781_v5, %v3962_v43  ;;  %v1782_v50 = vld [vmem:[%s1921_s10 + $0x2a0] sm:$0xff]  ;;  %v1783_v34 = vld [vmem:[%s1921_s10 + $0x2a8] sm:$0xff]  ;;  %v1784_v39 = vld [vmem:[%s1921_s10 + $0x2b0] sm:$0xff]  ;;  %1375 = vst [vmem:[%s3281_s13 + $0x258] sm:$0xff] %v1247_v32 }
 0x193   : > { %v3963_v27 = vld [vmem:[#allocation15_spill] sm:$0xff]  ;;  %v3964_v22 = vld [vmem:[#allocation16_spill] sm:$0xff]  ;;  %v3965_v12 = vld [vmem:[#allocation37_spill] sm:$0xff]  ;;  %1376 = vst [vmem:[%s3281_s13 + $0x260] sm:$0xff] %v1248_v9 }
 0x194   : > { %v1256_v10 = vmul.f32 %v1782_v50, %v3963_v27  ;;  %v1257_v55 = vmul.f32 %v1783_v34, %v3964_v22  ;;  %v1258_v2 = vmul.f32 %v1784_v39, %v3965_v12  ;;  %1377 = vst [vmem:[%s3281_s13 + $0x268] sm:$0xff] %v1249_v60  ;;  %1378 = vst [vmem:[%s3281_s13 + $0x270] sm:$0xff] %v1250_v6  ;;  %v1785_v62 = vld [vmem:[%s1921_s10 + $0x2b8] sm:$0xff]  ;;  %v3966_v18 = vld [vmem:[#allocation19_spill] sm:$0xff] }
 0x195   : > { %v1259_v40 = vmul.f32 %v1785_v62, %v3966_v18  ;;  %v1786_v26 = vld [vmem:[%s1921_s10 + $0x2c0] sm:$0xff]  ;;  %v3967_v3 = vld [vmem:[#allocation40_spill] sm:$0xff]  ;;  %v3968_v42 = vld [vmem:[#allocation22_spill] sm:$0xff]  ;;  %1379 = vst [vmem:[%s3281_s13 + $0x278] sm:$0xff] %v1251_v17 }
 0x196   : > { %v1260_v58 = vmul.f32 %v1786_v26, %v3967_v3  ;;  %v1787_v15 = vld [vmem:[%s1921_s10 + $0x2c8] sm:$0xff]  ;;  %v1788_v44 = vld [vmem:[%s1921_s10 + $0x2d0] sm:$0xff]  ;;  %v3969_v32 = vld [vmem:[#allocation58_spill] sm:$0xff]  ;;  %1380 = vst [vmem:[%s3281_s13 + $0x280] sm:$0xff] %v1252_v49 }
 0x197   : > { %v1261_v54 = vmul.f32 %v1787_v15, %v3968_v42  ;;  %v1262_v7 = vmul.f32 %v1788_v44, %v3969_v32  ;;  %1381 = vst [vmem:[%s3281_s13 + $0x288] sm:$0xff] %v1253_v29  ;;  %1382 = vst [vmem:[%s3281_s13 + $0x290] sm:$0xff] %v1254_v23  ;;  %v1789_v19 = vld [vmem:[%s1921_s10 + $0x2d8] sm:$0xff]  ;;  %v3970_v9 = vld [vmem:[#allocation61_spill] sm:$0xff] }
 0x198   : > { %v1263_v0 = vmul.f32 %v1789_v19, %v3970_v9  ;;  %v1790_v53 = vld [vmem:[%s1921_s10 + $0x2e0] sm:$0xff]  ;;  %v3971_v60 = vld [vmem:[#allocation64_spill] sm:$0xff]  ;;  %v1792_v57 = vld [vmem:[%s1921_s10 + $0x2f0] sm:$0xff]  ;;  %1383 = vst [vmem:[%s3281_s13 + $0x298] sm:$0xff] %v1255_v31 }
 0x199   : > { %v1264_v63 = vmul.f32 %v1790_v53, %v3971_v60  ;;  %v1791_v38 = vld [vmem:[%s1921_s10 + $0x2e8] sm:$0xff]  ;;  %v3973_v17 = vld [vmem:[#allocation73_spill] sm:$0xff]  ;;  %1384 = vst [vmem:[%s3281_s13 + $0x2a0] sm:$0xff] %v1256_v10  ;;  %1385 = vst [vmem:[%s3281_s13 + $0x2a8] sm:$0xff] %v1257_v55 }
 0x19a   : > { %v3972_v6 = vld [vmem:[#allocation4_spill] sm:$0xff]  ;;  %v1266_v36 = vmul.f32 %v1792_v57, %v3973_v17  ;;  %1386 = vst [vmem:[%s3281_s13 + $0x2b0] sm:$0xff] %v1258_v2  ;;  %v1793_v37 = vld [vmem:[%s1921_s10 + $0x2f8] sm:$0xff]  ;;  %v1794_v59 = vld [vmem:[%s1921_s10 + $0x300] sm:$0xff] }
 0x19b   : > { %v1265_v35 = vmul.f32 %v1791_v38, %v3972_v6  ;;  %v1267_v49 = vmul.f32 %v1793_v37, %v3210_v51  ;;  %v3974_v21 = vld [vmem:[#allocation36_spill] sm:$0xff]  ;;  %v3975_v47 = vld [vmem:[#allocation18_spill] sm:$0xff]  ;;  %v1796_v5 = vld [vmem:[%s1921_s10 + $0x310] sm:$0xff]  ;;  %1387 = vst [vmem:[%s3281_s13 + $0x2b8] sm:$0xff] %v1259_v40 }
 0x19c   : > { %v1268_v29 = vmul.f32 %v1794_v59, %v3974_v21  ;;  %v1795_v45 = vld [vmem:[%s1921_s10 + $0x308] sm:$0xff]  ;;  %v3976_v43 = vld [vmem:[#allocation39_spill] sm:$0xff]  ;;  %1388 = vst [vmem:[%s3281_s13 + $0x2c0] sm:$0xff] %v1260_v58  ;;  %1389 = vst [vmem:[%s3281_s13 + $0x2c8] sm:$0xff] %v1261_v54 }
 0x19d   : > { %v1269_v23 = vmul.f32 %v1795_v45, %v3975_v47  ;;  %v1270_v31 = vmul.f32 %v1796_v5, %v3976_v43  ;;  %1390 = vst [vmem:[%s3281_s13 + $0x2d0] sm:$0xff] %v1262_v7  ;;  %v1797_v51 = vld [vmem:[%s1921_s10 + $0x318] sm:$0xff]  ;;  %v3977_v50 = vld [vmem:[#allocation21_spill] sm:$0xff]  ;;  %v1798_v10 = vld [vmem:[%s1921_s10 + $0x320] sm:$0xff] }
 0x19e   : > { %v1271_v27 = vmul.f32 %v1797_v51, %v3977_v50  ;;  %v3978_v34 = vld [vmem:[#allocation42_spill] sm:$0xff]  ;;  %v1799_v55 = vld [vmem:[%s1921_s10 + $0x328] sm:$0xff]  ;;  %v3979_v39 = vld [vmem:[#allocation59_spill] sm:$0xff]  ;;  %1391 = vst [vmem:[%s3281_s13 + $0x2d8] sm:$0xff] %v1263_v0 }
 0x19f   : > { %v1272_v22 = vmul.f32 %v1798_v10, %v3978_v34  ;;  %v1273_v12 = vmul.f32 %v1799_v55, %v3979_v39  ;;  %v1800_v2 = vld [vmem:[%s1921_s10 + $0x330] sm:$0xff]  ;;  %v3980_v62 = vld [vmem:[#allocation62_spill] sm:$0xff]  ;;  %1392 = vst [vmem:[%s3281_s13 + $0x2e0] sm:$0xff] %v1264_v63  ;;  %1393 = vst [vmem:[%s3281_s13 + $0x2e8] sm:$0xff] %v1265_v35 }
 0x1a0   : > { %v1274_v18 = vmul.f32 %v1800_v2, %v3980_v62  ;;  %1394 = vst [vmem:[%s3281_s13 + $0x2f0] sm:$0xff] %v1266_v36  ;;  %v1801_v40 = vld [vmem:[%s1921_s10 + $0x338] sm:$0xff]  ;;  %v3981_v26 = vld [vmem:[#allocation3_spill] sm:$0xff]  ;;  %v1803_v54 = vld [vmem:[%s1921_s10 + $0x348] sm:$0xff] }
 0x1a1   : > { %v1275_v3 = vmul.f32 %v1801_v40, %v3981_v26  ;;  %v1802_v58 = vld [vmem:[%s1921_s10 + $0x340] sm:$0xff]  ;;  %v1277_v44 = vmul.f32 %v1803_v54, %v3201_v20  ;;  %v1804_v32 = vld [vmem:[%s1921_s10 + $0x350] sm:$0xff]  ;;  %1395 = vst [vmem:[%s3281_s13 + $0x2f8] sm:$0xff] %v1267_v49  ;;  %1396 = vst [vmem:[%s3281_s13 + $0x300] sm:$0xff] %v1268_v29 }
 0x1a2   : > { %v3982_v15 = vld [vmem:[#allocation71_spill] sm:$0xff]  ;;  %v1278_v7 = vmul.f32 %v1804_v32, %v3214_v61  ;;  %1397 = vst [vmem:[%s3281_s13 + $0x308] sm:$0xff] %v1269_v23  ;;  %1398 = vst [vmem:[%s3281_s13 + $0x310] sm:$0xff] %v1270_v31  ;;  %v1805_v19 = vld [vmem:[%s1921_s10 + $0x358] sm:$0xff] }
 0x1a3   : > { %v1276_v42 = vmul.f32 %v1802_v58, %v3982_v15  ;;  %v1279_v9 = vmul.f32 %v1805_v19, %v3218_v41  ;;  %v1806_v0 = vld [vmem:[%s1921_s10 + $0x360] sm:$0xff]  ;;  %v1807_v53 = vld [vmem:[%s1921_s10 + $0x368] sm:$0xff]  ;;  %v1808_v61 = vld [vmem:[%s1921_s10 + $0x370] sm:$0xff]  ;;  %1399 = vst [vmem:[%s3281_s13 + $0x318] sm:$0xff] %v1271_v27 }
 0x1a4   : > { %v1280_v20 = vmul.f32 %v1806_v0, %v3222_v13  ;;  %v1281_v60 = vmul.f32 %v1807_v53, %v3226_v4  ;;  %v1282_v63 = vmul.f32 %v1808_v61, %v3230_v28  ;;  %1400 = vst [vmem:[%s3281_s13 + $0x320] sm:$0xff] %v1272_v22  ;;  %1401 = vst [vmem:[%s3281_s13 + $0x328] sm:$0xff] %v1273_v12  ;;  %v1809_v41 = vld [vmem:[%s1921_s10 + $0x378] sm:$0xff]  ;;  %v1810_v38 = vld [vmem:[%s1921_s10 + $0x380] sm:$0xff] }
 0x1a5   : > { %1402 = vst [vmem:[%s3281_s13 + $0x330] sm:$0xff] %v1274_v18  ;;  %v1283_v13 = vmul.f32 %v1809_v41, %v3234_v25  ;;  %v1284_v4 = vmul.f32 %v1810_v38, %v3238_v52  ;;  %v1811_v6 = vld [vmem:[%s1921_s10 + $0x388] sm:$0xff]  ;;  %v1812_v28 = vld [vmem:[%s1921_s10 + $0x390] sm:$0xff]  ;;  %1403 = vst [vmem:[%s3281_s13 + $0x338] sm:$0xff] %v1275_v3 }
 0x1a6   : > { %v1285_v35 = vmul.f32 %v1811_v6, %v3242_v48  ;;  %v1286_v57 = vmul.f32 %v1812_v28, %v3246_v16  ;;  %1404 = vst [vmem:[%s3281_s13 + $0x340] sm:$0xff] %v1276_v42  ;;  %1405 = vst [vmem:[%s3281_s13 + $0x348] sm:$0xff] %v1277_v44  ;;  %v1813_v25 = vld [vmem:[%s1921_s10 + $0x398] sm:$0xff]  ;;  %v1814_v17 = vld [vmem:[%s1921_s10 + $0x3a0] sm:$0xff] }
 0x1a7   : > { %1406 = vst [vmem:[%s3281_s13 + $0x350] sm:$0xff] %v1278_v7  ;;  %v1287_v52 = vmul.f32 %v1813_v25, %v3250_v14  ;;  %v1288_v48 = vmul.f32 %v1814_v17, %v3254_v30  ;;  %v1815_v36 = vld [vmem:[%s1921_s10 + $0x3a8] sm:$0xff]  ;;  %v1816_v16 = vld [vmem:[%s1921_s10 + $0x3b0] sm:$0xff]  ;;  %1407 = vst [vmem:[%s3281_s13 + $0x358] sm:$0xff] %v1279_v9 }
 0x1a8   : > { %v1289_v37 = vmul.f32 %v1815_v36, %v3258_v24  ;;  %v1290_v49 = vmul.f32 %v1816_v16, %v3262_v46  ;;  %1408 = vst [vmem:[%s3281_s13 + $0x360] sm:$0xff] %v1280_v20  ;;  %1409 = vst [vmem:[%s3281_s13 + $0x368] sm:$0xff] %v1281_v60  ;;  %v1817_v14 = vld [vmem:[%s1921_s10 + $0x3b8] sm:$0xff]  ;;  %v1818_v59 = vld [vmem:[%s1921_s10 + $0x3c0] sm:$0xff] }
 0x1a9   : > { %1410 = vst [vmem:[%s3281_s13 + $0x370] sm:$0xff] %v1282_v63  ;;  %v1291_v30 = vmul.f32 %v1817_v14, %v3265_v8  ;;  %v1292_v24 = vmul.f32 %v1818_v59, %v3268_v33  ;;  %v1819_v21 = vld [vmem:[%s1921_s10 + $0x3c8] sm:$0xff]  ;;  %v1820_v46 = vld [vmem:[%s1921_s10 + $0x3d0] sm:$0xff]  ;;  %v3983_v45 = vld [vmem:[#allocation74_spill] sm:$0xff] }
 0x1aa   : > { %v1293_v29 = vmul.f32 %v1819_v21, %v3271_v1  ;;  %v1294_v47 = vmul.f32 %v1820_v46, %v3983_v45  ;;  %1411 = vst [vmem:[%s3281_s13 + $0x378] sm:$0xff] %v1283_v13  ;;  %1412 = vst [vmem:[%s3281_s13 + $0x380] sm:$0xff] %v1284_v4  ;;  %v1821_v8 = vld [vmem:[%s1921_s10 + $0x3d8] sm:$0xff]  ;;  %v1822_v23 = vld [vmem:[%s1921_s10 + $0x3e0] sm:$0xff] }
 0x1ab   : > { %1413 = vst [vmem:[%s3281_s13 + $0x388] sm:$0xff] %v1285_v35  ;;  %1414 = vst [vmem:[%s3281_s13 + $0x390] sm:$0xff] %v1286_v57  ;;  %v1295_v33 = vmul.f32 %v1821_v8, %v3284_v11  ;;  %v3984_v1 = vld [vmem:[#allocation75_spill] sm:$0xff]  ;;  %v1823_v43 = vld [vmem:[%s1921_s10 + $0x3e8] sm:$0xff] }
 0x1ac   : > { %v1296_v5 = vmul.f32 %v1822_v23, %v3984_v1  ;;  %v3985_v31 = vld [vmem:[#allocation76_spill] sm:$0xff]  ;;  %v1824_v50 = vld [vmem:[%s1921_s10 + $0x3f0] sm:$0xff]  ;;  %1415 = vst [vmem:[%s3281_s13 + $0x398] sm:$0xff] %v1287_v52  ;;  %1416 = vst [vmem:[%s3281_s13 + $0x3a0] sm:$0xff] %v1288_v48 }
 0x1ad   : > { %v1297_v51 = vmul.f32 %v1823_v43, %v3985_v31  ;;  %v3986_v27 = vld [vmem:[#allocation77_spill] sm:$0xff]  ;;  %1417 = vst [vmem:[%s3281_s13 + $0x3a8] sm:$0xff] %v1289_v37  ;;  %1418 = vst [vmem:[%s3281_s13 + $0x3b0] sm:$0xff] %v1290_v49  ;;  %v1825_v11 = vld [vmem:[%s1921_s10 + $0x3f8] sm:$0xff] }
 0x1ae   : > { %v1298_v10 = vmul.f32 %v1824_v50, %v3986_v27  ;;  %v1299_v34 = vmul.f32 %v1825_v11, %v3296_v56  ;;  %1419 = vst [vmem:[%s3281_s13 + $0x3b8] sm:$0xff] %v1291_v30  ;;  %1420 = vst [vmem:[%s3281_s13 + $0x3c0] sm:$0xff] %v1292_v24 }
 0x1af   : > { %1421 = vst [vmem:[%s3281_s13 + $0x3c8] sm:$0xff] %v1293_v29  ;;  %1422 = vst [vmem:[%s3281_s13 + $0x3d0] sm:$0xff] %v1294_v47 }
 0x1b0   : > { %1423 = vst [vmem:[%s3281_s13 + $0x3d8] sm:$0xff] %v1295_v33  ;;  %1424 = vst [vmem:[%s3281_s13 + $0x3e0] sm:$0xff] %v1296_v5 }
 0x1b1   : > { %1425 = vst [vmem:[%s3281_s13 + $0x3e8] sm:$0xff] %v1297_v51  ;;  %1426 = vst [vmem:[%s3281_s13 + $0x3f0] sm:$0xff] %v1298_v10 }
 0x1b2   : > { %1427 = vst [vmem:[%s3281_s13 + $0x3f8] sm:$0xff] %v1299_v34 }
 0x1b3 PF: > { %s15_s19 = sadd.s32 1, %s1848_s19   ;;  %s3987_s17 = smov %s1844_s18 }
 0x1b4   : > { %p12_p5 = scmp.ge.s32.totalorder %s15_s19, 4   ;;  %s3988_s18 = smov %s3990_s3 }
 0x1b6   :  { %14 = sbr.rel (!%p12_p5) target bundleno = 2 (0x2), region = 69 }

</bundles_post_ra>
